<compile_context>
chip_gen: v7x
topology: tpu7x:2x2x1
jax: 0.10.0
libtpu: 0.0.40
codegen_flags: <defaults>
</compile_context>

<pallas_src>
import jax
import jax.numpy as jnp
from jax.experimental import pallas as pl
from jax.experimental.pallas import tpu as pltpu


# --------------------------------------------------------------------------- kernel
def _ensemble_member_kernel(x_ref, wfront_ref, wfc_ref, wfc1_ref, bias_ref, out_ref):
    f32 = jnp.float32
    bf16 = jnp.bfloat16

    b = bias_ref[...]                                   # [3, 1024] f32
    b_cn = b[0:1, :]                                    # [b_cat | b_num]  [1, 1024]
    b_fc = b[1:2, 0:768]                                # [1, 768]
    b_fc1 = b[2:3, 0:512]                               # [1, 512]

    # merged front-end: one K=32 bf16 matmul (one-hot joint cat + numerics)
    pre = jnp.dot(x_ref[...], wfront_ref[...], preferred_element_type=f32) + b_cn
    h = jnp.maximum(pre, 0.0).astype(bf16)              # [TM, 1024]

    # tab_fc: Linear(1024 -> 768) + ReLU   (bf16 weights, f32 accumulation)
    feat = jnp.dot(h, wfc_ref[...], preferred_element_type=f32) + b_fc
    feat = jnp.maximum(feat, 0.0).astype(bf16)          # [TM, 768]

    # tab_fc1: Linear(768 -> 512) + ReLU
    out = jnp.dot(feat, wfc1_ref[...], preferred_element_type=f32) + b_fc1
    out_ref[...] = jnp.maximum(out, 0.0).astype(out_ref.dtype)   # bf16 store


# ----------------------------------------------------------------- params / packing
def init_member_params(key):
    """One member's parameters in the original PyTorch layout ([in, out] weights)."""
    f32 = jnp.float32
    ks = jax.random.split(key, 16)

    def lin(kw, kb, fan_in, fan_out):
        bound = 1.0 / jnp.sqrt(float(fan_in))
        w = jax.random.uniform(kw, (fan_in, fan_out), f32, -bound, bound)
        b = jax.random.uniform(kb, (fan_out,), f32, -bound, bound)
        return w, b

    p = {}
    p["emb0"] = jax.random.normal(ks[0], (4, 12), f32)      # nn.Embedding(4, 12)
    p["emb1"] = jax.random.normal(ks[1], (3, 9), f32)       # nn.Embedding(3, 9)
    p["w_lin0"], p["b_lin0"] = lin(ks[2], ks[3], 12, 32)    # Linear(12, 32)
    p["w_lin1"], p["b_lin1"] = lin(ks[4], ks[5], 9, 32)     # Linear(9, 32)
    p["w_cat"], p["b_cat"] = lin(ks[6], ks[7], 64, 512)     # Linear(64, 512)
    p["w_num"], p["b_num"] = lin(ks[8], ks[9], 13, 512)     # Linear(13, 512)
    p["w_fc"], p["b_fc"] = lin(ks[10], ks[11], 1024, 768)   # Linear(1024, 768)
    p["w_fc1"], p["b_fc1"] = lin(ks[12], ks[13], 768, 512)  # Linear(768, 512)
    return p


def pack_member_params(members):
    """Fold the embedding front-end and pack E member param sets into 4 tensors."""
    f32, bf16 = jnp.float32, jnp.bfloat16
    w_front, w_fc, w_fc1, bias = [], [], [], []
    for p in members:
        # fold emb -> Linear -> ReLU -> cat_emLIN split-weights into a joint table
        h0 = jax.nn.relu(p["emb0"] @ p["w_lin0"] + p["b_lin0"])       # [4, 32]
        h1 = jax.nn.relu(p["emb1"] @ p["w_lin1"] + p["b_lin1"])       # [3, 32]
        cat_a = h0 @ p["w_cat"][:32]                                  # [4, 512]
        cat_b = h1 @ p["w_cat"][32:]                                  # [3, 512]
        joint = (cat_a[:, None, :] + cat_b[None, :, :]).reshape(12, 512)

        # merged front weight [32, 1024]:
        #   rows 0-11,  cols   0-511 : joint categorical table
        #   rows 12-24, cols 512-1023: numeric Linear(13,512) weight
        wf = jnp.zeros((32, 1024), f32)
        wf = wf.at[0:12, 0:512].set(joint)
        wf = wf.at[12:25, 512:1024].set(p["w_num"])
        w_front.append(wf.astype(bf16))

        w_fc.append(p["w_fc"].astype(bf16))                           # [1024, 768]
        w_fc1.append(p["w_fc1"].astype(bf16))                         # [768, 512]

        b = jnp.zeros((3, 1024), f32)
        b = b.at[0, :512].set(p["b_cat"]).at[0, 512:].set(p["b_num"])
        b = b.at[1, :768].set(p["b_fc"]).at[2, :512].set(p["b_fc1"])
        bias.append(b)                                                # [3, 1024]

    return {"w_front": jnp.stack(w_front), "w_fc": jnp.stack(w_fc),
            "w_fc1": jnp.stack(w_fc1), "bias": jnp.stack(bias)}


# --------------------------------------------------------------------------- wrapper
def _round_up(x, m):
    return ((x + m - 1) // m) * m


def _device_defaults():
    """(batch_tile, weight_buffer_depth) per chip generation."""
    try:
        kind = jax.devices()[0].device_kind.lower()
    except Exception:
        kind = ""
    if "v6" in kind or "v7" in kind:
        return 512, 2          # fast HBM, big MXU: bigger tile, double buffer enough
    if "v5e" in kind or ("v5" in kind and "lite" in kind):
        return 256, 3          # slow HBM: 3-deep weight buffer hides e-boundary DMA
    return 256, 2


def _preprocess_tab(tarb):
    """tarb [B,15] (2 id cols + 13 numerics) -> [B,32] bf16 front-end input.
    lanes 0-11: one-hot(joint id), lanes 12-24: numerics, lanes 25-31: zero."""
    bf16 = jnp.bfloat16
    idx0 = jnp.clip(tarb[:, 0].astype(jnp.int32), 0, 3)
    idx1 = jnp.clip(tarb[:, 1].astype(jnp.int32), 0, 2)
    oh = jax.nn.one_hot(idx0 * 3 + idx1, 12, dtype=bf16)              # [B, 12]
    num = tarb[:, 2:].astype(bf16)                                    # [B, 13]
    pad = jnp.zeros((tarb.shape[0], 7), bf16)
    return jnp.concatenate([oh, num, pad], axis=1)                    # [B, 32]


def ensemble_M_forward(tarb, kparams, *, batch_tile=None):
    """Run all E members on tarb; return (score, vote, features[E,B,512] bf16)."""
    f32 = jnp.float32
    w_front, w_fc = kparams["w_front"], kparams["w_fc"]
    w_fc1, bias = kparams["w_fc1"], kparams["bias"]
    E = w_front.shape[0]
    B = tarb.shape[0]

    tm_default, wdepth = _device_defaults()
    tm = batch_tile if batch_tile is not None else tm_default
    tm = min(tm, _round_up(B, 128))                    # don't compute dead rows
    b_pad = _round_up(B, tm)

    x32 = _preprocess_tab(tarb.astype(f32))            # [B, 32] bf16
    if b_pad != B:
        x32 = jnp.pad(x32, ((0, b_pad - B), (0, 0)))

    n_bt = b_pad // tm
    grid = (E, n_bt)
    # v7x megacore: shard E (distinct members per core, 1x weight traffic) when the
    # batch is small; shard the batch axis when it is large.
    dims = ("parallel", "arbitrary") if n_bt <= 2 else ("arbitrary", "parallel")

    def _weight_spec(shape):
        if wdepth > 2:
            return pl.BlockSpec(shape, lambda e, i: (e, 0, 0),
                                pipeline_mode=pl.Buffered(wdepth))
        return pl.BlockSpec(shape, lambda e, i: (e, 0, 0))

    flops = 2 * E * b_pad * (32 * 1024 + 1024 * 768 + 768 * 512)
    weight_bytes = (w_front.nbytes + w_fc.nbytes + w_fc1.nbytes + bias.nbytes)
    bytes_accessed = int(weight_bytes + E * x32.nbytes + E * b_pad * 512 * 2)

    out = pl.pallas_call(
        _ensemble_member_kernel,
        out_shape=jax.ShapeDtypeStruct((E, b_pad, 512), jnp.bfloat16),
        grid=grid,
        in_specs=[
            pl.BlockSpec((tm, 32), lambda e, i: (i, 0)),             # front-end input
            pl.BlockSpec((None, 32, 1024), lambda e, i: (e, 0, 0)),  # merged front W
            _weight_spec((None, 1024, 768)),                         # tab_fc W (bf16)
            _weight_spec((None, 768, 512)),                          # tab_fc1 W (bf16)
            pl.BlockSpec((None, 3, 1024), lambda e, i: (e, 0, 0)),   # packed biases
        ],
        out_specs=pl.BlockSpec((None, tm, 512), lambda e, i: (e, i, 0)),
        compiler_params=pltpu.CompilerParams(
            dimension_semantics=dims,
            vmem_limit_bytes=32 * 1024 * 1024),
        cost_estimate=pl.CostEstimate(
            flops=flops, transcendentals=0, bytes_accessed=bytes_accessed),
    )(x32, w_front, w_fc, w_fc1, bias)

    features = out[:, :B, :]                           # [E, B, 512] bf16
    score = features[:, 0, 0].astype(f32)              # output.tolist()[0][0] / member
    vote = jnp.where(score >= 0.5, 1, 0)               # torch.where(output >= 0.5,1,0)
    return score, vote, features


# ------------------------------------------------------------------------ references
def _dot_hp(a, b):
    return jnp.dot(a, b, precision=jax.lax.Precision.HIGHEST)


def member_forward_f32(tarb, p):
    """Original module structure, all f32 (semantic reference)."""
    idx0 = tarb[:, 0].astype(jnp.int32)
    idx1 = tarb[:, 1].astype(jnp.int32)
    h0 = jax.nn.relu(_dot_hp(p["emb0"][idx0], p["w_lin0"]) + p["b_lin0"])
    h1 = jax.nn.relu(_dot_hp(p["emb1"][idx1], p["w_lin1"]) + p["b_lin1"])
    cat_out = jax.nn.relu(_dot_hp(jnp.concatenate([h0, h1], 1), p["w_cat"]) + p["b_cat"])
    num_out = jax.nn.relu(_dot_hp(tarb[:, 2:], p["w_num"]) + p["b_num"])
    feat = jnp.concatenate([cat_out, num_out], 1)
    feat = jax.nn.relu(_dot_hp(feat, p["w_fc"]) + p["b_fc"])
    return jax.nn.relu(_dot_hp(feat, p["w_fc1"]) + p["b_fc1"])


def member_forward_matched(tarb, p):
    """Same structure, mirroring the kernel's bf16 quantization exactly."""
    f32, bf16 = jnp.float32, jnp.bfloat16
    idx0 = jnp.clip(tarb[:, 0].astype(jnp.int32), 0, 3)
    idx1 = jnp.clip(tarb[:, 1].astype(jnp.int32), 0, 2)
    h0 = jax.nn.relu(_dot_hp(p["emb0"], p["w_lin0"]) + p["b_lin0"])
    h1 = jax.nn.relu(_dot_hp(p["emb1"], p["w_lin1"]) + p["b_lin1"])
    cat_a = _dot_hp(h0, p["w_cat"][:32])
    cat_b = _dot_hp(h1, p["w_cat"][32:])
    joint = (cat_a[:, None, :] + cat_b[None, :, :]).reshape(12, 512)
    joint_bf = joint.astype(bf16).astype(f32)
    cat_pre = joint_bf[idx0 * 3 + idx1] + p["b_cat"]
    num_bf = tarb[:, 2:].astype(bf16).astype(f32)
    wnum_bf = p["w_num"].astype(bf16).astype(f32)
    num_pre = _dot_hp(num_bf, wnum_bf) + p["b_num"]
    h = jax.nn.relu(jnp.concatenate([cat_pre, num_pre], 1)).astype(bf16).astype(f32)
    feat = jax.nn.relu(_dot_hp(h, p["w_fc"].astype(bf16).astype(f32)) + p["b_fc"])
    feat = feat.astype(bf16).astype(f32)
    out = jax.nn.relu(_dot_hp(feat, p["w_fc1"].astype(bf16).astype(f32)) + p["b_fc1"])
    return out.astype(bf16)


# ------------------------------------------------------------------------------ main
if __name__ == "__main__":
    key = jax.random.PRNGKey(0)
    k_members, k_data = jax.random.split(key)

    E = 3
    members = [init_member_params(k) for k in jax.random.split(k_members, E)]
    kparams = pack_member_params(members)

    for B in (8, 200):   # 8 = small demo; 200 exercises tile-clamping / batch padding
        kc0, kc1, kn = jax.random.split(jax.random.fold_in(k_data, B), 3)
        cat0 = jax.random.randint(kc0, (B, 1), 0, 4).astype(jnp.float32)
        cat1 = jax.random.randint(kc1, (B, 1), 0, 3).astype(jnp.float32)
        numeric = jax.random.normal(kn, (B, 13), jnp.float32)
        tarb = jnp.concatenate([cat0, cat1, numeric], axis=1)     # [B, 15]

        score, vote, feats = ensemble_M_forward(tarb, kparams)
        feats = jax.block_until_ready(feats)
        assert feats.shape == (E, B, 512), feats.shape
        assert score.shape == (E,) and vote.shape == (E,)

        feats32 = feats.astype(jnp.float32)
        for e in range(E):
            ref_m = member_forward_matched(tarb, members[e]).astype(jnp.float32)
            ref_f = member_forward_f32(tarb, members[e])
            assert jnp.allclose(feats32[e], ref_m, rtol=1e-2, atol=1e-2), \
                f"member {e} mismatch vs bf16-matched reference (B={B})"
            assert jnp.allclose(feats32[e], ref_f, rtol=3e-2, atol=3e-2), \
                f"member {e} mismatch vs f32 reference (B={B})"
        ref_scores = jnp.stack(
            [member_forward_matched(tarb, members[e])[0, 0] for e in range(E)]
        ).astype(jnp.float32)
        assert jnp.allclose(score, ref_scores, rtol=1e-2, atol=1e-2)

    print("KERNEL_OK")
</pallas_src>

<mosaic_0001>
module attributes {stable_mosaic.version = 11 : i64} {
  func.func @_ensemble_member_kernel(%arg0: i32, %arg1: i32, %arg2: memref<128x32xbf16, #tpu.memory_space<vmem>>, %arg3: memref<1x32x1024xbf16, #tpu.memory_space<vmem>>, %arg4: memref<1x1024x768xbf16, #tpu.memory_space<vmem>>, %arg5: memref<1x768x512xbf16, #tpu.memory_space<vmem>>, %arg6: memref<1x3x1024xf32, #tpu.memory_space<vmem>>, %arg7: memref<1x128x512xbf16, #tpu.memory_space<vmem>>) attributes {dimension_semantics = [#tpu.dimension_semantics<parallel>, #tpu.dimension_semantics<arbitrary>], iteration_bounds = array<i64: 3, 1>, scalar_prefetch = 0 : i64, scratch_operands = 0 : i64, tpu.core_type = #tpu.core_type<tc>, window_params = [{transform_indices = @transform_0, window_bounds = array<i64: 128, 32>}, {transform_indices = @transform_1, window_bounds = array<i64: 1, 32, 1024>}, {transform_indices = @transform_2, window_bounds = array<i64: 1, 1024, 768>}, {transform_indices = @transform_3, window_bounds = array<i64: 1, 768, 512>}, {transform_indices = @transform_4, window_bounds = array<i64: 1, 3, 1024>}, {transform_indices = @transform_5, window_bounds = array<i64: 1, 128, 512>}]} {
    %c0 = arith.constant 0 : index
    %c0_0 = arith.constant 0 : index
    %c0_1 = arith.constant 0 : index
    %0 = vector.load %arg6[%c0, %c0_0, %c0_1] : memref<1x3x1024xf32, #tpu.memory_space<vmem>>, vector<1x3x1024xf32>
    %1 = vector.shape_cast %0 : vector<1x3x1024xf32> to vector<3x1024xf32>
    %2 = vector.extract_strided_slice %1 {offsets = [0, 0], sizes = [1, 1024], strides = [1, 1]} : vector<3x1024xf32> to vector<1x1024xf32>
    %3 = vector.extract_strided_slice %1 {offsets = [1, 0], sizes = [1, 768], strides = [1, 1]} : vector<3x1024xf32> to vector<1x768xf32>
    %4 = vector.extract_strided_slice %1 {offsets = [2, 0], sizes = [1, 512], strides = [1, 1]} : vector<3x1024xf32> to vector<1x512xf32>
    %c0_2 = arith.constant 0 : index
    %c0_3 = arith.constant 0 : index
    %5 = vector.load %arg2[%c0_2, %c0_3] : memref<128x32xbf16, #tpu.memory_space<vmem>>, vector<128x32xbf16>
    %c0_4 = arith.constant 0 : index
    %c0_5 = arith.constant 0 : index
    %c0_6 = arith.constant 0 : index
    %6 = vector.load %arg3[%c0_4, %c0_5, %c0_6] : memref<1x32x1024xbf16, #tpu.memory_space<vmem>>, vector<1x32x1024xbf16>
    %7 = vector.shape_cast %6 : vector<1x32x1024xbf16> to vector<32x1024xbf16>
    %cst = arith.constant dense<0.000000e+00> : vector<128x1024xf32>
    %8 = tpu.matmul %5, %7, %cst {dimension_numbers = #tpu.dot_dimension_numbers<[1], [0], [0], [1], [0, 0, 1, 1], [], []>} : vector<128x32xbf16>, vector<32x1024xbf16>, vector<128x1024xf32> -> vector<128x1024xf32>
    %9 = vector.broadcast %2 : vector<1x1024xf32> to vector<128x1024xf32>
    %10 = arith.addf %8, %9 : vector<128x1024xf32>
    %cst_7 = arith.constant 0.000000e+00 : f32
    %11 = vector.broadcast %cst_7 : f32 to vector<128x1024xf32>
    %12 = arith.maximumf %10, %11 : vector<128x1024xf32>
    %13 = arith.truncf %12 : vector<128x1024xf32> to vector<128x1024xbf16>
    %c0_8 = arith.constant 0 : index
    %c0_9 = arith.constant 0 : index
    %c0_10 = arith.constant 0 : index
    %14 = vector.load %arg4[%c0_8, %c0_9, %c0_10] : memref<1x1024x768xbf16, #tpu.memory_space<vmem>>, vector<1x1024x768xbf16>
    %15 = vector.shape_cast %14 : vector<1x1024x768xbf16> to vector<1024x768xbf16>
    %cst_11 = arith.constant dense<0.000000e+00> : vector<128x768xf32>
    %16 = tpu.matmul %13, %15, %cst_11 {dimension_numbers = #tpu.dot_dimension_numbers<[1], [0], [0], [1], [0, 0, 1, 1], [], []>} : vector<128x1024xbf16>, vector<1024x768xbf16>, vector<128x768xf32> -> vector<128x768xf32>
    %17 = vector.broadcast %3 : vector<1x768xf32> to vector<128x768xf32>
    %18 = arith.addf %16, %17 : vector<128x768xf32>
    %cst_12 = arith.constant 0.000000e+00 : f32
    %19 = vector.broadcast %cst_12 : f32 to vector<128x768xf32>
    %20 = arith.maximumf %18, %19 : vector<128x768xf32>
    %21 = arith.truncf %20 : vector<128x768xf32> to vector<128x768xbf16>
    %c0_13 = arith.constant 0 : index
    %c0_14 = arith.constant 0 : index
    %c0_15 = arith.constant 0 : index
    %22 = vector.load %arg5[%c0_13, %c0_14, %c0_15] : memref<1x768x512xbf16, #tpu.memory_space<vmem>>, vector<1x768x512xbf16>
    %23 = vector.shape_cast %22 : vector<1x768x512xbf16> to vector<768x512xbf16>
    %cst_16 = arith.constant dense<0.000000e+00> : vector<128x512xf32>
    %24 = tpu.matmul %21, %23, %cst_16 {dimension_numbers = #tpu.dot_dimension_numbers<[1], [0], [0], [1], [0, 0, 1, 1], [], []>} : vector<128x768xbf16>, vector<768x512xbf16>, vector<128x512xf32> -> vector<128x512xf32>
    %25 = vector.broadcast %4 : vector<1x512xf32> to vector<128x512xf32>
    %26 = arith.addf %24, %25 : vector<128x512xf32>
    %cst_17 = arith.constant 0.000000e+00 : f32
    %27 = vector.broadcast %cst_17 : f32 to vector<128x512xf32>
    %28 = arith.maximumf %26, %27 : vector<128x512xf32>
    %29 = arith.truncf %28 : vector<128x512xf32> to vector<128x512xbf16>
    %c0_18 = arith.constant 0 : index
    %c0_19 = arith.constant 0 : index
    %c0_20 = arith.constant 0 : index
    %30 = vector.load %arg7[%c0_18, %c0_19, %c0_20] : memref<1x128x512xbf16, #tpu.memory_space<vmem>>, vector<1x128x512xbf16>
    %31 = vector.shape_cast %30 : vector<1x128x512xbf16> to vector<128x512xbf16>
    %32 = vector.shape_cast %29 : vector<128x512xbf16> to vector<1x128x512xbf16>
    tpu.vector_store %arg7[%c0_18, %c0_19, %c0_20], %32 {strides = array<i32>} : memref<1x128x512xbf16, #tpu.memory_space<vmem>>, vector<1x128x512xbf16>,
    return
  }
  func.func @transform_0(%arg0: i32, %arg1: i32) -> (i32, i32) {
    %c0_i32 = arith.constant 0 : i32
    %c0_i32_0 = arith.constant 0 : i32
    return %arg1, %c0_i32 : i32, i32
  }
  func.func @transform_1(%arg0: i32, %arg1: i32) -> (i32, i32, i32) {
    %c0_i32 = arith.constant 0 : i32
    %c0_i32_0 = arith.constant 0 : i32
    %c0_i32_1 = arith.constant 0 : i32
    return %arg0, %c0_i32, %c0_i32_0 : i32, i32, i32
  }
  func.func @transform_2(%arg0: i32, %arg1: i32) -> (i32, i32, i32) {
    %c0_i32 = arith.constant 0 : i32
    %c0_i32_0 = arith.constant 0 : i32
    %c0_i32_1 = arith.constant 0 : i32
    return %arg0, %c0_i32, %c0_i32_0 : i32, i32, i32
  }
  func.func @transform_3(%arg0: i32, %arg1: i32) -> (i32, i32, i32) {
    %c0_i32 = arith.constant 0 : i32
    %c0_i32_0 = arith.constant 0 : i32
    %c0_i32_1 = arith.constant 0 : i32
    return %arg0, %c0_i32, %c0_i32_0 : i32, i32, i32
  }
  func.func @transform_4(%arg0: i32, %arg1: i32) -> (i32, i32, i32) {
    %c0_i32 = arith.constant 0 : i32
    %c0_i32_0 = arith.constant 0 : i32
    %c0_i32_1 = arith.constant 0 : i32
    return %arg0, %c0_i32, %c0_i32_0 : i32, i32, i32
  }
  func.func @transform_5(%arg0: i32, %arg1: i32) -> (i32, i32, i32) {
    %c0_i32 = arith.constant 0 : i32
    %c0_i32_0 = arith.constant 0 : i32
    return %arg0, %arg1, %c0_i32 : i32, i32, i32
  }
}

</mosaic_0001>

<bundles_post_ra>
// kernel: tpu_custom_call.1
= control target key start
LH: loop header
LB: loop body
LE: loop exit
PB: predicated region body
PF: predicated region fallthrough
CT: control target
= control target key end

     0   :  { %s11985_s0 = inlined_call_operand.vmem [shape: bf16[128,32], index: 0, kind: input, shape index: {}]   ;;  %s11986_s1 = inlined_call_operand.hbm [shape: bf16[3,32,1024], index: 1, kind: input, shape index: {}]   ;;  %s11987_s2 = inlined_call_operand.hbm [shape: bf16[3,1024,768], index: 2, kind: input, shape index: {}]   ;;  %s11988_s3 = inlined_call_operand.hbm [shape: bf16[3,768,512], index: 3, kind: input, shape index: {}]   ;;  %s11989_s4 = inlined_call_operand.hbm [shape: f32[3,3,1024], index: 4, kind: input, shape index: {}]   ;;  %s11990_s5 = inlined_call_operand.hbm [shape: bf16[3,128,512], index: 5, kind: output, shape index: {}]  }
   0x1   :  { %12018 = sst [smem:[#allocation37_spill]] %s11986_s1 }
   0x2   :  { %12019 = sst [smem:[#allocation38_spill]] %s11987_s2 }
   0x3   :  { %10 = vsyncpa [#allocation3], 0 }
   0x4   :  { %12 = vsyncpa [#allocation3 + $0x1], 0 }
   0x5   :  { %13 = vsyncpa [#allocation6], 0 }
   0x6   :  { %15 = vsyncpa [#allocation6 + $0x1], 0 }
   0x7   :  { %16 = vsyncpa [#allocation9], 0 }
   0x8   :  { %18 = vsyncpa [#allocation9 + $0x1], 0 }
   0x9   :  { %19 = vsyncpa [#allocation4], 0 }
   0xa   :  { %21 = vsyncpa [#allocation4 + $0x1], 0  ;;  %s10013_s18 = smov 0   ;;  %s10015_s19 = smov 0  }
   0xb   :  { %s10017_s20 = smov 0   ;;  %s10019_s21 = smov 0  }
   0xc   :  { %s10021_s22 = smov 0   ;;  %s10023_s23 = smov 0  }
   0xd LB: > { %12020 = sst [smem:[#allocation15_spill]] %s9955_s20  ;;  %s10044_s24 = sadd.s32 4294967295, %s9967_s23   ;;  %s9967_s23 = sphi %s10023_s23, %s27_s23   ;;  %s9963_s22 = sphi %s10021_s22, %s12084_s22   ;;  %s9959_s21 = sphi %s10019_s21, %s12083_s21   ;;  %s9955_s20 = sphi %s10017_s20, %s12079_s20   ;;  %s9951_s19 = sphi %s10015_s19, %s12082_s19   ;;  %s9947_s18 = sphi %s10013_s18, %s12081_s18  }
   0xe   : > { %s7492_s25 = sadd.s32 4294967294, %s9967_s23   ;;  %s39_s26 = sadd.s32 1, %s9963_s22 }
   0xf   : > { %s72_s27 = sadd.s32 1, %s9955_s20  ;;  %p41_p0 = scmp.ge.s32.totalorder %s39_s26, 3 }
  0x10   : > { %p79_p1 = scmp.ne.s32.totalorder %s9955_s20, %s9951_s19  ;;  %p80_p2 = scmp.eq.s32.totalorder %s9967_s23, 0 }
  0x11   : > { %p85_p3 = scmp.ne.s32.totalorder %s9951_s19, %s9947_s18  ;;  %s12086_s26 = smov (%p41_p0, %s39_s26), 0 }
  0x12   : > { %12021 = sst [smem:[#allocation16_spill]] %s12086_s26  ;;  %p10056_p4 = por %p80_p2, %p79_p1 }
  0x13   : > { %p86_p5 = scmp.eq.s32.totalorder %s10044_s24, 0  ;;  %s69_s29 = ssub.s32 %s9963_s22, %s12086_s26 }
  0x14   : > { %p189_p6 = scmp.eq.s32.totalorder %s10044_s24, 2  ;;  %p70_p7 = scmp.eq.s32.totalorder %s69_s29, 0 }
  0x15   : > { %p10064_p8 = por %p86_p5, %p85_p3  ;;  %p195_p10 = scmp.eq.s32.totalorder %s7492_s25, 2 }
  0x16   : > { %p10068_p9 = por %p189_p6, %p79_p1  ;;  %p8821_p12 = scmp.lt.s32.totalorder %s9967_s23, 3 }
  0x17   : > { %s12023_s30 = scalar_select %p10064_p8, 1, 0 }
  0x18   : > { %s12024_s6 = scalar_select %p10068_p9, 1, 0 }
  0x19   : > { %s10073_s7 = scalar_select %p70_p7, %s9955_s20, %s72_s27  }
  0x1a   : > { %p10075_p11 = por %p195_p10, %p85_p3  ;;  %s10081_s9 = sand.u32 1, %s9955_s20  }
  0x1b   : > { %12025 = sst [smem:[#allocation17_spill]] %s10073_s7  ;;  %s245_s10 = sand.u32 1, %s9967_s23  }
  0x1c   : > { %s12026_s8 = scalar_select %p10075_p11, 1, 0 }
  0x1d   : > { %s8788_s11 = smul.u32 3072, %s10081_s9  ;;  %p10087_p13 = pnand %p8821_p12, %p10056_p4 }
  0x1e   : > { %12027 = sst [smem:[#allocation18_spill]] %s12026_s8  ;;  %s8789_s13 = smul.u32 49152, %s9963_s22 }
  0x1f   : > { %s12028_s12 = scalar_select %p10087_p13, 1, 0 }
  0x20   : > { %s249_s14 = scalar_lea.vmem [#allocation5], %s8788_s11  ;;  %s12029_s2 = sld [smem:[#allocation38_spill]] }
  0x21   : > { %s256_s15 = sshll.u32 %s249_s14, 4  ;;  %s10099_s27 = scalar_lea.sflag [#allocation6], %s245_s10  ;;  %s10097_s15 = int_to_ptr.vmem [resolvable:$true] %s256_s15 }
  0x22   : > { %p10105_p1 = pneg %p10087_p13 }
  0x26   : > { %s10095_s25 = scalar_lea.hbm %s12029_s2, %s8789_s13  ;;  %s9762_s14 = scalar_lea.hbm %s12029_s2, 147456 }
  0x27   : > { %s9757_s28 = scalar_lea.hbm %s10095_s25, 49152  ;;  %p9763_p4 = scmp.lt.u32.totalorder %s10095_s25, %s12029_s2 }
  0x28   : > { %p9758_p0 = scmp.ne.s32.totalorder %s10095_s25, %s9757_s28  ;;  %p9764_p5 = scmp.lt.u32.totalorder %s9762_s14, %s9757_s28 }
  0x29   : > { %p9766_p7 = scmp.lt.u32.totalorder %s9757_s28, %s10095_s25 }
  0x2a   : > { %p9760_p2 = pnand %p10105_p1, %p9758_p0  ;;  %p9765_p6 = por %p9764_p5, %p9763_p4 }
  0x2c   : > { %p9761_p3 = pneg %p9760_p2  ;;  %p9767_p10 = por %p9766_p7, %p9765_p6 }
  0x2e   : > { %p9768_p12 = pnand %p9767_p10, %p9761_p3 }
  0x30   : > { %9771 = shalt.err (!%p9768_p12)
}
  0x31   : > { %s9772_s10 = scalar_lea.vmem %s10097_s15, 49152  ;;  %s9969_s11 = smov [#allocation5]  }
  0x32   : > { %p9773_p0 = scmp.ne.s32.totalorder %s10097_s15, %s9772_s10  ;;  %s9777_s13 = sshll.u32 %s9969_s11, 4  ;;  %s9778_s13 = int_to_ptr.vmem [resolvable:$false] %s9777_s13 }
  0x33   : > { %s9779_s16 = scalar_lea.vmem %s9778_s13, 98304  ;;  %p9780_p9 = scmp.lt.s32.totalorder %s10097_s15, %s9778_s13 }
  0x34   : > { %p9775_p2 = pnand %p9773_p0, %p10105_p1  ;;  %p9781_p8 = scmp.lt.s32.totalorder %s9779_s16, %s9772_s10 }
  0x36   : > { %p9776_p11 = pneg %p9775_p2  ;;  %p9782_p4 = por %p9781_p8, %p9780_p9 }
  0x38   : > { %p9783_p5 = pnand %p9782_p4, %p9776_p11 }
  0x3a   : > { %9786 = shalt.err (!%p9783_p5)
}
  0x3b   : > { %s9970_s28 = smov 384   ;;  %s9971_s14 = smov 24  }
  0x3c   : > { %8810 = dma.hbm_to_vmem [thread:$0]  (!%p10087_p13), %s10095_s25, 49152, %s10097_s15, %s10099_s27, %s9970_s28, %s9970_s28, %s9971_s14  }
  0x3d   : > { %p7504_p3 = scmp.ge.s32.totalorder %s9967_s23, 1  ;;  %p304_p6 = scmp.lt.s32.totalorder %s9967_s23, 4 }
  0x3e   : > { %s7496_s10 = sshll.u32 %s10081_s9, 7  ;;  %s8177_s11 = sshll.u32 %s9963_s22, 11 }
  0x3f   : > { %p10131_p7 = pnand %p7504_p3, %p304_p6  ;;  %s12032_s1 = sld [smem:[#allocation37_spill]] }
  0x40   : > { %s228_s26 = scalar_lea.vmem [#allocation2], %s7496_s10  ;;  %s225_s15 = scalar_lea.sflag [#allocation3], %s10081_s9 }
  0x41   : > { %s12031_s17 = scalar_select %p10131_p7, 1, 0 }
  0x42   : > { %s235_s7 = sshll.u32 %s228_s26, 4  ;;  %s10142_s7 = int_to_ptr.vmem [resolvable:$true] %s235_s7 }
  0x45   : > { %s10140_s2 = scalar_lea.hbm %s12032_s1, %s8177_s11  ;;  %s9792_s13 = scalar_lea.hbm %s12032_s1, 6144 }
  0x46   : > { %s9787_s25 = scalar_lea.hbm %s10140_s2, 2048  ;;  %p9793_p10 = scmp.lt.u32.totalorder %s10140_s2, %s12032_s1 }
  0x47   : > { %p9788_p8 = scmp.ne.s32.totalorder %s10140_s2, %s9787_s25  ;;  %p9794_p12 = scmp.lt.u32.totalorder %s9792_s13, %s9787_s25 }
  0x48   : > { %p9796_p2 = scmp.lt.u32.totalorder %s9787_s25, %s10140_s2 }
  0x49   : > { %p9790_p9 = pnand %p9788_p8, %p10105_p1  ;;  %p9795_p0 = por %p9794_p12, %p9793_p10 }
  0x4b   : > { %p9791_p11 = pneg %p9790_p9  ;;  %p9797_p4 = por %p9796_p2, %p9795_p0 }
  0x4d   : > { %p9798_p5 = pnand %p9797_p4, %p9791_p11 }
  0x4f   : > { %9801 = shalt.err (!%p9798_p5)
}
  0x50   : > { %s9802_s26 = scalar_lea.vmem %s10142_s7, 2048  ;;  %s9972_s10 = smov [#allocation2]  }
  0x51   : > { %p9803_p3 = scmp.ne.s32.totalorder %s10142_s7, %s9802_s26  ;;  %s9807_s28 = sshll.u32 %s9972_s10, 4  ;;  %s9808_s28 = int_to_ptr.vmem [resolvable:$false] %s9807_s28 }
  0x52   : > { %s9809_s14 = scalar_lea.vmem %s9808_s28, 4096  ;;  %p9810_p9 = scmp.lt.s32.totalorder %s10142_s7, %s9808_s28 }
  0x53   : > { %p9805_p6 = pnand %p9803_p3, %p10105_p1  ;;  %p9811_p7 = scmp.lt.s32.totalorder %s9809_s14, %s9802_s26 }
  0x55   : > { %p9806_p8 = pneg %p9805_p6  ;;  %p9812_p10 = por %p9811_p7, %p9810_p9 }
  0x57   : > { %p9813_p12 = pnand %p9812_p10, %p9806_p8 }
  0x59   : > { %9816 = shalt.err (!%p9813_p12)
}
  0x5a   : > { %s9973_s25 = smov 512   ;;  %s9974_s13 = smov 32  }
  0x5b   : > { %8807 = dma.hbm_to_vmem [thread:$0]  (!%p10087_p13), %s10140_s2, 2048, %s10142_s7, %s225_s15, %s9973_s25, %s9973_s25, %s9974_s13  }
  0x5c   : > { %s8790_s11 = smul.u32 1536, %s10081_s9  ;;  %s7501_s20 = sshll.u32 %s10081_s9, 5 }
  0x5d   : > { %s8791_s16 = smul.u32 24576, %s9963_s22  ;;  %s9822_s15 = scalar_lea.hbm %s11988_s3, 73728 }
  0x5e   : > { %s270_s14 = scalar_lea.vmem [#allocation7], %s8790_s11 }
  0x5f   : > { %s10173_s28 = scalar_lea.hbm %s11988_s3, %s8791_s16  ;;  %s277_s1 = sshll.u32 %s270_s14, 4  ;;  %s10175_s1 = int_to_ptr.vmem [resolvable:$true] %s277_s1 }
  0x60   : > { %s9817_s8 = scalar_lea.hbm %s10173_s28, 24576  ;;  %p9823_p2 = scmp.lt.u32.totalorder %s10173_s28, %s11988_s3 }
  0x61   : > { %p9818_p7 = scmp.ne.s32.totalorder %s10173_s28, %s9817_s8  ;;  %p9824_p4 = scmp.lt.u32.totalorder %s9822_s15, %s9817_s8 }
  0x62   : > { %p9826_p3 = scmp.lt.u32.totalorder %s9817_s8, %s10173_s28 }
  0x63   : > { %p9820_p11 = pnand %p9818_p7, %p10105_p1  ;;  %p9825_p5 = por %p9824_p4, %p9823_p2 }
  0x65   : > { %p9821_p0 = pneg %p9820_p11  ;;  %p9827_p6 = por %p9826_p3, %p9825_p5 }
  0x67   : > { %p9828_p8 = pnand %p9827_p6, %p9821_p0 }
  0x69   : > { %9831 = shalt.err (!%p9828_p8)
}
  0x6a   : > { %s9832_s11 = scalar_lea.vmem %s10175_s1, 24576  ;;  %s9975_s16 = smov [#allocation7]  }
  0x6b   : > { %p9833_p9 = scmp.ne.s32.totalorder %s10175_s1, %s9832_s11  ;;  %s9837_s10 = sshll.u32 %s9975_s16, 4  ;;  %s9838_s10 = int_to_ptr.vmem [resolvable:$false] %s9837_s10 }
  0x6c   : > { %s9839_s26 = scalar_lea.vmem %s9838_s10, 49152  ;;  %p9840_p7 = scmp.lt.s32.totalorder %s10175_s1, %s9838_s10 }
  0x6d   : > { %p9835_p10 = pnand %p9833_p9, %p10105_p1  ;;  %p9841_p11 = scmp.lt.s32.totalorder %s9839_s26, %s9832_s11 }
  0x6f   : > { %p9836_p12 = pneg %p9835_p10  ;;  %p9842_p2 = por %p9841_p11, %p9840_p7 }
  0x71   : > { %p9843_p4 = pnand %p9842_p2, %p9836_p12 }
  0x73   : > { %9846 = shalt.err (!%p9843_p4)
}
  0x74   : > { %s9976_s8 = smov 256   ;;  %s9977_s14 = smov 16  }
  0x75   : > { %8813 = dma.hbm_to_vmem [thread:$0]  (!%p10087_p13), %s10173_s28, 24576, %s10175_s1, %s10099_s27, %s9976_s8, %s9976_s8, %s9977_s14  }
  0x76   : > { %s8178_s2 = sshll.u32 %s9963_s22, 9  ;;  %s291_s13 = scalar_lea.vmem [#allocation8], %s7501_s20 }
  0x77   : > { %s10204_s25 = scalar_lea.hbm %s11989_s4, %s8178_s2  ;;  %s299_s11 = sshll.u32 %s291_s13, 4  ;;  %s300_s11 = int_to_ptr.vmem [resolvable:$true] %s299_s11 }
  0x78   : > { %s288_s16 = scalar_lea.sflag [#allocation9], %s10081_s9  ;;  %s9847_s10 = scalar_lea.hbm %s10204_s25, 512 }
  0x79   : > { %p9848_p0 = scmp.ne.s32.totalorder %s10204_s25, %s9847_s10  ;;  %s9852_s28 = scalar_lea.hbm %s11989_s4, 1536 }
  0x7a   : > { %p9853_p6 = scmp.lt.u32.totalorder %s10204_s25, %s11989_s4  ;;  %p9854_p8 = scmp.lt.u32.totalorder %s9852_s28, %s9847_s10 }
  0x7b   : > { %p9850_p5 = pnand %p9848_p0, %p10105_p1  ;;  %p9856_p10 = scmp.lt.u32.totalorder %s9847_s10, %s10204_s25 }
  0x7c   : > { %p9855_p9 = por %p9854_p8, %p9853_p6 }
  0x7d   : > { %p9851_p3 = pneg %p9850_p5 }
  0x7e   : > { %p9857_p12 = por %p9856_p10, %p9855_p9 }
  0x80   : > { %p9858_p7 = pnand %p9857_p12, %p9851_p3 }
  0x82   : > { %9861 = shalt.err (!%p9858_p7)
}
  0x83   : > { %s9862_s20 = scalar_lea.vmem %s300_s11, 512  ;;  %s9978_s9 = smov [#allocation8]  }
  0x84   : > { %p9863_p11 = scmp.ne.s32.totalorder %s300_s11, %s9862_s20  ;;  %s9867_s14 = sshll.u32 %s9978_s9, 4  ;;  %s9868_s14 = int_to_ptr.vmem [resolvable:$false] %s9867_s14 }
  0x85   : > { %s9869_s2 = scalar_lea.vmem %s9868_s14, 1024  ;;  %p9870_p0 = scmp.lt.s32.totalorder %s300_s11, %s9868_s14 }
  0x86   : > { %p9865_p2 = pnand %p9863_p11, %p10105_p1  ;;  %p9871_p5 = scmp.lt.s32.totalorder %s9869_s2, %s9862_s20 }
  0x88   : > { %p9866_p4 = pneg %p9865_p2  ;;  %p9872_p13 = por %p9871_p5, %p9870_p0 }
  0x8a   : > { %p9873_p6 = pnand %p9872_p13, %p9866_p4 }
  0x8c   : > { %9876 = shalt.err (!%p9873_p6)
}
  0x8d   : > { %p12033_p8 = scmp.ne.s32.totalorder %s12028_s12, 0  ;;  %p12034_p3 = scmp.ne.s32.totalorder %s12031_s17, 0 }
  0x8f   : > { %8816 = dma.hbm_to_vmem [thread:$0]  (!%p12033_p8), %s10204_s25, 512, %s300_s11, %s288_s16  }
  0x90   : > { %308 = sbr.rel (%p12034_p3) target bundleno = 1551 (0x60f), region = 40 }
  0x97   : > { %s10229_s29 = sand.u32 1, %s9951_s19   ;;  %p12035_p1 = scmp.ne.s32.totalorder %s12023_s30, 0 }
  0x98   : > { %s7505_s7 = sshll.u32 %s10229_s29, 7  ;;  %s311_s15 = scalar_lea.sflag [#allocation3], %s10229_s29 }
  0x99   : > { %s10233_s13 = scalar_lea.vmem [#allocation2], %s7505_s7 }
  0x9a   : > { %9930 = dma.done.wait (%p12035_p1), %s311_s15, 2048  }
  0x9b   : > { %9932 = vsyncadd (%p12035_p1), %s311_s15, 4294965248  ;;  %s319_s12 = sand.u32 1, %s10044_s24   ;;  %s8792_s17 = smul.u32 3072, %s10229_s29 }
  0x9c   : > { %s320_s25 = scalar_lea.sflag [#allocation6], %s319_s12 }
  0x9d   : > { %s10241_s11 = scalar_lea.vmem [#allocation5], %s8792_s17 }
  0x9e   : > { %9934 = dma.done.wait (%p12035_p1), %s320_s25, 73728  }
  0x9f   : > { %9936 = vsyncadd (%p12035_p1), %s320_s25, 4294893568  ;;  %s8793_s16 = smul.u32 1536, %s10229_s29  ;;  %s7506_s10 = sshll.u32 %s10229_s29, 5 }
  0xa0   : > { %s338_s27 = scalar_lea.sflag [#allocation9], %s10229_s29  ;;  %s10252_s28 = scalar_lea.vmem [#allocation8], %s7506_s10 }
  0xa1   : > { %s10249_s1 = scalar_lea.vmem [#allocation7], %s8793_s16 }
  0xa2   : > { %9938 = dma.done.wait (%p12035_p1), %s338_s27, 512  }
  0xa3   : > { %9940 = vsyncadd (%p12035_p1), %s338_s27, 4294966784  ;;  %v9979_v0 = vmov 0   ;;  %v416_v1 = vld [vmem:[%s10233_s13] sm:$0xff]  ;;  %v417_v8 = vld [vmem:[%s10233_s13 + $0x8] sm:$0xff]  ;;  %vm628_vm0 = vcmask 261120   ;;  %s7310_s8 = scalar_lea.sflag [#allocation4], %s10229_s29 }
  0xa4   : > { %685 = vmatprep.mubr.bf16.mxu0 %v9979_v0  ;;  %1024 = vmatprep.mubr.bf16.mxu1 %v9979_v0  ;;  %v420_v2 = vld [vmem:[%s10233_s13 + $0x20] sm:$0xff]  ;;  %v421_v9 = vld [vmem:[%s10233_s13 + $0x28] sm:$0xff]  ;;  %v10274_v17 = vld [vmem:[%s10233_s13 + $0x10] sm:$0xff]  ;;  %p12075_p9 = scmp.ne.s32.totalorder %s12024_s6, 0 }
  0xa5   : > { %v424_v3 = vld [vmem:[%s10233_s13 + $0x40] sm:$0xff]  ;;  %v7517_v4 = vcombine.high %v416_v1, %v420_v2  ;;  %v7516_v5 = vcombine.low %v416_v1, %v420_v2  ;;  %v7519_v11 = vcombine.high %v417_v8, %v421_v9  ;;  %v425_v13 = vld [vmem:[%s10233_s13 + $0x48] sm:$0xff]  ;;  %v7518_v15 = vcombine.low %v417_v8, %v421_v9  ;;  %v10279_v18 = vld [vmem:[%s10233_s13 + $0x30] sm:$0xff] }
  0xa6   : > { %v428_v6 = vld [vmem:[%s10233_s13 + $0x60] sm:$0xff]  ;;  %v429_v14 = vld [vmem:[%s10233_s13 + $0x68] sm:$0xff]  ;;  %v7521_v21 = vcombine.high %v10274_v17, %v10279_v18  ;;  %v10295_v22 = vld [vmem:[%s11985_s0 + $0x10] sm:$0xff]   ;;  %v7520_v56 = vcombine.low %v10274_v17, %v10279_v18 }
  0xa7   : > { %v7525_v7 = vcombine.high %v424_v3, %v428_v6  ;;  %653 = vmatprep.subr.bf16.mxu0 %v7517_v4  ;;  %v7524_v10 = vcombine.low %v424_v3, %v428_v6  ;;  %v10269_v12 = vld [vmem:[%s11985_s0] sm:$0xff]   ;;  %v7527_v16 = vcombine.high %v425_v13, %v429_v14  ;;  %v7526_v19 = vcombine.low %v425_v13, %v429_v14  ;;  %v10285_v20 = vld [vmem:[%s11985_s0 + $0x8] sm:$0xff]   ;;  %v419_v23 = vld [vmem:[%s10233_s13 + $0x18] sm:$0xff] }
  0xa8   : > { %654 = vmatpush1.bf16.msra.mxu0 %v7516_v5  ;;  %v423_v24 = vld [vmem:[%s10233_s13 + $0x38] sm:$0xff]  ;;  %v8891_v32 = vld [vmem:[%s10241_s11 + $0x8] ss:$24 sps:$4 sm:$0xff]   ;;  %v8893_v33 = vld [vmem:[%s10241_s11 + $0xc] ss:$24 sps:$4 sm:$0xff]  }
  0xa9   : > { %655 = vmatprep.subr.bf16.mxu0 %v7525_v7  ;;  %v7523_v25 = vcombine.high %v419_v23, %v423_v24  ;;  %v7522_v26 = vcombine.low %v419_v23, %v423_v24  ;;  %v10305_v27 = vld [vmem:[%s11985_s0 + $0x18] sm:$0xff]   ;;  %v10317_v34 = vld [vmem:[%s11985_s0 + $0x20] sm:$0xff]   ;;  %v10330_v37 = vld [vmem:[%s11985_s0 + $0x28] sm:$0xff]  }
  0xaa   : > { %v427_v28 = vld [vmem:[%s10233_s13 + $0x58] sm:$0xff]  ;;  %v8903_v38 = vld [vmem:[%s10241_s11 + $0x68] ss:$24 sps:$4 sm:$0xff]   ;;  %v8905_v39 = vld [vmem:[%s10241_s11 + $0x6c] ss:$24 sps:$4 sm:$0xff]  }
  0xab   : > { %992 = vmatprep.subr.bf16.mxu1 %v7523_v25  ;;  %v431_v29 = vld [vmem:[%s10233_s13 + $0x78] sm:$0xff]  ;;  %v10345_v42 = vld [vmem:[%s11985_s0 + $0x30] sm:$0xff]   ;;  %v8915_v43 = vld [vmem:[%s10241_s11 + $0xc8] ss:$24 sps:$4 sm:$0xff]  }
  0xac   : > { %656 = vmatpush1.bf16.msra.mxu0 %v7524_v10  ;;  %993 = vmatpush1.bf16.msra.mxu1 %v7522_v26  ;;  %v7531_v30 = vcombine.high %v427_v28, %v431_v29  ;;  %v7530_v31 = vcombine.low %v427_v28, %v431_v29  ;;  %v8897_v35 = vld [vmem:[%s10241_s11 + $0x38] ss:$24 sps:$4 sm:$0xff]   ;;  %v8899_v36 = vld [vmem:[%s10241_s11 + $0x3c] ss:$24 sps:$4 sm:$0xff]   ;;  %v8917_v44 = vld [vmem:[%s10241_s11 + $0xcc] ss:$24 sps:$4 sm:$0xff]  }
  0xad   : > { %766 = vmatprep.subr.bf16.mxu0 %v7519_v11  ;;  %v8909_v40 = vld [vmem:[%s10241_s11 + $0x98] ss:$24 sps:$4 sm:$0xff]   ;;  %v8911_v41 = vld [vmem:[%s10241_s11 + $0x9c] ss:$24 sps:$4 sm:$0xff]   ;;  %v8927_v48 = vld [vmem:[%s10241_s11 + $0x128] ss:$24 sps:$4 sm:$0xff]  }
  0xae   : > { %994 = vmatprep.subr.bf16.mxu1 %v7531_v30  ;;  %v8921_v45 = vld [vmem:[%s10241_s11 + $0xf8] ss:$24 sps:$4 sm:$0xff]   ;;  %v8923_v46 = vld [vmem:[%s10241_s11 + $0xfc] ss:$24 sps:$4 sm:$0xff]   ;;  %v8929_v49 = vld [vmem:[%s10241_s11 + $0x12c] ss:$24 sps:$4 sm:$0xff]  }
  0xaf   : > { %7532 = vmatmul.mubr.msk.bf16.vlgmr.msra.gmra.mrb[0].mxu0 %vm628_vm0, %v10269_v12  ;;  %v10360_v47 = vld [vmem:[%s11985_s0 + $0x38] sm:$0xff]   ;;  %v8941_v52 = vld [vmem:[%s10241_s11 + $0x18c] ss:$24 sps:$4 sm:$0xff]   ;;  %v426_v53 = vld [vmem:[%s10233_s13 + $0x50] sm:$0xff] }
  0xb0   : > { %767 = vmatpush1.bf16.msra.mxu0 %v7518_v15  ;;  %695 = vmatprep.mubr.bf16.mxu0 %v9979_v0  ;;  %v8933_v50 = vld [vmem:[%s10241_s11 + $0x158] ss:$24 sps:$4 sm:$0xff]   ;;  %v8935_v51 = vld [vmem:[%s10241_s11 + $0x15c] ss:$24 sps:$4 sm:$0xff]   ;;  %v8939_v55 = vld [vmem:[%s10241_s11 + $0x188] ss:$24 sps:$4 sm:$0xff]  }
  0xb1   : > { %768 = vmatprep.subr.bf16.mxu0 %v7527_v16  ;;  %995 = vmatpush1.bf16.msra.mxu1 %v7530_v31  ;;  %v430_v54 = vld [vmem:[%s10233_s13 + $0x70] sm:$0xff]  ;;  %v8890_v61 = vld [vmem:[%s10241_s11 + $0x4] ss:$24 sps:$4 sm:$0xff]   ;;  %v8951_v63 = vld [vmem:[%s10241_s11 + $0x1e8] ss:$24 sps:$4 sm:$0xff]   ;;  %s7507_s13 = sshll.u32 %s10229_s29, 8 }
  0xb2   : > { %4107 = vmatprep.subr.bf16.mxu1 %v8893_v33  ;;  %v7529_v57 = vcombine.high %v426_v53, %v430_v54  ;;  %v8947_v58 = vld [vmem:[%s10241_s11 + $0x1bc] ss:$24 sps:$4 sm:$0xff]   ;;  %v8945_v59 = vld [vmem:[%s10241_s11 + $0x1b8] ss:$24 sps:$4 sm:$0xff]   ;;  %v7528_v60 = vcombine.low %v426_v53, %v430_v54  ;;  %v8953_v62 = vld [vmem:[%s10241_s11 + $0x1ec] ss:$24 sps:$4 sm:$0xff]  }
  0xb3   : > { %v8959_v1 = vld [vmem:[%s10241_s11 + $0x21c] ss:$24 sps:$4 sm:$0xff]   ;;  %v8957_v2 = vld [vmem:[%s10241_s11 + $0x218] ss:$24 sps:$4 sm:$0xff]   ;;  %v8965_v3 = vld [vmem:[%s10241_s11 + $0x24c] ss:$24 sps:$4 sm:$0xff]  }
  0xb4   : > { %769 = vmatpush1.bf16.msra.mxu0 %v7526_v19  ;;  %7556 = vmatmul.mubr.msk.bf16.vlgmr.msra.gmra.mrb[0].mxu1 %vm628_vm0, %v10269_v12  ;;  %v8963_v4 = vld [vmem:[%s10241_s11 + $0x248] ss:$24 sps:$4 sm:$0xff]   ;;  %v8971_v5 = vld [vmem:[%s10241_s11 + $0x27c] ss:$24 sps:$4 sm:$0xff]   ;;  %v8969_v6 = vld [vmem:[%s10241_s11 + $0x278] ss:$24 sps:$4 sm:$0xff]  }
  0xb5   : > { %879 = vmatprep.subr.bf16.mxu0 %v7521_v21  ;;  %4108 = vmatpush1.bf16.msra.mxu1 %v8891_v32  ;;  %v8977_v7 = vld [vmem:[%s10241_s11 + $0x2ac] ss:$24 sps:$4 sm:$0xff]   ;;  %v8975_v8 = vld [vmem:[%s10241_s11 + $0x2a8] ss:$24 sps:$4 sm:$0xff]   ;;  %v8983_v9 = vld [vmem:[%s10241_s11 + $0x2dc] ss:$24 sps:$4 sm:$0xff]  }
  0xb6   : > { %1034 = vmatprep.mubr.bf16.mxu1 %v9979_v0  ;;  %4109 = vmatprep.subr.bf16.mxu1 %v8899_v36  ;;  %v8981_v10 = vld [vmem:[%s10241_s11 + $0x2d8] ss:$24 sps:$4 sm:$0xff]   ;;  %v8989_v11 = vld [vmem:[%s10241_s11 + $0x30c] ss:$24 sps:$4 sm:$0xff]  }
  0xb7   : > { %7533 = vmatmul.mubr.msk.bf16.gmra.mrb[4].mxu0 %vm628_vm0, %v10285_v20  ;;  %v8888_v13 = vld [vmem:[%s10241_s11] ss:$24 sps:$4 sm:$0xff]   ;;  %v8896_v14 = vld [vmem:[%s10241_s11 + $0x34] ss:$24 sps:$4 sm:$0xff]   ;;  %v8894_v15 = vld [vmem:[%s10241_s11 + $0x30] ss:$24 sps:$4 sm:$0xff]  }
  0xb8   : > { %705 = vmatprep.mubr.bf16.mxu0 %v9979_v0  ;;  %v8902_v16 = vld [vmem:[%s10241_s11 + $0x64] ss:$24 sps:$4 sm:$0xff]   ;;  %v8900_v17 = vld [vmem:[%s10241_s11 + $0x60] ss:$24 sps:$4 sm:$0xff]   ;;  %v8908_v18 = vld [vmem:[%s10241_s11 + $0x94] ss:$24 sps:$4 sm:$0xff]  }
  0xb9   : > { %4110 = vmatpush1.bf16.msra.mxu1 %v8897_v35  ;;  %v8914_v19 = vld [vmem:[%s10241_s11 + $0xc4] ss:$24 sps:$4 sm:$0xff]   ;;  %v8912_v21 = vld [vmem:[%s10241_s11 + $0xc0] ss:$24 sps:$4 sm:$0xff]   ;;  %v8920_v23 = vld [vmem:[%s10241_s11 + $0xf4] ss:$24 sps:$4 sm:$0xff]  }
  0xba   : > { %4111 = vmatprep.subr.bf16.mxu1 %v8905_v39  ;;  %v8926_v24 = vld [vmem:[%s10241_s11 + $0x124] ss:$24 sps:$4 sm:$0xff]   ;;  %v8924_v25 = vld [vmem:[%s10241_s11 + $0x120] ss:$24 sps:$4 sm:$0xff]   ;;  %v8932_v26 = vld [vmem:[%s10241_s11 + $0x154] ss:$24 sps:$4 sm:$0xff]  }
  0xbb   : > { %v8938_v28 = vld [vmem:[%s10241_s11 + $0x184] ss:$24 sps:$4 sm:$0xff]   ;;  %v8936_v29 = vld [vmem:[%s10241_s11 + $0x180] ss:$24 sps:$4 sm:$0xff]   ;;  %v8944_v30 = vld [vmem:[%s10241_s11 + $0x1b4] ss:$24 sps:$4 sm:$0xff]  }
  0xbc   : > { %7557 = vmatmul.mubr.msk.bf16.gmra.mrb[4].mxu1 %vm628_vm0, %v10285_v20  ;;  %v8950_v31 = vld [vmem:[%s10241_s11 + $0x1e4] ss:$24 sps:$4 sm:$0xff]   ;;  %v8948_v32 = vld [vmem:[%s10241_s11 + $0x1e0] ss:$24 sps:$4 sm:$0xff]   ;;  %v8956_v33 = vld [vmem:[%s10241_s11 + $0x214] ss:$24 sps:$4 sm:$0xff]  }
  0xbd   : > { %1044 = vmatprep.mubr.bf16.mxu1 %v9979_v0  ;;  %4112 = vmatpush1.bf16.msra.mxu1 %v8903_v38  ;;  %v8962_v35 = vld [vmem:[%s10241_s11 + $0x244] ss:$24 sps:$4 sm:$0xff]   ;;  %v8960_v36 = vld [vmem:[%s10241_s11 + $0x240] ss:$24 sps:$4 sm:$0xff]   ;;  %v8968_v38 = vld [vmem:[%s10241_s11 + $0x274] ss:$24 sps:$4 sm:$0xff]  }
  0xbe   : > { %4113 = vmatprep.subr.bf16.mxu1 %v8911_v41  ;;  %v8974_v39 = vld [vmem:[%s10241_s11 + $0x2a4] ss:$24 sps:$4 sm:$0xff]   ;;  %v8980_v41 = vld [vmem:[%s10241_s11 + $0x2d4] ss:$24 sps:$4 sm:$0xff]  }
  0xbf   : > { %7534 = vmatmul.mubr.msk.bf16.gmra.mrb[8].mxu0 %vm628_vm0, %v10295_v22 }
  0xc0   : > { %715 = vmatprep.mubr.bf16.mxu0 %v9979_v0 }
  0xc1   : > { %4114 = vmatpush1.bf16.msra.mxu1 %v8909_v40  ;;  %v8972_v40 = vld [vmem:[%s10241_s11 + $0x2a0] ss:$24 sps:$4 sm:$0xff]  }
  0xc2   : > { %4115 = vmatprep.subr.bf16.mxu1 %v8917_v44  ;;  %v8986_v44 = vld [vmem:[%s10241_s11 + $0x304] ss:$24 sps:$4 sm:$0xff]  }
  0xc4   : > { %7558 = vmatmul.mubr.msk.bf16.gmra.mrb[8].mxu1 %vm628_vm0, %v10295_v22 }
  0xc5   : > { %1054 = vmatprep.mubr.bf16.mxu1 %v9979_v0  ;;  %4116 = vmatpush1.bf16.msra.mxu1 %v8915_v43  ;;  %v8978_v43 = vld [vmem:[%s10241_s11 + $0x2d0] ss:$24 sps:$4 sm:$0xff]  }
  0xc6   : > { %4117 = vmatprep.subr.bf16.mxu1 %v8923_v46  ;;  %v396_v46 = vld [vmem:[%s10252_s28] sm:$0x77] }
  0xc7   : > { %7535 = vmatmul.mubr.msk.bf16.gmra.mrb[12].mxu0 %vm628_vm0, %v10305_v27 }
  0xc8   : > { %725 = vmatprep.mubr.bf16.mxu0 %v9979_v0 }
  0xc9   : > { %4118 = vmatpush1.bf16.msra.mxu1 %v8921_v45 }
  0xca   : > { %4119 = vmatprep.subr.bf16.mxu1 %v8929_v49 }
  0xcc   : > { %7559 = vmatmul.mubr.msk.bf16.gmra.mrb[12].mxu1 %vm628_vm0, %v10305_v27 }
  0xcd   : > { %1064 = vmatprep.mubr.bf16.mxu1 %v9979_v0  ;;  %4120 = vmatpush1.bf16.msra.mxu1 %v8927_v48 }
  0xce   : > { %4121 = vmatprep.subr.bf16.mxu1 %v8935_v51 }
  0xcf   : > { %7536 = vmatmul.mubr.msk.bf16.gmra.mrb[16].mxu0 %vm628_vm0, %v10317_v34 }
  0xd0   : > { %735 = vmatprep.mubr.bf16.mxu0 %v9979_v0 }
  0xd1   : > { %4122 = vmatpush1.bf16.msra.mxu1 %v8933_v50 }
  0xd2   : > { %4123 = vmatprep.subr.bf16.mxu1 %v8941_v52 }
  0xd4   : > { %7560 = vmatmul.mubr.msk.bf16.gmra.mrb[16].mxu1 %vm628_vm0, %v10317_v34 }
  0xd5   : > { %1074 = vmatprep.mubr.bf16.mxu1 %v9979_v0  ;;  %4124 = vmatpush1.bf16.msra.mxu1 %v8939_v55 }
  0xd6   : > { %4125 = vmatprep.subr.bf16.mxu1 %v8947_v58 }
  0xd7   : > { %7537 = vmatmul.mubr.msk.bf16.gmra.mrb[20].mxu0 %vm628_vm0, %v10330_v37 }
  0xd8   : > { %745 = vmatprep.mubr.bf16.mxu0 %v9979_v0 }
  0xd9   : > { %4126 = vmatpush1.bf16.msra.mxu1 %v8945_v59 }
  0xda   : > { %4127 = vmatprep.subr.bf16.mxu1 %v8953_v62 }
  0xdc   : > { %7561 = vmatmul.mubr.msk.bf16.gmra.mrb[20].mxu1 %vm628_vm0, %v10330_v37 }
  0xdd   : > { %1084 = vmatprep.mubr.bf16.mxu1 %v9979_v0  ;;  %4128 = vmatpush1.bf16.msra.mxu1 %v8951_v63 }
  0xde   : > { %4129 = vmatprep.subr.bf16.mxu1 %v8959_v1  ;;  %v8984_v1 = vld [vmem:[%s10241_s11 + $0x300] ss:$24 sps:$4 sm:$0xff]  }
  0xdf   : > { %7538 = vmatmul.mubr.msk.bf16.gmra.mrb[24].mxu0 %vm628_vm0, %v10345_v42 }
  0xe0   : > { %755 = vmatprep.mubr.bf16.mxu0 %v9979_v0 }
  0xe1   : > { %4130 = vmatpush1.bf16.msra.mxu1 %v8957_v2  ;;  %v8987_v2 = vld [vmem:[%s10241_s11 + $0x308] ss:$24 sps:$4 sm:$0xff]  }
  0xe2   : > { %4131 = vmatprep.subr.bf16.mxu1 %v8965_v3 }
  0xe4   : > { %7562 = vmatmul.mubr.msk.bf16.gmra.mrb[24].mxu1 %vm628_vm0, %v10345_v42 }
  0xe5   : > { %1094 = vmatprep.mubr.bf16.mxu1 %v9979_v0  ;;  %4132 = vmatpush1.bf16.msra.mxu1 %v8963_v4 }
  0xe6   : > { %4133 = vmatprep.subr.bf16.mxu1 %v8971_v5 }
  0xe7   : > { %7539 = vmatmul.mubr.msk.bf16.gmra.mrb[28].mxu0 %vm628_vm0, %v10360_v47 }
  0xe8   : > { %798 = vmatprep.mubr.bf16.mxu0 %v9979_v0 }
  0xe9   : > { %4134 = vmatpush1.bf16.msra.mxu1 %v8969_v6 }
  0xea   : > { %4135 = vmatprep.subr.bf16.mxu1 %v8977_v7 }
  0xec   : > { %7563 = vmatmul.mubr.msk.bf16.gmra.mrb[28].mxu1 %vm628_vm0, %v10360_v47 }
  0xed   : > { %4136 = vmatpush1.bf16.msra.mxu1 %v8975_v8  ;;  %v8992_v8 = vld [vmem:[%s10241_s11 + $0x334] ss:$24 sps:$4 sm:$0xff]  }
  0xee   : > { %4137 = vmatprep.subr.bf16.mxu1 %v8983_v9  ;;  %v8995_v9 = vld [vmem:[%s10241_s11 + $0x33c] ss:$24 sps:$4 sm:$0xff]  }
  0xef   : > { %7540 = vmatmul.mubr.msk.bf16.vlgmr.msra.gmra.mrb[32].mxu0 %vm628_vm0, %v10269_v12 }
  0xf0   : > { %880 = vmatpush1.bf16.msra.mxu0 %v7520_v56  ;;  %808 = vmatprep.mubr.bf16.mxu0 %v9979_v0 }
  0xf1   : > { %881 = vmatprep.subr.bf16.mxu0 %v7529_v57  ;;  %4138 = vmatpush1.bf16.msra.mxu1 %v8981_v10 }
  0xf2   : > { %4220 = vmatprep.subr.bf16.mxu1 %v8989_v11 }
  0xf4   : > { %882 = vmatpush1.bf16.msra.mxu0 %v7528_v60 }
  0xf5   : > { %3655 = vmatprep.subr.bf16.mxu0 %v8890_v61 }
  0xf7   : > { %7541 = vmatmul.mubr.msk.bf16.gmra.mrb[36].mxu0 %vm628_vm0, %v10285_v20 }
  0xf8   : > { %818 = vmatprep.mubr.bf16.mxu0 %v9979_v0 }
  0xff   : > { %7542 = vmatmul.mubr.msk.bf16.gmra.mrb[40].mxu0 %vm628_vm0, %v10295_v22 }
 0x100   : > { %828 = vmatprep.mubr.bf16.mxu0 %v9979_v0 }
 0x107   : > { %7543 = vmatmul.mubr.msk.bf16.gmra.mrb[44].mxu0 %vm628_vm0, %v10305_v27 }
 0x108   : > { %838 = vmatprep.mubr.bf16.mxu0 %v9979_v0 }
 0x10f   : > { %7544 = vmatmul.mubr.msk.bf16.gmra.mrb[48].mxu0 %vm628_vm0, %v10317_v34 }
 0x110   : > { %848 = vmatprep.mubr.bf16.mxu0 %v9979_v0 }
 0x117   : > { %7545 = vmatmul.mubr.msk.bf16.gmra.mrb[52].mxu0 %vm628_vm0, %v10330_v37 }
 0x118   : > { %858 = vmatprep.mubr.bf16.mxu0 %v9979_v0 }
 0x11f   : > { %7546 = vmatmul.mubr.msk.bf16.gmra.mrb[56].mxu0 %vm628_vm0, %v10345_v42 }
 0x120   : > { %868 = vmatprep.mubr.bf16.mxu0 %v9979_v0 }
 0x127   : > { %7547 = vmatmul.mubr.msk.bf16.gmra.mrb[60].mxu0 %vm628_vm0, %v10360_v47 }
 0x128   : > { %911 = vmatprep.mubr.bf16.mxu0 %v9979_v0 }
 0x12f   : > { %7548 = vmatmul.mubr.msk.bf16.vlgmr.msra.gmra.mrb[64].mxu0 %vm628_vm0, %v10269_v12  ;;  %v8906_v12 = vld [vmem:[%s10241_s11 + $0x90] ss:$24 sps:$4 sm:$0xff]  }
 0x130   : > { %921 = vmatprep.mubr.bf16.mxu0 %v9979_v0  ;;  %3656 = vmatpush1.bf16.msra.mxu0 %v8888_v13  ;;  %v8990_v13 = vld [vmem:[%s10241_s11 + $0x330] ss:$24 sps:$4 sm:$0xff]  }
 0x131   : > { %3657 = vmatprep.subr.bf16.mxu0 %v8896_v14  ;;  %v8993_v14 = vld [vmem:[%s10241_s11 + $0x338] ss:$24 sps:$4 sm:$0xff]  }
 0x134   : > { %3658 = vmatpush1.bf16.msra.mxu0 %v8894_v15 }
 0x135   : > { %3659 = vmatprep.subr.bf16.mxu0 %v8902_v16 }
 0x137   : > { %7549 = vmatmul.mubr.msk.bf16.gmra.mrb[68].mxu0 %vm628_vm0, %v10285_v20  ;;  %v8918_v20 = vld [vmem:[%s10241_s11 + $0xf0] ss:$24 sps:$4 sm:$0xff]  }
 0x138   : > { %931 = vmatprep.mubr.bf16.mxu0 %v9979_v0  ;;  %3660 = vmatpush1.bf16.msra.mxu0 %v8900_v17  ;;  %v8998_v17 = vld [vmem:[%s10241_s11 + $0x364] ss:$24 sps:$4 sm:$0xff]  }
 0x139   : > { %3661 = vmatprep.subr.bf16.mxu0 %v8908_v18 }
 0x13c   : > { %3662 = vmatpush1.bf16.msra.mxu0 %v8906_v12 }
 0x13d   : > { %3663 = vmatprep.subr.bf16.mxu0 %v8914_v19 }
 0x13f   : > { %7550 = vmatmul.mubr.msk.bf16.gmra.mrb[72].mxu0 %vm628_vm0, %v10295_v22  ;;  %v8930_v22 = vld [vmem:[%s10241_s11 + $0x150] ss:$24 sps:$4 sm:$0xff]  }
 0x140   : > { %941 = vmatprep.mubr.bf16.mxu0 %v9979_v0  ;;  %3664 = vmatpush1.bf16.msra.mxu0 %v8912_v21  ;;  %v9001_v21 = vld [vmem:[%s10241_s11 + $0x36c] ss:$24 sps:$4 sm:$0xff]  }
 0x141   : > { %3665 = vmatprep.subr.bf16.mxu0 %v8920_v23 }
 0x144   : > { %3666 = vmatpush1.bf16.msra.mxu0 %v8918_v20 }
 0x145   : > { %3667 = vmatprep.subr.bf16.mxu0 %v8926_v24  ;;  %v8996_v24 = vld [vmem:[%s10241_s11 + $0x360] ss:$24 sps:$4 sm:$0xff]  }
 0x147   : > { %7551 = vmatmul.mubr.msk.bf16.gmra.mrb[76].mxu0 %vm628_vm0, %v10305_v27  ;;  %v8942_v27 = vld [vmem:[%s10241_s11 + $0x1b0] ss:$24 sps:$4 sm:$0xff]  }
 0x148   : > { %951 = vmatprep.mubr.bf16.mxu0 %v9979_v0  ;;  %3668 = vmatpush1.bf16.msra.mxu0 %v8924_v25  ;;  %v8999_v25 = vld [vmem:[%s10241_s11 + $0x368] ss:$24 sps:$4 sm:$0xff]  }
 0x149   : > { %3669 = vmatprep.subr.bf16.mxu0 %v8932_v26 }
 0x14c   : > { %3670 = vmatpush1.bf16.msra.mxu0 %v8930_v22 }
 0x14d   : > { %3671 = vmatprep.subr.bf16.mxu0 %v8938_v28 }
 0x14f   : > { %7552 = vmatmul.mubr.msk.bf16.gmra.mrb[80].mxu0 %vm628_vm0, %v10317_v34  ;;  %v8954_v34 = vld [vmem:[%s10241_s11 + $0x210] ss:$24 sps:$4 sm:$0xff]  }
 0x150   : > { %961 = vmatprep.mubr.bf16.mxu0 %v9979_v0  ;;  %3672 = vmatpush1.bf16.msra.mxu0 %v8936_v29 }
 0x151   : > { %3673 = vmatprep.subr.bf16.mxu0 %v8944_v30 }
 0x154   : > { %3674 = vmatpush1.bf16.msra.mxu0 %v8942_v27  ;;  %v9004_v27 = vld [vmem:[%s10241_s11 + $0x394] ss:$24 sps:$4 sm:$0xff]  }
 0x155   : > { %3675 = vmatprep.subr.bf16.mxu0 %v8950_v31  ;;  %v9007_v31 = vld [vmem:[%s10241_s11 + $0x39c] ss:$24 sps:$4 sm:$0xff]  }
 0x157   : > { %7553 = vmatmul.mubr.msk.bf16.gmra.mrb[84].mxu0 %vm628_vm0, %v10330_v37  ;;  %v8966_v37 = vld [vmem:[%s10241_s11 + $0x270] ss:$24 sps:$4 sm:$0xff]  }
 0x158   : > { %971 = vmatprep.mubr.bf16.mxu0 %v9979_v0  ;;  %3676 = vmatpush1.bf16.msra.mxu0 %v8948_v32 }
 0x159   : > { %3677 = vmatprep.subr.bf16.mxu0 %v8956_v33 }
 0x15c   : > { %3678 = vmatpush1.bf16.msra.mxu0 %v8954_v34  ;;  %v9002_v34 = vld [vmem:[%s10241_s11 + $0x390] ss:$24 sps:$4 sm:$0xff]  }
 0x15d   : > { %3679 = vmatprep.subr.bf16.mxu0 %v8962_v35  ;;  %v9005_v35 = vld [vmem:[%s10241_s11 + $0x398] ss:$24 sps:$4 sm:$0xff]  }
 0x15f   : > { %7554 = vmatmul.mubr.msk.bf16.gmra.mrb[88].mxu0 %vm628_vm0, %v10345_v42  ;;  %v436_v42 = vlaneseq }
 0x160   : > { %981 = vmatprep.mubr.bf16.mxu0 %v9979_v0  ;;  %3680 = vmatpush1.bf16.msra.mxu0 %v8960_v36 }
 0x161   : > { %3681 = vmatprep.subr.bf16.mxu0 %v8968_v38  ;;  %v10484_v0 = vshrl.u32 %v436_v42, 7 }
 0x163   : > { %12036 = vst [vmem:[#allocation19_spill] sm:$0xff] %v10484_v0  ;;  %v10487_v45 = vsub.s32 0, %v10484_v0  ;;  %v10491_v48 = vsub.s32 4, %v10484_v0  ;;  %v9145_v0 = vld [vmem:[%s10241_s11 + $0x7ec] ss:$24 sps:$4 sm:$0xff]  }
 0x164   : > { %3682 = vmatpush1.bf16.msra.mxu0 %v8966_v37  ;;  %v9010_v37 = vld [vmem:[%s10241_s11 + $0x3c4] ss:$24 sps:$4 sm:$0xff]  }
 0x165   : > { %3683 = vmatprep.subr.bf16.mxu0 %v8974_v39  ;;  %v439_v49 = vrot.slane %v396_v46, %v10487_v45 }
 0x167   : > { %7555 = vmatmul.mubr.msk.bf16.gmra.mrb[92].mxu0 %vm628_vm0, %v10360_v47  ;;  %v443_v47 = vrot.slane %v396_v46, %v10491_v48  ;;  %v10496_v50 = vrot.slane %v439_v49, %v10487_v45  ;;  %v9008_v46 = vld [vmem:[%s10241_s11 + $0x3c0] ss:$24 sps:$4 sm:$0xff]  }
 0x168   : > { %3684 = vmatpush1.bf16.msra.mxu0 %v8972_v40  ;;  %v9011_v49 = vld [vmem:[%s10241_s11 + $0x3c8] ss:$24 sps:$4 sm:$0xff]  }
 0x169   : > { %3685 = vmatprep.subr.bf16.mxu0 %v8980_v41  ;;  %v10499_v51 = vrot.slane %v443_v47, %v10487_v45 }
 0x16c   : > { %3686 = vmatpush1.bf16.msra.mxu0 %v8978_v43  ;;  %v9013_v43 = vld [vmem:[%s10241_s11 + $0x3cc] ss:$24 sps:$4 sm:$0xff]  }
 0x16d   : > { %3768 = vmatprep.subr.bf16.mxu0 %v8986_v44 }
 0x182   : > { %v687_v52 = vpop.f32.mrb[0].mxu0 }
 0x183   : > { %v688_v53 = vadd.f32 %v687_v52, %v10496_v50  ;;  %v689_v54 = vpop.f32.mrb[1].mxu0 }
 0x184   : > { %v690_v55 = vadd.f32 %v689_v54, %v10499_v51  ;;  %v691_v56 = vpop.f32.mrb[2].mxu0 }
 0x185   : > { %v692_v57 = vadd.f32 %v691_v56, %v10496_v50  ;;  %v693_v58 = vpop.f32.mrb[3].mxu0  ;;  %v1105_v60 = vmax.f32 %v688_v53, 0.0  ;;  %v9016_v56 = vld [vmem:[%s10241_s11 + $0x3f4] ss:$24 sps:$4 sm:$0xff]  }
 0x186   : > { %v694_v59 = vadd.f32 %v693_v58, %v10499_v51  ;;  %v1106_v62 = vmax.f32 %v690_v55, 0.0 }
 0x187   : > { %v1113_v61 = vmax.f32 %v692_v57, 0.0  ;;  %v9019_v57 = vld [vmem:[%s10241_s11 + $0x3fc] ss:$24 sps:$4 sm:$0xff]  }
 0x188   : > { %v1114_v63 = vmax.f32 %v694_v59, 0.0 }
 0x189   : > { %v10507_v3 = vpack.c.bf16 %v1113_v61, %v1105_v60  ;;  %v9014_v60 = vld [vmem:[%s10241_s11 + $0x3f0] ss:$24 sps:$4 sm:$0xff]  }
 0x18a   : > { %v10509_v4 = vpack.c.bf16 %v1114_v63, %v1106_v62  ;;  %v697_v5 = vpop.f32.mrb[4].mxu0  ;;  %v9017_v61 = vld [vmem:[%s10241_s11 + $0x3f8] ss:$24 sps:$4 sm:$0xff]  }
 0x18b   : > { %v698_v6 = vadd.f32 %v697_v5, %v10496_v50  ;;  %v699_v7 = vpop.f32.mrb[5].mxu0 }
 0x18c   : > { %v700_v10 = vadd.f32 %v699_v7, %v10499_v51  ;;  %v701_v11 = vpop.f32.mrb[6].mxu0  ;;  %3687 = vmatprep.mubr.bf16.mxu0 %v10509_v4  ;;  %4139 = vmatprep.mubr.bf16.mxu1 %v10509_v4  ;;  %v9025_v7 = vld [vmem:[%s10241_s11 + $0x42c] ss:$24 sps:$4 sm:$0xff]  }
 0x18d   : > { %v702_v15 = vadd.f32 %v701_v11, %v10496_v50  ;;  %v703_v16 = vpop.f32.mrb[7].mxu0  ;;  %3688 = vmatmul.mubr.bf16.vlgmr.msra.gmra.mrb[96].mxu0 %v10507_v3  ;;  %4140 = vmatmul.mubr.bf16.vlgmr.msra.gmra.mrb[32].mxu1 %v10507_v3  ;;  %v1121_v12 = vmax.f32 %v698_v6, 0.0  ;;  %v9023_v11 = vld [vmem:[%s10241_s11 + $0x428] ss:$24 sps:$4 sm:$0xff]  }
 0x18e   : > { %v704_v18 = vadd.f32 %v703_v16, %v10499_v51  ;;  %3769 = vmatpush1.bf16.msra.mxu0 %v8984_v1  ;;  %4221 = vmatpush1.bf16.msra.mxu1 %v8987_v2  ;;  %v1122_v23 = vmax.f32 %v700_v10, 0.0  ;;  %v9022_v1 = vld [vmem:[%s10241_s11 + $0x424] ss:$24 sps:$4 sm:$0xff]   ;;  %v9020_v10 = vld [vmem:[%s10241_s11 + $0x420] ss:$24 sps:$4 sm:$0xff]  }
 0x18f   : > { %v1129_v19 = vmax.f32 %v702_v15, 0.0  ;;  %3770 = vmatprep.subr.bf16.mxu0 %v8992_v8  ;;  %4222 = vmatprep.subr.bf16.mxu1 %v8995_v9 }
 0x190   : > { %v1130_v20 = vmax.f32 %v704_v18, 0.0  ;;  %v9028_v18 = vld [vmem:[%s10241_s11 + $0x454] ss:$24 sps:$4 sm:$0xff]  }
 0x191   : > { %v10527_v26 = vpack.c.bf16 %v1129_v19, %v1121_v12  ;;  %v9031_v12 = vld [vmem:[%s10241_s11 + $0x45c] ss:$24 sps:$4 sm:$0xff]  }
 0x192   : > { %v10529_v22 = vpack.c.bf16 %v1130_v20, %v1122_v23  ;;  %v707_v28 = vpop.f32.mrb[8].mxu0  ;;  %3771 = vmatpush1.bf16.msra.mxu0 %v8990_v13  ;;  %4223 = vmatpush1.bf16.msra.mxu1 %v8993_v14  ;;  %v9026_v23 = vld [vmem:[%s10241_s11 + $0x450] ss:$24 sps:$4 sm:$0xff]  }
 0x193   : > { %v708_v29 = vadd.f32 %v707_v28, %v10496_v50  ;;  %v709_v30 = vpop.f32.mrb[9].mxu0  ;;  %3772 = vmatprep.subr.bf16.mxu0 %v8998_v17  ;;  %4224 = vmatprep.subr.bf16.mxu1 %v9001_v21  ;;  %v9029_v20 = vld [vmem:[%s10241_s11 + $0x458] ss:$24 sps:$4 sm:$0xff]   ;;  %v9034_v28 = vld [vmem:[%s10241_s11 + $0x484] ss:$24 sps:$4 sm:$0xff]  }
 0x194   : > { %v710_v32 = vadd.f32 %v709_v30, %v10499_v51  ;;  %v711_v33 = vpop.f32.mrb[10].mxu0  ;;  %3697 = vmatprep.mubr.bf16.mxu0 %v10529_v22  ;;  %4149 = vmatprep.mubr.bf16.mxu1 %v10529_v22 }
 0x195   : > { %v712_v36 = vadd.f32 %v711_v33, %v10496_v50  ;;  %v713_v38 = vpop.f32.mrb[11].mxu0  ;;  %3698 = vmatmul.mubr.bf16.gmra.mrb[100].mxu0 %v10527_v26  ;;  %4150 = vmatmul.mubr.bf16.gmra.mrb[36].mxu1 %v10527_v26  ;;  %v1137_v40 = vmax.f32 %v708_v29, 0.0 }
 0x196   : > { %v714_v39 = vadd.f32 %v713_v38, %v10499_v51  ;;  %3773 = vmatpush1.bf16.msra.mxu0 %v8996_v24  ;;  %4225 = vmatpush1.bf16.msra.mxu1 %v8999_v25  ;;  %v1138_v44 = vmax.f32 %v710_v32, 0.0 }
 0x197   : > { %v1145_v41 = vmax.f32 %v712_v36, 0.0  ;;  %3774 = vmatprep.subr.bf16.mxu0 %v9004_v27  ;;  %4226 = vmatprep.subr.bf16.mxu1 %v9007_v31  ;;  %v9037_v31 = vld [vmem:[%s10241_s11 + $0x48c] ss:$24 sps:$4 sm:$0xff]  }
 0x198   : > { %v1146_v42 = vmax.f32 %v714_v39, 0.0 }
 0x199   : > { %v10547_v47 = vpack.c.bf16 %v1145_v41, %v1137_v40  ;;  %v9040_v41 = vld [vmem:[%s10241_s11 + $0x4b4] ss:$24 sps:$4 sm:$0xff]  }
 0x19a   : > { %v10549_v52 = vpack.c.bf16 %v1146_v42, %v1138_v44  ;;  %v717_v53 = vpop.f32.mrb[12].mxu0  ;;  %3775 = vmatpush1.bf16.msra.mxu0 %v9002_v34  ;;  %4227 = vmatpush1.bf16.msra.mxu1 %v9005_v35  ;;  %v9032_v34 = vld [vmem:[%s10241_s11 + $0x480] ss:$24 sps:$4 sm:$0xff]  }
 0x19b   : > { %v718_v54 = vadd.f32 %v717_v53, %v10496_v50  ;;  %v719_v55 = vpop.f32.mrb[13].mxu0  ;;  %3776 = vmatprep.subr.bf16.mxu0 %v9010_v37  ;;  %4228 = vmatprep.subr.bf16.mxu1 %v9013_v43  ;;  %v9035_v35 = vld [vmem:[%s10241_s11 + $0x488] ss:$24 sps:$4 sm:$0xff]   ;;  %v9043_v43 = vld [vmem:[%s10241_s11 + $0x4bc] ss:$24 sps:$4 sm:$0xff]  }
 0x19c   : > { %v720_v58 = vadd.f32 %v719_v55, %v10499_v51  ;;  %v721_v59 = vpop.f32.mrb[14].mxu0  ;;  %3707 = vmatprep.mubr.bf16.mxu0 %v10549_v52  ;;  %4159 = vmatprep.mubr.bf16.mxu1 %v10549_v52  ;;  %v9046_v55 = vld [vmem:[%s10241_s11 + $0x4e4] ss:$24 sps:$4 sm:$0xff]  }
 0x19d   : > { %v722_v62 = vadd.f32 %v721_v59, %v10496_v50  ;;  %v723_v63 = vpop.f32.mrb[15].mxu0  ;;  %3708 = vmatmul.mubr.bf16.gmra.mrb[104].mxu0 %v10547_v47  ;;  %4160 = vmatmul.mubr.bf16.gmra.mrb[40].mxu1 %v10547_v47  ;;  %v1153_v5 = vmax.f32 %v718_v54, 0.0  ;;  %v9049_v59 = vld [vmem:[%s10241_s11 + $0x4ec] ss:$24 sps:$4 sm:$0xff]  }
 0x19e   : > { %v724_v2 = vadd.f32 %v723_v63, %v10499_v51  ;;  %3777 = vmatpush1.bf16.msra.mxu0 %v9008_v46  ;;  %4229 = vmatpush1.bf16.msra.mxu1 %v9011_v49  ;;  %v1154_v8 = vmax.f32 %v720_v58, 0.0  ;;  %v9038_v46 = vld [vmem:[%s10241_s11 + $0x4b0] ss:$24 sps:$4 sm:$0xff]  }
 0x19f   : > { %v1161_v6 = vmax.f32 %v722_v62, 0.0  ;;  %3778 = vmatprep.subr.bf16.mxu0 %v9016_v56  ;;  %4230 = vmatprep.subr.bf16.mxu1 %v9019_v57  ;;  %v9041_v49 = vld [vmem:[%s10241_s11 + $0x4b8] ss:$24 sps:$4 sm:$0xff]   ;;  %v9047_v63 = vld [vmem:[%s10241_s11 + $0x4e8] ss:$24 sps:$4 sm:$0xff]  }
 0x1a0   : > { %v1162_v9 = vmax.f32 %v724_v2, 0.0  ;;  %v9044_v62 = vld [vmem:[%s10241_s11 + $0x4e0] ss:$24 sps:$4 sm:$0xff]  }
 0x1a1   : > { %v10567_v13 = vpack.c.bf16 %v1161_v6, %v1153_v5 }
 0x1a2   : > { %v10569_v14 = vpack.c.bf16 %v1162_v9, %v1154_v8  ;;  %v727_v15 = vpop.f32.mrb[16].mxu0  ;;  %3779 = vmatpush1.bf16.msra.mxu0 %v9014_v60  ;;  %4231 = vmatpush1.bf16.msra.mxu1 %v9017_v61  ;;  %v9052_v8 = vld [vmem:[%s10241_s11 + $0x514] ss:$24 sps:$4 sm:$0xff]  }
 0x1a3   : > { %v728_v16 = vadd.f32 %v727_v15, %v10496_v50  ;;  %v729_v17 = vpop.f32.mrb[17].mxu0  ;;  %3780 = vmatprep.subr.bf16.mxu0 %v9022_v1  ;;  %4232 = vmatprep.subr.bf16.mxu1 %v9025_v7  ;;  %v9055_v9 = vld [vmem:[%s10241_s11 + $0x51c] ss:$24 sps:$4 sm:$0xff]   ;;  %v9050_v15 = vld [vmem:[%s10241_s11 + $0x510] ss:$24 sps:$4 sm:$0xff]  }
 0x1a4   : > { %v730_v19 = vadd.f32 %v729_v17, %v10499_v51  ;;  %v731_v21 = vpop.f32.mrb[18].mxu0  ;;  %3717 = vmatprep.mubr.bf16.mxu0 %v10569_v14  ;;  %4169 = vmatprep.mubr.bf16.mxu1 %v10569_v14 }
 0x1a5   : > { %v732_v24 = vadd.f32 %v731_v21, %v10496_v50  ;;  %v733_v25 = vpop.f32.mrb[19].mxu0  ;;  %3718 = vmatmul.mubr.bf16.gmra.mrb[108].mxu0 %v10567_v13  ;;  %4170 = vmatmul.mubr.bf16.gmra.mrb[44].mxu1 %v10567_v13  ;;  %v1169_v30 = vmax.f32 %v728_v16, 0.0  ;;  %v9053_v16 = vld [vmem:[%s10241_s11 + $0x518] ss:$24 sps:$4 sm:$0xff]  }
 0x1a6   : > { %v734_v29 = vadd.f32 %v733_v25, %v10499_v51  ;;  %3781 = vmatpush1.bf16.msra.mxu0 %v9020_v10  ;;  %4233 = vmatpush1.bf16.msra.mxu1 %v9023_v11  ;;  %v1170_v32 = vmax.f32 %v730_v19, 0.0  ;;  %v9061_v19 = vld [vmem:[%s10241_s11 + $0x54c] ss:$24 sps:$4 sm:$0xff]  }
 0x1a7   : > { %v1177_v27 = vmax.f32 %v732_v24, 0.0  ;;  %3782 = vmatprep.subr.bf16.mxu0 %v9028_v18  ;;  %4234 = vmatprep.subr.bf16.mxu1 %v9031_v12  ;;  %v9058_v12 = vld [vmem:[%s10241_s11 + $0x544] ss:$24 sps:$4 sm:$0xff]   ;;  %v397_v24 = vld [vmem:[%s10252_s28 + $0x8] sm:$0x77] }
 0x1a8   : > { %v1178_v33 = vmax.f32 %v734_v29, 0.0  ;;  %v9056_v29 = vld [vmem:[%s10241_s11 + $0x540] ss:$24 sps:$4 sm:$0xff]  }
 0x1a9   : > { %v10587_v36 = vpack.c.bf16 %v1177_v27, %v1169_v30  ;;  %v9059_v30 = vld [vmem:[%s10241_s11 + $0x548] ss:$24 sps:$4 sm:$0xff]  }
 0x1aa   : > { %v10589_v38 = vpack.c.bf16 %v1178_v33, %v1170_v32  ;;  %v737_v37 = vpop.f32.mrb[20].mxu0  ;;  %3783 = vmatpush1.bf16.msra.mxu0 %v9026_v23  ;;  %4235 = vmatpush1.bf16.msra.mxu1 %v9029_v20  ;;  %v447_v33 = vrot.slane %v397_v24, %v10487_v45 }
 0x1ab   : > { %v738_v39 = vadd.f32 %v737_v37, %v10496_v50  ;;  %v739_v40 = vpop.f32.mrb[21].mxu0  ;;  %3784 = vmatprep.subr.bf16.mxu0 %v9034_v28  ;;  %4236 = vmatprep.subr.bf16.mxu1 %v9037_v31  ;;  %v9064_v37 = vld [vmem:[%s10241_s11 + $0x574] ss:$24 sps:$4 sm:$0xff]  }
 0x1ac   : > { %v740_v44 = vadd.f32 %v739_v40, %v10499_v51  ;;  %v741_v42 = vpop.f32.mrb[22].mxu0  ;;  %3727 = vmatprep.mubr.bf16.mxu0 %v10589_v38  ;;  %4179 = vmatprep.mubr.bf16.mxu1 %v10589_v38 }
 0x1ad   : > { %v742_v53 = vadd.f32 %v741_v42, %v10496_v50  ;;  %v743_v54 = vpop.f32.mrb[23].mxu0  ;;  %3728 = vmatmul.mubr.bf16.gmra.mrb[112].mxu0 %v10587_v36  ;;  %4180 = vmatmul.mubr.bf16.gmra.mrb[48].mxu1 %v10587_v36  ;;  %v1185_v57 = vmax.f32 %v738_v39, 0.0  ;;  %v9067_v39 = vld [vmem:[%s10241_s11 + $0x57c] ss:$24 sps:$4 sm:$0xff]   ;;  %v451_v42 = vrot.slane %v397_v24, %v10491_v48 }
 0x1ae   : > { %v744_v56 = vadd.f32 %v743_v54, %v10499_v51  ;;  %3785 = vmatpush1.bf16.msra.mxu0 %v9032_v34  ;;  %4237 = vmatpush1.bf16.msra.mxu1 %v9035_v35  ;;  %v1186_v60 = vmax.f32 %v740_v44, 0.0  ;;  %v9065_v44 = vld [vmem:[%s10241_s11 + $0x578] ss:$24 sps:$4 sm:$0xff]  }
 0x1af   : > { %v1193_v58 = vmax.f32 %v742_v53, 0.0  ;;  %3786 = vmatprep.subr.bf16.mxu0 %v9040_v41  ;;  %4238 = vmatprep.subr.bf16.mxu1 %v9043_v43  ;;  %v9062_v43 = vld [vmem:[%s10241_s11 + $0x570] ss:$24 sps:$4 sm:$0xff]   ;;  %v9070_v53 = vld [vmem:[%s10241_s11 + $0x5a4] ss:$24 sps:$4 sm:$0xff]  }
 0x1b0   : > { %v1194_v61 = vmax.f32 %v744_v56, 0.0  ;;  %v399_v56 = vld [vmem:[%s10252_s28 + $0x18] sm:$0x77] }
 0x1b1   : > { %v10607_v1 = vpack.c.bf16 %v1193_v58, %v1185_v57 }
 0x1b2   : > { %v10609_v2 = vpack.c.bf16 %v1194_v61, %v1186_v60  ;;  %v747_v5 = vpop.f32.mrb[24].mxu0  ;;  %3787 = vmatpush1.bf16.msra.mxu0 %v9038_v46  ;;  %4239 = vmatpush1.bf16.msra.mxu1 %v9041_v49  ;;  %v1026_v60 = vpop.f32.mrb[0].mxu1  ;;  %v467_v61 = vrot.slane %v399_v56, %v10491_v48 }
 0x1b3   : > { %v748_v6 = vadd.f32 %v747_v5, %v10496_v50  ;;  %v749_v7 = vpop.f32.mrb[25].mxu0  ;;  %3788 = vmatprep.subr.bf16.mxu0 %v9046_v55  ;;  %4240 = vmatprep.subr.bf16.mxu1 %v9049_v59  ;;  %v10648_v55 = vrot.slane %v447_v33, %v10487_v45  ;;  %v463_v59 = vrot.slane %v399_v56, %v10487_v45  ;;  %v9068_v5 = vld [vmem:[%s10241_s11 + $0x5a0] ss:$24 sps:$4 sm:$0xff]  }
 0x1b4   : > { %v750_v10 = vadd.f32 %v749_v7, %v10499_v51  ;;  %v751_v11 = vpop.f32.mrb[26].mxu0  ;;  %3737 = vmatprep.mubr.bf16.mxu0 %v10609_v2  ;;  %4189 = vmatprep.mubr.bf16.mxu1 %v10609_v2  ;;  %v1028_v7 = vpop.f32.mrb[1].mxu1 }
 0x1b5   : > { %v752_v17 = vadd.f32 %v751_v11, %v10496_v50  ;;  %v753_v18 = vpop.f32.mrb[27].mxu0  ;;  %3738 = vmatmul.mubr.bf16.gmra.mrb[116].mxu0 %v10607_v1  ;;  %4190 = vmatmul.mubr.bf16.gmra.mrb[52].mxu1 %v10607_v1  ;;  %v1201_v23 = vmax.f32 %v748_v6, 0.0  ;;  %v9071_v6 = vld [vmem:[%s10241_s11 + $0x5a8] ss:$24 sps:$4 sm:$0xff]   ;;  %v1030_v11 = vpop.f32.mrb[2].mxu1 }
 0x1b6   : > { %v754_v21 = vadd.f32 %v753_v18, %v10499_v51  ;;  %3789 = vmatpush1.bf16.msra.mxu0 %v9044_v62  ;;  %4241 = vmatpush1.bf16.msra.mxu1 %v9047_v63  ;;  %v1202_v25 = vmax.f32 %v750_v10, 0.0  ;;  %v10655_v63 = vrot.slane %v451_v42, %v10487_v45  ;;  %v10665_v10 = vrot.slane %v467_v61, %v10487_v45 }
 0x1b7   : > { %v1209_v20 = vmax.f32 %v752_v17, 0.0  ;;  %3790 = vmatprep.subr.bf16.mxu0 %v9052_v8  ;;  %4242 = vmatprep.subr.bf16.mxu1 %v9055_v9  ;;  %v10662_v9 = vrot.slane %v463_v59, %v10487_v45  ;;  %v1032_v17 = vpop.f32.mrb[3].mxu1 }
 0x1b8   : > { %v1210_v28 = vmax.f32 %v754_v21, 0.0  ;;  %v9079_v21 = vld [vmem:[%s10241_s11 + $0x5dc] ss:$24 sps:$4 sm:$0xff]  }
 0x1b9   : > { %v10628_v27 = vpack.c.bf16 %v1209_v20, %v1201_v23  ;;  %v1027_v23 = vadd.f32 %v1026_v60, %v10662_v9  ;;  %v1029_v20 = vadd.f32 %v1028_v7, %v10665_v10 }
 0x1ba   : > { %v10630_v31 = vpack.c.bf16 %v1210_v28, %v1202_v25  ;;  %v757_v32 = vpop.f32.mrb[28].mxu0  ;;  %3791 = vmatpush1.bf16.msra.mxu0 %v9050_v15  ;;  %4243 = vmatpush1.bf16.msra.mxu1 %v9053_v16  ;;  %v9074_v28 = vld [vmem:[%s10241_s11 + $0x5d0] ss:$24 sps:$4 sm:$0xff]  }
 0x1bb   : > { %v758_v34 = vadd.f32 %v757_v32, %v10496_v50  ;;  %v759_v35 = vpop.f32.mrb[29].mxu0  ;;  %3792 = vmatprep.subr.bf16.mxu0 %v9058_v12  ;;  %4244 = vmatprep.subr.bf16.mxu1 %v9061_v19  ;;  %v9076_v19 = vld [vmem:[%s10241_s11 + $0x5d4] ss:$24 sps:$4 sm:$0xff]   ;;  %v1033_v32 = vadd.f32 %v1032_v17, %v10665_v10 }
 0x1bc   : > { %v760_v40 = vadd.f32 %v759_v35, %v10499_v51  ;;  %v761_v41 = vpop.f32.mrb[30].mxu0  ;;  %3747 = vmatprep.mubr.bf16.mxu0 %v10630_v31  ;;  %4199 = vmatprep.mubr.bf16.mxu1 %v10630_v31  ;;  %v1111_v35 = vmax.f32 %v1027_v23, 0.0 }
 0x1bd   : > { %v762_v46 = vadd.f32 %v761_v41, %v10496_v50  ;;  %v763_v49 = vpop.f32.mrb[31].mxu0  ;;  %3748 = vmatmul.mubr.bf16.gmra.mrb[120].mxu0 %v10628_v27  ;;  %4200 = vmatmul.mubr.bf16.gmra.mrb[56].mxu1 %v10628_v27  ;;  %v1217_v57 = vmax.f32 %v758_v34, 0.0  ;;  %v9073_v50 = vld [vmem:[%s10241_s11 + $0x5ac] ss:$24 sps:$4 sm:$0xff]  }
 0x1be   : > { %v764_v54 = vadd.f32 %v763_v49, %v10499_v51  ;;  %3793 = vmatpush1.bf16.msra.mxu0 %v9056_v29  ;;  %4245 = vmatpush1.bf16.msra.mxu1 %v9059_v30  ;;  %v1218_v62 = vmax.f32 %v760_v40, 0.0  ;;  %v9077_v29 = vld [vmem:[%s10241_s11 + $0x5d8] ss:$24 sps:$4 sm:$0xff]   ;;  %v1031_v30 = vadd.f32 %v1030_v11, %v10662_v9  ;;  %v9082_v40 = vld [vmem:[%s10241_s11 + $0x604] ss:$24 sps:$4 sm:$0xff]  }
 0x1bf   : > { %v1225_v58 = vmax.f32 %v762_v46, 0.0  ;;  %3794 = vmatprep.subr.bf16.mxu0 %v9064_v37  ;;  %4246 = vmatprep.subr.bf16.mxu1 %v9067_v39  ;;  %v1112_v37 = vmax.f32 %v1029_v20, 0.0  ;;  %v9083_v11 = vld [vmem:[%s10241_s11 + $0x608] ss:$24 sps:$4 sm:$0xff]  }
 0x1c0   : > { %v1226_v51 = vmax.f32 %v764_v54, 0.0  ;;  %v1119_v41 = vmax.f32 %v1031_v30, 0.0  ;;  %v9086_v30 = vld [vmem:[%s10241_s11 + $0x630] ss:$24 sps:$4 sm:$0xff]  }
 0x1c1   : > { %v10659_v8 = vpack.c.bf16 %v1225_v58, %v1217_v57  ;;  %v9080_v58 = vld [vmem:[%s10241_s11 + $0x600] ss:$24 sps:$4 sm:$0xff]  }
 0x1c2   : > { %v10667_v15 = vpack.c.bf16 %v1226_v51, %v1218_v62  ;;  %v800_v16 = vpop.f32.mrb[32].mxu0  ;;  %3795 = vmatpush1.bf16.msra.mxu0 %v9062_v43  ;;  %4247 = vmatpush1.bf16.msra.mxu1 %v9065_v44  ;;  %v1120_v43 = vmax.f32 %v1033_v32, 0.0  ;;  %v1036_v44 = vpop.f32.mrb[4].mxu1 }
 0x1c3   : > { %v801_v18 = vadd.f32 %v800_v16, %v10648_v55  ;;  %v802_v12 = vpop.f32.mrb[33].mxu0  ;;  %3796 = vmatprep.subr.bf16.mxu0 %v9070_v53  ;;  %4248 = vmatprep.subr.bf16.mxu1 %v9073_v50  ;;  %v9085_v53 = vld [vmem:[%s10241_s11 + $0x60c] ss:$24 sps:$4 sm:$0xff]   ;;  %v1037_v54 = vadd.f32 %v1036_v44, %v10662_v9  ;;  %v1038_v56 = vpop.f32.mrb[5].mxu1  ;;  %v10689_v50 = vpack.c.bf16 %v1119_v41, %v1111_v35  ;;  %v9089_v35 = vld [vmem:[%s10241_s11 + $0x638] ss:$24 sps:$4 sm:$0xff]  }
 0x1c4   : > { %v803_v24 = vadd.f32 %v802_v12, %v10655_v63  ;;  %v804_v25 = vpop.f32.mrb[34].mxu0  ;;  %3757 = vmatprep.mubr.bf16.mxu0 %v10667_v15  ;;  %4209 = vmatprep.mubr.bf16.mxu1 %v10667_v15  ;;  %v10691_v59 = vpack.c.bf16 %v1120_v43, %v1112_v37  ;;  %v1039_v60 = vadd.f32 %v1038_v56, %v10665_v10  ;;  %v1040_v61 = vpop.f32.mrb[6].mxu1  ;;  %v9088_v16 = vld [vmem:[%s10241_s11 + $0x634] ss:$24 sps:$4 sm:$0xff]   ;;  %v9094_v37 = vld [vmem:[%s10241_s11 + $0x664] ss:$24 sps:$4 sm:$0xff]  }
 0x1c5   : > { %v805_v33 = vadd.f32 %v804_v25, %v10648_v55  ;;  %v806_v34 = vpop.f32.mrb[35].mxu0  ;;  %3758 = vmatmul.mubr.bf16.gmra.mrb[124].mxu0 %v10659_v8  ;;  %4210 = vmatmul.mubr.bf16.gmra.mrb[60].mxu1 %v10659_v8  ;;  %v1107_v42 = vmax.f32 %v801_v18, 0.0  ;;  %v1127_v51 = vmax.f32 %v1037_v54, 0.0  ;;  %v1042_v17 = vpop.f32.mrb[7].mxu1  ;;  %v9097_v43 = vld [vmem:[%s10241_s11 + $0x66c] ss:$24 sps:$4 sm:$0xff]  }
 0x1c6   : > { %v807_v39 = vadd.f32 %v806_v34, %v10655_v63  ;;  %3797 = vmatpush1.bf16.msra.mxu0 %v9068_v5  ;;  %4249 = vmatpush1.bf16.msra.mxu1 %v9071_v6  ;;  %v1108_v46 = vmax.f32 %v803_v24, 0.0  ;;  %v1041_v5 = vadd.f32 %v1040_v61, %v10662_v9  ;;  %v1043_v20 = vadd.f32 %v1042_v17, %v10665_v10 }
 0x1c7   : > { %v1115_v49 = vmax.f32 %v805_v33, 0.0  ;;  %3798 = vmatprep.subr.bf16.mxu0 %v9076_v19  ;;  %4250 = vmatprep.subr.bf16.mxu1 %v9079_v21  ;;  %v9091_v19 = vld [vmem:[%s10241_s11 + $0x63c] ss:$24 sps:$4 sm:$0xff]   ;;  %v1128_v21 = vmax.f32 %v1039_v60, 0.0 }
 0x1c8   : > { %v1116_v57 = vmax.f32 %v807_v39, 0.0  ;;  %v1135_v23 = vmax.f32 %v1041_v5, 0.0  ;;  %v1136_v33 = vmax.f32 %v1043_v20, 0.0  ;;  %v1046_v39 = vpop.f32.mrb[8].mxu1 }
 0x1c9   : > { %v10694_v62 = vpack.c.bf16 %v1115_v49, %v1107_v42  ;;  %v1047_v42 = vadd.f32 %v1046_v39, %v10662_v9 }
 0x1ca   : > { %v10697_v6 = vpack.c.bf16 %v1116_v57, %v1108_v46  ;;  %v810_v7 = vpop.f32.mrb[36].mxu0  ;;  %3799 = vmatpush1.bf16.msra.mxu0 %v9074_v28  ;;  %4251 = vmatpush1.bf16.msra.mxu1 %v9077_v29  ;;  %v10711_v32 = vpack.c.bf16 %v1135_v23, %v1127_v51  ;;  %v10717_v44 = vpack.c.bf16 %v1136_v33, %v1128_v21  ;;  %v1048_v46 = vpop.f32.mrb[9].mxu1 }
 0x1cb   : > { %v811_v18 = vadd.f32 %v810_v7, %v10648_v55  ;;  %v812_v12 = vpop.f32.mrb[37].mxu0  ;;  %3881 = vmatprep.subr.bf16.mxu0 %v9082_v40  ;;  %4333 = vmatprep.subr.bf16.mxu1 %v9085_v53  ;;  %v1049_v54 = vadd.f32 %v1048_v46, %v10665_v10  ;;  %v1050_v56 = vpop.f32.mrb[10].mxu1  ;;  %v1143_v60 = vmax.f32 %v1047_v42, 0.0  ;;  %v9095_v7 = vld [vmem:[%s10241_s11 + $0x668] ss:$24 sps:$4 sm:$0xff]  }
 0x1cc   : > { %v813_v24 = vadd.f32 %v812_v12, %v10655_v63  ;;  %v814_v25 = vpop.f32.mrb[38].mxu0  ;;  %3800 = vmatprep.mubr.bf16.mxu0 %v10697_v6  ;;  %4252 = vmatprep.mubr.bf16.mxu1 %v10697_v6  ;;  %v1051_v61 = vadd.f32 %v1050_v56, %v10662_v9  ;;  %v9103_v12 = vld [vmem:[%s10241_s11 + $0x69c] ss:$24 sps:$4 sm:$0xff]  }
 0x1cd   : > { %v815_v28 = vadd.f32 %v814_v25, %v10648_v55  ;;  %v816_v29 = vpop.f32.mrb[39].mxu0  ;;  %3801 = vmatmul.mubr.bf16.vlgmr.msra.gmra.mrb[96].mxu0 %v10694_v62  ;;  %4253 = vmatmul.mubr.bf16.vlgmr.msra.gmra.mrb[32].mxu1 %v10694_v62  ;;  %v1123_v40 = vmax.f32 %v811_v18, 0.0 }
 0x1ce   : > { %v817_v34 = vadd.f32 %v816_v29, %v10655_v63  ;;  %3882 = vmatpush1.bf16.msra.mxu0 %v9080_v58  ;;  %4334 = vmatpush1.bf16.msra.mxu1 %v9083_v11  ;;  %v1124_v49 = vmax.f32 %v813_v24, 0.0  ;;  %v9092_v58 = vld [vmem:[%s10241_s11 + $0x660] ss:$24 sps:$4 sm:$0xff]   ;;  %v9100_v11 = vld [vmem:[%s10241_s11 + $0x694] ss:$24 sps:$4 sm:$0xff]   ;;  %v1151_v21 = vmax.f32 %v1051_v61, 0.0 }
 0x1cf   : > { %v1131_v41 = vmax.f32 %v815_v28, 0.0  ;;  %3883 = vmatprep.subr.bf16.mxu0 %v9088_v16  ;;  %4335 = vmatprep.subr.bf16.mxu1 %v9091_v19  ;;  %v1052_v16 = vpop.f32.mrb[11].mxu1  ;;  %v1144_v19 = vmax.f32 %v1049_v54, 0.0  ;;  %v9098_v29 = vld [vmem:[%s10241_s11 + $0x690] ss:$24 sps:$4 sm:$0xff]  }
 0x1d0   : > { %v1132_v53 = vmax.f32 %v817_v34, 0.0  ;;  %v1053_v23 = vadd.f32 %v1052_v16, %v10665_v10  ;;  %v1056_v39 = vpop.f32.mrb[12].mxu1  ;;  %v9104_v61 = vld [vmem:[%s10241_s11 + $0x6c0] ss:$24 sps:$4 sm:$0xff]  }
 0x1d1   : > { %v10721_v57 = vpack.c.bf16 %v1131_v41, %v1123_v40  ;;  %v1057_v46 = vadd.f32 %v1056_v39, %v10662_v9 }
 0x1d2   : > { %v10725_v51 = vpack.c.bf16 %v1132_v53, %v1124_v49  ;;  %v820_v5 = vpop.f32.mrb[40].mxu0  ;;  %3884 = vmatpush1.bf16.msra.mxu0 %v9086_v30  ;;  %4336 = vmatpush1.bf16.msra.mxu1 %v9089_v35  ;;  %v10739_v30 = vpack.c.bf16 %v1151_v21, %v1143_v60  ;;  %v1152_v33 = vmax.f32 %v1053_v23, 0.0  ;;  %v9101_v35 = vld [vmem:[%s10241_s11 + $0x698] ss:$24 sps:$4 sm:$0xff]   ;;  %v1058_v49 = vpop.f32.mrb[13].mxu1 }
 0x1d3   : > { %v821_v17 = vadd.f32 %v820_v5, %v10648_v55  ;;  %v822_v18 = vpop.f32.mrb[41].mxu0  ;;  %3885 = vmatprep.subr.bf16.mxu0 %v9094_v37  ;;  %4337 = vmatprep.subr.bf16.mxu1 %v9097_v43  ;;  %v9106_v37 = vld [vmem:[%s10241_s11 + $0x6c4] ss:$24 sps:$4 sm:$0xff]   ;;  %v1059_v56 = vadd.f32 %v1058_v49, %v10665_v10  ;;  %v1159_v5 = vmax.f32 %v1057_v46, 0.0 }
 0x1d4   : > { %v823_v20 = vadd.f32 %v822_v18, %v10655_v63  ;;  %v824_v24 = vpop.f32.mrb[42].mxu0  ;;  %3810 = vmatprep.mubr.bf16.mxu0 %v10725_v51  ;;  %4262 = vmatprep.mubr.bf16.mxu1 %v10725_v51  ;;  %v9109_v43 = vld [vmem:[%s10241_s11 + $0x6cc] ss:$24 sps:$4 sm:$0xff]   ;;  %v10745_v42 = vpack.c.bf16 %v1152_v33, %v1144_v19  ;;  %v9115_v23 = vld [vmem:[%s10241_s11 + $0x6fc] ss:$24 sps:$4 sm:$0xff]  }
 0x1d5   : > { %v825_v25 = vadd.f32 %v824_v24, %v10648_v55  ;;  %v826_v28 = vpop.f32.mrb[43].mxu0  ;;  %3811 = vmatmul.mubr.bf16.gmra.mrb[100].mxu0 %v10721_v57  ;;  %4263 = vmatmul.mubr.bf16.gmra.mrb[36].mxu1 %v10721_v57  ;;  %v1139_v40 = vmax.f32 %v821_v17, 0.0  ;;  %v9107_v17 = vld [vmem:[%s10241_s11 + $0x6c8] ss:$24 sps:$4 sm:$0xff]   ;;  %v9112_v18 = vld [vmem:[%s10241_s11 + $0x6f4] ss:$24 sps:$4 sm:$0xff]  }
 0x1d6   : > { %v827_v34 = vadd.f32 %v826_v28, %v10655_v63  ;;  %3886 = vmatpush1.bf16.msra.mxu0 %v9092_v58  ;;  %4338 = vmatpush1.bf16.msra.mxu1 %v9095_v7  ;;  %v1140_v53 = vmax.f32 %v823_v20, 0.0  ;;  %v1060_v58 = vpop.f32.mrb[14].mxu1  ;;  %v1160_v20 = vmax.f32 %v1059_v56, 0.0 }
 0x1d7   : > { %v1147_v41 = vmax.f32 %v825_v25, 0.0  ;;  %3887 = vmatprep.subr.bf16.mxu0 %v9100_v11  ;;  %4339 = vmatprep.subr.bf16.mxu1 %v9103_v12  ;;  %v1061_v7 = vadd.f32 %v1060_v58, %v10662_v9  ;;  %v1062_v12 = vpop.f32.mrb[15].mxu1 }
 0x1d8   : > { %v1148_v54 = vmax.f32 %v827_v34, 0.0  ;;  %v1063_v25 = vadd.f32 %v1062_v12, %v10665_v10  ;;  %v1066_v46 = vpop.f32.mrb[16].mxu1 }
 0x1d9   : > { %v10749_v60 = vpack.c.bf16 %v1147_v41, %v1139_v40  ;;  %v1167_v24 = vmax.f32 %v1061_v7, 0.0  ;;  %v9113_v41 = vld [vmem:[%s10241_s11 + $0x6f8] ss:$24 sps:$4 sm:$0xff]   ;;  %v1067_v58 = vadd.f32 %v1066_v46, %v10662_v9 }
 0x1da   : > { %v10753_v11 = vpack.c.bf16 %v1148_v54, %v1140_v53  ;;  %v830_v16 = vpop.f32.mrb[44].mxu0  ;;  %3888 = vmatpush1.bf16.msra.mxu0 %v9098_v29  ;;  %4340 = vmatpush1.bf16.msra.mxu1 %v9101_v35  ;;  %v9110_v35 = vld [vmem:[%s10241_s11 + $0x6f0] ss:$24 sps:$4 sm:$0xff]   ;;  %v1168_v39 = vmax.f32 %v1063_v25, 0.0  ;;  %v9121_v54 = vld [vmem:[%s10241_s11 + $0x72c] ss:$24 sps:$4 sm:$0xff]  }
 0x1db   : > { %12037 = vst [vmem:[#allocation20_spill] sm:$0xff] %v10749_v60  ;;  %v831_v19 = vadd.f32 %v830_v16, %v10648_v55  ;;  %v832_v21 = vpop.f32.mrb[45].mxu0  ;;  %3889 = vmatprep.subr.bf16.mxu0 %v9106_v37  ;;  %4341 = vmatprep.subr.bf16.mxu1 %v9109_v43  ;;  %v10767_v37 = vpack.c.bf16 %v1167_v24, %v1159_v5  ;;  %v9118_v43 = vld [vmem:[%s10241_s11 + $0x724] ss:$24 sps:$4 sm:$0xff]   ;;  %v1068_v5 = vpop.f32.mrb[17].mxu1 }
 0x1dc   : > { %12038 = vst [vmem:[#allocation21_spill] sm:$0xff] %v10753_v11  ;;  %v833_v28 = vadd.f32 %v832_v21, %v10655_v63  ;;  %v834_v29 = vpop.f32.mrb[46].mxu0  ;;  %3820 = vmatprep.mubr.bf16.mxu0 %v10753_v11  ;;  %4272 = vmatprep.mubr.bf16.mxu1 %v10753_v11  ;;  %v10773_v56 = vpack.c.bf16 %v1168_v39, %v1160_v20  ;;  %v1175_v21 = vmax.f32 %v1067_v58, 0.0  ;;  %v9119_v24 = vld [vmem:[%s10241_s11 + $0x728] ss:$24 sps:$4 sm:$0xff]  }
 0x1dd   : > { %v835_v33 = vadd.f32 %v834_v29, %v10648_v55  ;;  %v836_v34 = vpop.f32.mrb[47].mxu0  ;;  %3821 = vmatmul.mubr.bf16.gmra.mrb[104].mxu0 %v10749_v60  ;;  %4273 = vmatmul.mubr.bf16.gmra.mrb[40].mxu1 %v10749_v60  ;;  %v1155_v49 = vmax.f32 %v831_v19, 0.0  ;;  %v9116_v19 = vld [vmem:[%s10241_s11 + $0x720] ss:$24 sps:$4 sm:$0xff]   ;;  %v9124_v25 = vld [vmem:[%s10241_s11 + $0x754] ss:$24 sps:$4 sm:$0xff]  }
 0x1de   : > { %v837_v40 = vadd.f32 %v836_v34, %v10655_v63  ;;  %3890 = vmatpush1.bf16.msra.mxu0 %v9104_v61  ;;  %4342 = vmatpush1.bf16.msra.mxu1 %v9107_v17  ;;  %v1156_v7 = vmax.f32 %v833_v28, 0.0  ;;  %v1069_v61 = vadd.f32 %v1068_v5, %v10665_v10  ;;  %v1070_v17 = vpop.f32.mrb[18].mxu1  ;;  %v9127_v34 = vld [vmem:[%s10241_s11 + $0x75c] ss:$24 sps:$4 sm:$0xff]  }
 0x1df   : > { %v1163_v53 = vmax.f32 %v835_v33, 0.0  ;;  %3891 = vmatprep.subr.bf16.mxu0 %v9112_v18  ;;  %4343 = vmatprep.subr.bf16.mxu1 %v9115_v23  ;;  %v1071_v18 = vadd.f32 %v1070_v17, %v10662_v9  ;;  %v1072_v29 = vpop.f32.mrb[19].mxu1 }
 0x1e0   : > { %v1164_v16 = vmax.f32 %v837_v40, 0.0  ;;  %v1176_v39 = vmax.f32 %v1069_v61, 0.0  ;;  %v1073_v46 = vadd.f32 %v1072_v29, %v10665_v10  ;;  %v1076_v61 = vpop.f32.mrb[20].mxu1 }
 0x1e1   : > { %v10777_v12 = vpack.c.bf16 %v1163_v53, %v1155_v49  ;;  %v1183_v40 = vmax.f32 %v1071_v18, 0.0 }
 0x1e2   : > { %v10781_v23 = vpack.c.bf16 %v1164_v16, %v1156_v7  ;;  %v840_v20 = vpop.f32.mrb[48].mxu0  ;;  %3892 = vmatpush1.bf16.msra.mxu0 %v9110_v35  ;;  %4344 = vmatpush1.bf16.msra.mxu1 %v9113_v41  ;;  %v1184_v58 = vmax.f32 %v1073_v46, 0.0  ;;  %v9125_v7 = vld [vmem:[%s10241_s11 + $0x758] ss:$24 sps:$4 sm:$0xff]   ;;  %v9130_v16 = vld [vmem:[%s10241_s11 + $0x784] ss:$24 sps:$4 sm:$0xff]  }
 0x1e3   : > { %12039 = vst [vmem:[#allocation22_spill] sm:$0xff] %v10777_v12  ;;  %v841_v28 = vadd.f32 %v840_v20, %v10648_v55  ;;  %v842_v33 = vpop.f32.mrb[49].mxu0  ;;  %3893 = vmatprep.subr.bf16.mxu0 %v9118_v43  ;;  %4345 = vmatprep.subr.bf16.mxu1 %v9121_v54  ;;  %v9122_v43 = vld [vmem:[%s10241_s11 + $0x750] ss:$24 sps:$4 sm:$0xff]   ;;  %v10795_v54 = vpack.c.bf16 %v1183_v40, %v1175_v21  ;;  %v9133_v20 = vld [vmem:[%s10241_s11 + $0x78c] ss:$24 sps:$4 sm:$0xff]  }
 0x1e4   : > { %12040 = vst [vmem:[#allocation23_spill] sm:$0xff] %v10781_v23  ;;  %v843_v49 = vadd.f32 %v842_v33, %v10655_v63  ;;  %v844_v35 = vpop.f32.mrb[50].mxu0  ;;  %3830 = vmatprep.mubr.bf16.mxu0 %v10781_v23  ;;  %4282 = vmatprep.mubr.bf16.mxu1 %v10781_v23  ;;  %v10801_v29 = vpack.c.bf16 %v1184_v58, %v1176_v39  ;;  %v1078_v33 = vpop.f32.mrb[21].mxu1  ;;  %v9136_v58 = vld [vmem:[%s10241_s11 + $0x7b4] ss:$24 sps:$4 sm:$0xff]  }
 0x1e5   : > { %v845_v41 = vadd.f32 %v844_v35, %v10648_v55  ;;  %v846_v53 = vpop.f32.mrb[51].mxu0  ;;  %3831 = vmatmul.mubr.bf16.gmra.mrb[108].mxu0 %v10777_v12  ;;  %4283 = vmatmul.mubr.bf16.gmra.mrb[44].mxu1 %v10777_v12  ;;  %v1171_v17 = vmax.f32 %v841_v28, 0.0  ;;  %v1077_v21 = vadd.f32 %v1076_v61, %v10662_v9  ;;  %v9128_v28 = vld [vmem:[%s10241_s11 + $0x780] ss:$24 sps:$4 sm:$0xff]   ;;  %v398_v23 = vld [vmem:[%s10252_s28 + $0x10] sm:$0x77] }
 0x1e6   : > { %v847_v5 = vadd.f32 %v846_v53, %v10655_v63  ;;  %3894 = vmatpush1.bf16.msra.mxu0 %v9116_v19  ;;  %4346 = vmatpush1.bf16.msra.mxu1 %v9119_v24  ;;  %v1172_v40 = vmax.f32 %v843_v49, 0.0  ;;  %v1079_v19 = vadd.f32 %v1078_v33, %v10665_v10  ;;  %v1080_v24 = vpop.f32.mrb[22].mxu1  ;;  %v9131_v53 = vld [vmem:[%s10241_s11 + $0x788] ss:$24 sps:$4 sm:$0xff]  }
 0x1e7   : > { %v1179_v18 = vmax.f32 %v845_v41, 0.0  ;;  %3895 = vmatprep.subr.bf16.mxu0 %v9124_v25  ;;  %4347 = vmatprep.subr.bf16.mxu1 %v9127_v34  ;;  %v1191_v41 = vmax.f32 %v1077_v21, 0.0  ;;  %v1081_v25 = vadd.f32 %v1080_v24, %v10662_v9  ;;  %v1082_v61 = vpop.f32.mrb[23].mxu1 }
 0x1e8   : > { %v1180_v46 = vmax.f32 %v847_v5, 0.0  ;;  %v1083_v21 = vadd.f32 %v1082_v61, %v10665_v10  ;;  %v1086_v61 = vpop.f32.mrb[24].mxu1 }
 0x1e9   : > { %v10805_v35 = vpack.c.bf16 %v1179_v18, %v1171_v17  ;;  %v9139_v17 = vld [vmem:[%s10241_s11 + $0x7bc] ss:$24 sps:$4 sm:$0xff]   ;;  %v1192_v18 = vmax.f32 %v1079_v19, 0.0  ;;  %v1199_v33 = vmax.f32 %v1081_v25, 0.0  ;;  %v9137_v25 = vld [vmem:[%s10241_s11 + $0x7b8] ss:$24 sps:$4 sm:$0xff]  }
 0x1ea   : > { %v10809_v34 = vpack.c.bf16 %v1180_v46, %v1172_v40  ;;  %v850_v39 = vpop.f32.mrb[52].mxu0  ;;  %3896 = vmatpush1.bf16.msra.mxu0 %v9122_v43  ;;  %4348 = vmatpush1.bf16.msra.mxu1 %v9125_v7  ;;  %v1200_v19 = vmax.f32 %v1083_v21, 0.0 }
 0x1eb   : > { %12041 = vst [vmem:[#allocation24_spill] sm:$0xff] %v10805_v35  ;;  %v851_v49 = vadd.f32 %v850_v39, %v10648_v55  ;;  %v852_v5 = vpop.f32.mrb[53].mxu0  ;;  %3897 = vmatprep.subr.bf16.mxu0 %v9130_v16  ;;  %4349 = vmatprep.subr.bf16.mxu1 %v9133_v20  ;;  %v9134_v16 = vld [vmem:[%s10241_s11 + $0x7b0] ss:$24 sps:$4 sm:$0xff]   ;;  %v10823_v20 = vpack.c.bf16 %v1199_v33, %v1191_v41  ;;  %v9142_v39 = vld [vmem:[%s10241_s11 + $0x7e4] ss:$24 sps:$4 sm:$0xff]  }
 0x1ec   : > { %12042 = vst [vmem:[#allocation25_spill] sm:$0xff] %v10809_v34  ;;  %v853_v40 = vadd.f32 %v852_v5, %v10655_v63  ;;  %v854_v43 = vpop.f32.mrb[54].mxu0  ;;  %3840 = vmatprep.mubr.bf16.mxu0 %v10809_v34  ;;  %4292 = vmatprep.mubr.bf16.mxu1 %v10809_v34  ;;  %v10829_v34 = vpack.c.bf16 %v1200_v19, %v1192_v18  ;;  %v1088_v33 = vpop.f32.mrb[25].mxu1  ;;  %v9143_v19 = vld [vmem:[%s10241_s11 + $0x7e8] ss:$24 sps:$4 sm:$0xff]  }
 0x1ed   : > { %v855_v7 = vadd.f32 %v854_v43, %v10648_v55  ;;  %v856_v46 = vpop.f32.mrb[55].mxu0  ;;  %3841 = vmatmul.mubr.bf16.gmra.mrb[112].mxu0 %v10805_v35  ;;  %4293 = vmatmul.mubr.bf16.gmra.mrb[48].mxu1 %v10805_v35  ;;  %v1187_v5 = vmax.f32 %v851_v49, 0.0  ;;  %v1087_v41 = vadd.f32 %v1086_v61, %v10662_v9  ;;  %v9140_v49 = vld [vmem:[%s10241_s11 + $0x7e0] ss:$24 sps:$4 sm:$0xff]   ;;  %v9148_v61 = vld [vmem:[%s10241_s11 + $0x814] ss:$24 sps:$4 sm:$0xff]  }
 0x1ee   : > { %v857_v24 = vadd.f32 %v856_v46, %v10655_v63  ;;  %3898 = vmatpush1.bf16.msra.mxu0 %v9128_v28  ;;  %4350 = vmatpush1.bf16.msra.mxu1 %v9131_v53  ;;  %v1188_v21 = vmax.f32 %v853_v40, 0.0  ;;  %v1089_v28 = vadd.f32 %v1088_v33, %v10665_v10  ;;  %v1090_v53 = vpop.f32.mrb[26].mxu1 }
 0x1ef   : > { %v1195_v43 = vmax.f32 %v855_v7, 0.0  ;;  %3899 = vmatprep.subr.bf16.mxu0 %v9136_v58  ;;  %4351 = vmatprep.subr.bf16.mxu1 %v9139_v17  ;;  %v1207_v7 = vmax.f32 %v1087_v41, 0.0  ;;  %v1091_v58 = vadd.f32 %v1090_v53, %v10662_v9  ;;  %v1092_v12 = vpop.f32.mrb[27].mxu1 }
 0x1f0   : > { %v1196_v46 = vmax.f32 %v857_v24, 0.0  ;;  %v1093_v33 = vadd.f32 %v1092_v12, %v10665_v10 }
 0x1f1   : > { %v10833_v35 = vpack.c.bf16 %v1195_v43, %v1187_v5  ;;  %v9151_v5 = vld [vmem:[%s10241_s11 + $0x81c] ss:$24 sps:$4 sm:$0xff]   ;;  %v1208_v43 = vmax.f32 %v1089_v28, 0.0  ;;  %v1215_v41 = vmax.f32 %v1091_v58, 0.0 }
 0x1f2   : > { %v10837_v17 = vpack.c.bf16 %v1196_v46, %v1188_v21  ;;  %v860_v18 = vpop.f32.mrb[56].mxu0  ;;  %3900 = vmatpush1.bf16.msra.mxu0 %v9134_v16  ;;  %4352 = vmatpush1.bf16.msra.mxu1 %v9137_v25  ;;  %v1216_v28 = vmax.f32 %v1093_v33, 0.0  ;;  %v9154_v58 = vld [vmem:[%s10241_s11 + $0x844] ss:$24 sps:$4 sm:$0xff]  }
 0x1f3   : > { %12043 = vst [vmem:[#allocation26_spill] sm:$0xff] %v10833_v35  ;;  %v861_v40 = vadd.f32 %v860_v18, %v10648_v55  ;;  %v862_v24 = vpop.f32.mrb[57].mxu0  ;;  %3901 = vmatprep.subr.bf16.mxu0 %v9142_v39  ;;  %4353 = vmatprep.subr.bf16.mxu1 %v9145_v0  ;;  %v9146_v0 = vld [vmem:[%s10241_s11 + $0x810] ss:$24 sps:$4 sm:$0xff]   ;;  %v10852_v12 = vpack.c.bf16 %v1215_v41, %v1207_v7  ;;  %v9157_v18 = vld [vmem:[%s10241_s11 + $0x84c] ss:$24 sps:$4 sm:$0xff]  }
 0x1f4   : > { %12044 = vst [vmem:[#allocation27_spill] sm:$0xff] %v10837_v17  ;;  %v863_v21 = vadd.f32 %v862_v24, %v10655_v63  ;;  %v864_v16 = vpop.f32.mrb[58].mxu0  ;;  %3850 = vmatprep.mubr.bf16.mxu0 %v10837_v17  ;;  %4302 = vmatprep.mubr.bf16.mxu1 %v10837_v17  ;;  %v9149_v39 = vld [vmem:[%s10241_s11 + $0x818] ss:$24 sps:$4 sm:$0xff]   ;;  %v1096_v24 = vpop.f32.mrb[28].mxu1 }
 0x1f5   : > { %v865_v25 = vadd.f32 %v864_v16, %v10648_v55  ;;  %v866_v46 = vpop.f32.mrb[59].mxu0  ;;  %3851 = vmatmul.mubr.bf16.gmra.mrb[116].mxu0 %v10833_v35  ;;  %4303 = vmatmul.mubr.bf16.gmra.mrb[52].mxu1 %v10833_v35  ;;  %v1203_v16 = vmax.f32 %v861_v40, 0.0  ;;  %v10858_v35 = vpack.c.bf16 %v1216_v28, %v1208_v43  ;;  %v1097_v7 = vadd.f32 %v1096_v24, %v10662_v9  ;;  %v1098_v41 = vpop.f32.mrb[29].mxu1  ;;  %v9152_v40 = vld [vmem:[%s10241_s11 + $0x840] ss:$24 sps:$4 sm:$0xff]  }
 0x1f6   : > { %v867_v53 = vadd.f32 %v866_v46, %v10655_v63  ;;  %3902 = vmatpush1.bf16.msra.mxu0 %v9140_v49  ;;  %4354 = vmatpush1.bf16.msra.mxu1 %v9143_v19  ;;  %v1204_v33 = vmax.f32 %v863_v21, 0.0  ;;  %v1099_v49 = vadd.f32 %v1098_v41, %v10665_v10  ;;  %v1100_v19 = vpop.f32.mrb[30].mxu1  ;;  %v9155_v28 = vld [vmem:[%s10241_s11 + $0x848] ss:$24 sps:$4 sm:$0xff]   ;;  %v9160_v24 = vld [vmem:[%s10241_s11 + $0x874] ss:$24 sps:$4 sm:$0xff]   ;;  %v455_v21 = vrot.slane %v398_v23, %v10487_v45 }
 0x1f7   : > { %v1211_v17 = vmax.f32 %v865_v25, 0.0  ;;  %3903 = vmatprep.subr.bf16.mxu0 %v9148_v61  ;;  %4355 = vmatprep.subr.bf16.mxu1 %v9151_v5  ;;  %v1223_v25 = vmax.f32 %v1097_v7, 0.0  ;;  %v1101_v61 = vadd.f32 %v1100_v19, %v10662_v9  ;;  %v9161_v19 = vld [vmem:[%s10241_s11 + $0x878] ss:$24 sps:$4 sm:$0xff]  }
 0x1f8   : > { %v1212_v46 = vmax.f32 %v867_v53, 0.0  ;;  %v1102_v53 = vpop.f32.mrb[31].mxu1 }
 0x1f9   : > { %v10862_v60 = vpack.c.bf16 %v1211_v17, %v1203_v16  ;;  %v9163_v17 = vld [vmem:[%s10241_s11 + $0x87c] ss:$24 sps:$4 sm:$0xff]   ;;  %v1224_v16 = vmax.f32 %v1099_v49, 0.0  ;;  %v1231_v7 = vmax.f32 %v1101_v61, 0.0  ;;  %v1103_v9 = vadd.f32 %v1102_v53, %v10665_v10  ;;  %v9158_v49 = vld [vmem:[%s10241_s11 + $0x870] ss:$24 sps:$4 sm:$0xff]  }
 0x1fa   : > { %v10866_v5 = vpack.c.bf16 %v1212_v46, %v1204_v33  ;;  %v870_v43 = vpop.f32.mrb[60].mxu0  ;;  %3904 = vmatpush1.bf16.msra.mxu0 %v9146_v0  ;;  %4356 = vmatpush1.bf16.msra.mxu1 %v9149_v39  ;;  %v459_v33 = vrot.slane %v398_v23, %v10491_v48  ;;  %v9166_v23 = vld [vmem:[%s10241_s11 + $0x8a4] ss:$24 sps:$4 sm:$0xff]  }
 0x1fb   : > { %v871_v41 = vadd.f32 %v870_v43, %v10648_v55  ;;  %v872_v11 = vpop.f32.mrb[61].mxu0  ;;  %3905 = vmatprep.subr.bf16.mxu0 %v9154_v58  ;;  %4357 = vmatprep.subr.bf16.mxu1 %v9157_v18  ;;  %v10881_v10 = vpack.c.bf16 %v1231_v7, %v1223_v25  ;;  %v1232_v18 = vmax.f32 %v1103_v9, 0.0  ;;  %v9169_v43 = vld [vmem:[%s10241_s11 + $0x8ac] ss:$24 sps:$4 sm:$0xff]  }
 0x1fc   : > { %v873_v0 = vadd.f32 %v872_v11, %v10655_v63  ;;  %v874_v39 = vpop.f32.mrb[62].mxu0  ;;  %3860 = vmatprep.mubr.bf16.mxu0 %v10866_v5  ;;  %4312 = vmatprep.mubr.bf16.mxu1 %v10866_v5 }
 0x1fd   : > { %v875_v46 = vadd.f32 %v874_v39, %v10648_v55  ;;  %v876_v58 = vpop.f32.mrb[63].mxu0  ;;  %3861 = vmatmul.mubr.bf16.gmra.mrb[120].mxu0 %v10862_v60  ;;  %4313 = vmatmul.mubr.bf16.gmra.mrb[56].mxu1 %v10862_v60  ;;  %v1219_v61 = vmax.f32 %v871_v41, 0.0  ;;  %v10887_v55 = vrot.slane %v455_v21, %v10487_v45  ;;  %v10891_v25 = vpack.c.bf16 %v1232_v18, %v1224_v16  ;;  %v9164_v21 = vld [vmem:[%s10241_s11 + $0x8a0] ss:$24 sps:$4 sm:$0xff]   ;;  %v9172_v16 = vld [vmem:[%s10241_s11 + $0x8d4] ss:$24 sps:$4 sm:$0xff]  }
 0x1fe   : > { %v877_v11 = vadd.f32 %v876_v58, %v10655_v63  ;;  %3906 = vmatpush1.bf16.msra.mxu0 %v9152_v40  ;;  %4358 = vmatpush1.bf16.msra.mxu1 %v9155_v28  ;;  %v1220_v63 = vmax.f32 %v873_v0, 0.0  ;;  %v10894_v28 = vrot.slane %v459_v33, %v10487_v45  ;;  %v9175_v0 = vld [vmem:[%s10241_s11 + $0x8dc] ss:$24 sps:$4 sm:$0xff]   ;;  %v9170_v18 = vld [vmem:[%s10241_s11 + $0x8d0] ss:$24 sps:$4 sm:$0xff]  }
 0x1ff   : > { %v1227_v48 = vmax.f32 %v875_v46, 0.0  ;;  %3907 = vmatprep.subr.bf16.mxu0 %v9160_v24  ;;  %4359 = vmatprep.subr.bf16.mxu1 %v9163_v17  ;;  %v9167_v17 = vld [vmem:[%s10241_s11 + $0x8a8] ss:$24 sps:$4 sm:$0xff]  }
 0x200   : > { %v1228_v40 = vmax.f32 %v877_v11, 0.0  ;;  %v9173_v11 = vld [vmem:[%s10241_s11 + $0x8d8] ss:$24 sps:$4 sm:$0xff]  }
 0x201   : > { %v10896_v53 = vpack.c.bf16 %v1227_v48, %v1219_v61  ;;  %v9178_v61 = vld [vmem:[%s10241_s11 + $0x904] ss:$24 sps:$4 sm:$0xff]  }
 0x202   : > { %v10898_v41 = vpack.c.bf16 %v1228_v40, %v1220_v63  ;;  %v913_v24 = vpop.f32.mrb[64].mxu0  ;;  %3908 = vmatpush1.bf16.msra.mxu0 %v9158_v49  ;;  %4360 = vmatpush1.bf16.msra.mxu1 %v9161_v19  ;;  %v9181_v48 = vld [vmem:[%s10241_s11 + $0x90c] ss:$24 sps:$4 sm:$0xff]  }
 0x203   : > { %v914_v7 = vadd.f32 %v913_v24, %v10887_v55  ;;  %v915_v9 = vpop.f32.mrb[65].mxu0  ;;  %3909 = vmatprep.subr.bf16.mxu0 %v9166_v23  ;;  %4361 = vmatprep.subr.bf16.mxu1 %v9169_v43 }
 0x204   : > { %v916_v45 = vadd.f32 %v915_v9, %v10894_v28  ;;  %v917_v39 = vpop.f32.mrb[66].mxu0  ;;  %3870 = vmatprep.mubr.bf16.mxu0 %v10898_v41  ;;  %4322 = vmatprep.mubr.bf16.mxu1 %v10898_v41 }
 0x205   : > { %v918_v33 = vadd.f32 %v917_v39, %v10887_v55  ;;  %v919_v46 = vpop.f32.mrb[67].mxu0  ;;  %3871 = vmatmul.mubr.bf16.gmra.mrb[124].mxu0 %v10896_v53  ;;  %4323 = vmatmul.mubr.bf16.gmra.mrb[60].mxu1 %v10896_v53  ;;  %v1109_v49 = vmax.f32 %v914_v7, 0.0 }
 0x206   : > { %v920_v58 = vadd.f32 %v919_v46, %v10894_v28  ;;  %3910 = vmatpush1.bf16.msra.mxu0 %v9164_v21  ;;  %4362 = vmatpush1.bf16.msra.mxu1 %v9167_v17  ;;  %v1110_v23 = vmax.f32 %v916_v45, 0.0  ;;  %v9176_v21 = vld [vmem:[%s10241_s11 + $0x900] ss:$24 sps:$4 sm:$0xff]  }
 0x207   : > { %v1117_v19 = vmax.f32 %v918_v33, 0.0  ;;  %3911 = vmatprep.subr.bf16.mxu0 %v9172_v16  ;;  %4363 = vmatprep.subr.bf16.mxu1 %v9175_v0  ;;  %v9179_v17 = vld [vmem:[%s10241_s11 + $0x908] ss:$24 sps:$4 sm:$0xff]   ;;  %v9184_v16 = vld [vmem:[%s10241_s11 + $0x934] ss:$24 sps:$4 sm:$0xff]  }
 0x208   : > { %v1118_v43 = vmax.f32 %v920_v58, 0.0  ;;  %v9187_v0 = vld [vmem:[%s10241_s11 + $0x93c] ss:$24 sps:$4 sm:$0xff]  }
 0x209   : > { %v10916_v63 = vpack.c.bf16 %v1117_v19, %v1109_v49 }
 0x20a   : > { %v10918_v40 = vpack.c.bf16 %v1118_v43, %v1110_v23  ;;  %v923_v24 = vpop.f32.mrb[68].mxu0  ;;  %3912 = vmatpush1.bf16.msra.mxu0 %v9170_v18  ;;  %4364 = vmatpush1.bf16.msra.mxu1 %v9173_v11  ;;  %v9182_v18 = vld [vmem:[%s10241_s11 + $0x930] ss:$24 sps:$4 sm:$0xff]  }
 0x20b   : > { %v924_v7 = vadd.f32 %v923_v24, %v10887_v55  ;;  %v925_v9 = vpop.f32.mrb[69].mxu0  ;;  %3994 = vmatprep.subr.bf16.mxu0 %v9178_v61  ;;  %4446 = vmatprep.subr.bf16.mxu1 %v9181_v48  ;;  %v9185_v11 = vld [vmem:[%s10241_s11 + $0x938] ss:$24 sps:$4 sm:$0xff]   ;;  %v9190_v61 = vld [vmem:[%s10241_s11 + $0x964] ss:$24 sps:$4 sm:$0xff]  }
 0x20c   : > { %v926_v45 = vadd.f32 %v925_v9, %v10894_v28  ;;  %v927_v39 = vpop.f32.mrb[70].mxu0  ;;  %3913 = vmatprep.mubr.bf16.mxu0 %v10918_v40  ;;  %4365 = vmatprep.mubr.bf16.mxu1 %v10918_v40  ;;  %v9193_v48 = vld [vmem:[%s10241_s11 + $0x96c] ss:$24 sps:$4 sm:$0xff]  }
 0x20d   : > { %v928_v33 = vadd.f32 %v927_v39, %v10887_v55  ;;  %v929_v46 = vpop.f32.mrb[71].mxu0  ;;  %3914 = vmatmul.mubr.bf16.vlgmr.msra.gmra.mrb[96].mxu0 %v10916_v63  ;;  %4366 = vmatmul.mubr.bf16.vlgmr.msra.gmra.mrb[32].mxu1 %v10916_v63  ;;  %v1125_v49 = vmax.f32 %v924_v7, 0.0  ;;  %v9191_v39 = vld [vmem:[%s10241_s11 + $0x968] ss:$24 sps:$4 sm:$0xff]  }
 0x20e   : > { %v930_v58 = vadd.f32 %v929_v46, %v10894_v28  ;;  %3995 = vmatpush1.bf16.msra.mxu0 %v9176_v21  ;;  %4447 = vmatpush1.bf16.msra.mxu1 %v9179_v17  ;;  %v1126_v23 = vmax.f32 %v926_v45, 0.0  ;;  %v9188_v17 = vld [vmem:[%s10241_s11 + $0x960] ss:$24 sps:$4 sm:$0xff]  }
 0x20f   : > { %v1133_v19 = vmax.f32 %v928_v33, 0.0  ;;  %3996 = vmatprep.subr.bf16.mxu0 %v9184_v16  ;;  %4448 = vmatprep.subr.bf16.mxu1 %v9187_v0  ;;  %v9196_v16 = vld [vmem:[%s10241_s11 + $0x994] ss:$24 sps:$4 sm:$0xff]  }
 0x210   : > { %v1134_v43 = vmax.f32 %v930_v58, 0.0  ;;  %v9199_v0 = vld [vmem:[%s10241_s11 + $0x99c] ss:$24 sps:$4 sm:$0xff]  }
 0x211   : > { %v10936_v24 = vpack.c.bf16 %v1133_v19, %v1125_v49  ;;  %v9194_v49 = vld [vmem:[%s10241_s11 + $0x990] ss:$24 sps:$4 sm:$0xff]  }
 0x212   : > { %v10938_v9 = vpack.c.bf16 %v1134_v43, %v1126_v23  ;;  %v933_v21 = vpop.f32.mrb[72].mxu0  ;;  %3997 = vmatpush1.bf16.msra.mxu0 %v9182_v18  ;;  %4449 = vmatpush1.bf16.msra.mxu1 %v9185_v11  ;;  %v9197_v19 = vld [vmem:[%s10241_s11 + $0x998] ss:$24 sps:$4 sm:$0xff]   ;;  %v9202_v23 = vld [vmem:[%s10241_s11 + $0x9c4] ss:$24 sps:$4 sm:$0xff]  }
 0x213   : > { %12045 = vst [vmem:[#allocation28_spill] sm:$0xff] %v10936_v24  ;;  %v934_v7 = vadd.f32 %v933_v21, %v10887_v55  ;;  %v935_v33 = vpop.f32.mrb[73].mxu0  ;;  %3998 = vmatprep.subr.bf16.mxu0 %v9190_v61  ;;  %4450 = vmatprep.subr.bf16.mxu1 %v9193_v48  ;;  %v9205_v43 = vld [vmem:[%s10241_s11 + $0x9cc] ss:$24 sps:$4 sm:$0xff]  }
 0x214   : > { %v936_v45 = vadd.f32 %v935_v33, %v10894_v28  ;;  %v937_v46 = vpop.f32.mrb[74].mxu0  ;;  %3923 = vmatprep.mubr.bf16.mxu0 %v10938_v9  ;;  %4375 = vmatprep.mubr.bf16.mxu1 %v10938_v9 }
 0x215   : > { %v938_v58 = vadd.f32 %v937_v46, %v10887_v55  ;;  %v939_v18 = vpop.f32.mrb[75].mxu0  ;;  %3924 = vmatmul.mubr.bf16.gmra.mrb[100].mxu0 %v10936_v24  ;;  %4376 = vmatmul.mubr.bf16.gmra.mrb[36].mxu1 %v10936_v24  ;;  %v1141_v61 = vmax.f32 %v934_v7, 0.0 }
 0x216   : > { %v940_v11 = vadd.f32 %v939_v18, %v10894_v28  ;;  %3999 = vmatpush1.bf16.msra.mxu0 %v9188_v17  ;;  %4451 = vmatpush1.bf16.msra.mxu1 %v9191_v39  ;;  %v1142_v21 = vmax.f32 %v936_v45, 0.0  ;;  %v9200_v39 = vld [vmem:[%s10241_s11 + $0x9c0] ss:$24 sps:$4 sm:$0xff]  }
 0x217   : > { %v1149_v48 = vmax.f32 %v938_v58, 0.0  ;;  %4000 = vmatprep.subr.bf16.mxu0 %v9196_v16  ;;  %4452 = vmatprep.subr.bf16.mxu1 %v9199_v0  ;;  %v9203_v18 = vld [vmem:[%s10241_s11 + $0x9c8] ss:$24 sps:$4 sm:$0xff]   ;;  %v9208_v16 = vld [vmem:[%s10241_s11 + $0x9f4] ss:$24 sps:$4 sm:$0xff]  }
 0x218   : > { %v1150_v33 = vmax.f32 %v940_v11, 0.0  ;;  %v9211_v0 = vld [vmem:[%s10241_s11 + $0x9fc] ss:$24 sps:$4 sm:$0xff]  }
 0x219   : > { %v10956_v46 = vpack.c.bf16 %v1149_v48, %v1141_v61  ;;  %v9206_v48 = vld [vmem:[%s10241_s11 + $0x9f0] ss:$24 sps:$4 sm:$0xff]  }
 0x21a   : > { %v10958_v24 = vpack.c.bf16 %v1150_v33, %v1142_v21  ;;  %v943_v17 = vpop.f32.mrb[76].mxu0  ;;  %4001 = vmatpush1.bf16.msra.mxu0 %v9194_v49  ;;  %4453 = vmatpush1.bf16.msra.mxu1 %v9197_v19  ;;  %v9214_v33 = vld [vmem:[%s10241_s11 + $0xa24] ss:$24 sps:$4 sm:$0xff]  }
 0x21b   : > { %12046 = vst [vmem:[#allocation29_spill] sm:$0xff] %v10956_v46  ;;  %v944_v7 = vadd.f32 %v943_v17, %v10887_v55  ;;  %v945_v58 = vpop.f32.mrb[77].mxu0  ;;  %4002 = vmatprep.subr.bf16.mxu0 %v9202_v23  ;;  %4454 = vmatprep.subr.bf16.mxu1 %v9205_v43  ;;  %v9209_v23 = vld [vmem:[%s10241_s11 + $0x9f8] ss:$24 sps:$4 sm:$0xff]   ;;  %v9217_v17 = vld [vmem:[%s10241_s11 + $0xa2c] ss:$24 sps:$4 sm:$0xff]  }
 0x21c   : > { %12047 = vst [vmem:[#allocation30_spill] sm:$0xff] %v10958_v24  ;;  %v946_v45 = vadd.f32 %v945_v58, %v10894_v28  ;;  %v947_v11 = vpop.f32.mrb[78].mxu0  ;;  %3933 = vmatprep.mubr.bf16.mxu0 %v10958_v24  ;;  %4385 = vmatprep.mubr.bf16.mxu1 %v10958_v24 }
 0x21d   : > { %v948_v49 = vadd.f32 %v947_v11, %v10887_v55  ;;  %v949_v19 = vpop.f32.mrb[79].mxu0  ;;  %3934 = vmatmul.mubr.bf16.gmra.mrb[104].mxu0 %v10956_v46  ;;  %4386 = vmatmul.mubr.bf16.gmra.mrb[40].mxu1 %v10956_v46  ;;  %v1157_v43 = vmax.f32 %v944_v7, 0.0 }
 0x21e   : > { %v950_v61 = vadd.f32 %v949_v19, %v10894_v28  ;;  %4003 = vmatpush1.bf16.msra.mxu0 %v9200_v39  ;;  %4455 = vmatpush1.bf16.msra.mxu1 %v9203_v18  ;;  %v1158_v58 = vmax.f32 %v946_v45, 0.0  ;;  %v9212_v18 = vld [vmem:[%s10241_s11 + $0xa20] ss:$24 sps:$4 sm:$0xff]  }
 0x21f   : > { %v1165_v21 = vmax.f32 %v948_v49, 0.0  ;;  %4004 = vmatprep.subr.bf16.mxu0 %v9208_v16  ;;  %4456 = vmatprep.subr.bf16.mxu1 %v9211_v0  ;;  %v9215_v19 = vld [vmem:[%s10241_s11 + $0xa28] ss:$24 sps:$4 sm:$0xff]   ;;  %v9220_v16 = vld [vmem:[%s10241_s11 + $0xa54] ss:$24 sps:$4 sm:$0xff]  }
 0x220   : > { %v1166_v11 = vmax.f32 %v950_v61, 0.0  ;;  %v9223_v0 = vld [vmem:[%s10241_s11 + $0xa5c] ss:$24 sps:$4 sm:$0xff]  }
 0x221   : > { %v10976_v24 = vpack.c.bf16 %v1165_v21, %v1157_v43  ;;  %v9218_v21 = vld [vmem:[%s10241_s11 + $0xa50] ss:$24 sps:$4 sm:$0xff]  }
 0x222   : > { %v10978_v46 = vpack.c.bf16 %v1166_v11, %v1158_v58  ;;  %v953_v39 = vpop.f32.mrb[80].mxu0  ;;  %4005 = vmatpush1.bf16.msra.mxu0 %v9206_v48  ;;  %4457 = vmatpush1.bf16.msra.mxu1 %v9209_v23  ;;  %v9226_v11 = vld [vmem:[%s10241_s11 + $0xa84] ss:$24 sps:$4 sm:$0xff]  }
 0x223   : > { %12048 = vst [vmem:[#allocation31_spill] sm:$0xff] %v10976_v24  ;;  %v954_v7 = vadd.f32 %v953_v39, %v10887_v55  ;;  %v955_v49 = vpop.f32.mrb[81].mxu0  ;;  %4006 = vmatprep.subr.bf16.mxu0 %v9214_v33  ;;  %4458 = vmatprep.subr.bf16.mxu1 %v9217_v17  ;;  %v9221_v33 = vld [vmem:[%s10241_s11 + $0xa58] ss:$24 sps:$4 sm:$0xff]   ;;  %v9229_v39 = vld [vmem:[%s10241_s11 + $0xa8c] ss:$24 sps:$4 sm:$0xff]  }
 0x224   : > { %12049 = vst [vmem:[#allocation32_spill] sm:$0xff] %v10978_v46  ;;  %v956_v45 = vadd.f32 %v955_v49, %v10894_v28  ;;  %v957_v61 = vpop.f32.mrb[82].mxu0  ;;  %3943 = vmatprep.mubr.bf16.mxu0 %v10978_v46  ;;  %4395 = vmatprep.mubr.bf16.mxu1 %v10978_v46 }
 0x225   : > { %v958_v48 = vadd.f32 %v957_v61, %v10887_v55  ;;  %v959_v23 = vpop.f32.mrb[83].mxu0  ;;  %3944 = vmatmul.mubr.bf16.gmra.mrb[108].mxu0 %v10976_v24  ;;  %4396 = vmatmul.mubr.bf16.gmra.mrb[44].mxu1 %v10976_v24  ;;  %v1173_v17 = vmax.f32 %v954_v7, 0.0 }
 0x226   : > { %v960_v43 = vadd.f32 %v959_v23, %v10894_v28  ;;  %4007 = vmatpush1.bf16.msra.mxu0 %v9212_v18  ;;  %4459 = vmatpush1.bf16.msra.mxu1 %v9215_v19  ;;  %v1174_v49 = vmax.f32 %v956_v45, 0.0  ;;  %v9224_v19 = vld [vmem:[%s10241_s11 + $0xa80] ss:$24 sps:$4 sm:$0xff]  }
 0x227   : > { %v1181_v58 = vmax.f32 %v958_v48, 0.0  ;;  %4008 = vmatprep.subr.bf16.mxu0 %v9220_v16  ;;  %4460 = vmatprep.subr.bf16.mxu1 %v9223_v0  ;;  %v9227_v23 = vld [vmem:[%s10241_s11 + $0xa88] ss:$24 sps:$4 sm:$0xff]   ;;  %v9232_v16 = vld [vmem:[%s10241_s11 + $0xab4] ss:$24 sps:$4 sm:$0xff]  }
 0x228   : > { %v1182_v61 = vmax.f32 %v960_v43, 0.0  ;;  %v9235_v0 = vld [vmem:[%s10241_s11 + $0xabc] ss:$24 sps:$4 sm:$0xff]  }
 0x229   : > { %v10996_v46 = vpack.c.bf16 %v1181_v58, %v1173_v17  ;;  %v9230_v58 = vld [vmem:[%s10241_s11 + $0xab0] ss:$24 sps:$4 sm:$0xff]  }
 0x22a   : > { %v10998_v24 = vpack.c.bf16 %v1182_v61, %v1174_v49  ;;  %v963_v18 = vpop.f32.mrb[84].mxu0  ;;  %4009 = vmatpush1.bf16.msra.mxu0 %v9218_v21  ;;  %4461 = vmatpush1.bf16.msra.mxu1 %v9221_v33  ;;  %v9238_v61 = vld [vmem:[%s10241_s11 + $0xae4] ss:$24 sps:$4 sm:$0xff]  }
 0x22b   : > { %12050 = vst [vmem:[#allocation33_spill] sm:$0xff] %v10996_v46  ;;  %v964_v7 = vadd.f32 %v963_v18, %v10887_v55  ;;  %v965_v48 = vpop.f32.mrb[85].mxu0  ;;  %4010 = vmatprep.subr.bf16.mxu0 %v9226_v11  ;;  %4462 = vmatprep.subr.bf16.mxu1 %v9229_v39  ;;  %v9233_v11 = vld [vmem:[%s10241_s11 + $0xab8] ss:$24 sps:$4 sm:$0xff]   ;;  %v9241_v18 = vld [vmem:[%s10241_s11 + $0xaec] ss:$24 sps:$4 sm:$0xff]  }
 0x22c   : > { %12051 = vst [vmem:[#allocation34_spill] sm:$0xff] %v10998_v24  ;;  %v966_v45 = vadd.f32 %v965_v48, %v10894_v28  ;;  %v967_v43 = vpop.f32.mrb[86].mxu0  ;;  %3953 = vmatprep.mubr.bf16.mxu0 %v10998_v24  ;;  %4405 = vmatprep.mubr.bf16.mxu1 %v10998_v24 }
 0x22d   : > { %v968_v21 = vadd.f32 %v967_v43, %v10887_v55  ;;  %v969_v33 = vpop.f32.mrb[87].mxu0  ;;  %3954 = vmatmul.mubr.bf16.gmra.mrb[112].mxu0 %v10996_v46  ;;  %4406 = vmatmul.mubr.bf16.gmra.mrb[48].mxu1 %v10996_v46  ;;  %v1189_v39 = vmax.f32 %v964_v7, 0.0 }
 0x22e   : > { %v970_v17 = vadd.f32 %v969_v33, %v10894_v28  ;;  %4011 = vmatpush1.bf16.msra.mxu0 %v9224_v19  ;;  %4463 = vmatpush1.bf16.msra.mxu1 %v9227_v23  ;;  %v1190_v48 = vmax.f32 %v966_v45, 0.0  ;;  %v9236_v23 = vld [vmem:[%s10241_s11 + $0xae0] ss:$24 sps:$4 sm:$0xff]  }
 0x22f   : > { %v1197_v49 = vmax.f32 %v968_v21, 0.0  ;;  %4012 = vmatprep.subr.bf16.mxu0 %v9232_v16  ;;  %4464 = vmatprep.subr.bf16.mxu1 %v9235_v0  ;;  %v9239_v33 = vld [vmem:[%s10241_s11 + $0xae8] ss:$24 sps:$4 sm:$0xff]   ;;  %v9244_v16 = vld [vmem:[%s10241_s11 + $0xb14] ss:$24 sps:$4 sm:$0xff]  }
 0x230   : > { %v1198_v43 = vmax.f32 %v970_v17, 0.0  ;;  %v9247_v0 = vld [vmem:[%s10241_s11 + $0xb1c] ss:$24 sps:$4 sm:$0xff]  }
 0x231   : > { %v11016_v24 = vpack.c.bf16 %v1197_v49, %v1189_v39  ;;  %v9242_v49 = vld [vmem:[%s10241_s11 + $0xb10] ss:$24 sps:$4 sm:$0xff]  }
 0x232   : > { %v11018_v46 = vpack.c.bf16 %v1198_v43, %v1190_v48  ;;  %v973_v19 = vpop.f32.mrb[88].mxu0  ;;  %4013 = vmatpush1.bf16.msra.mxu0 %v9230_v58  ;;  %4465 = vmatpush1.bf16.msra.mxu1 %v9233_v11  ;;  %v9250_v43 = vld [vmem:[%s10241_s11 + $0xb44] ss:$24 sps:$4 sm:$0xff]  }
 0x233   : > { %12052 = vst [vmem:[#allocation35_spill] sm:$0xff] %v11016_v24  ;;  %v974_v7 = vadd.f32 %v973_v19, %v10887_v55  ;;  %v975_v21 = vpop.f32.mrb[89].mxu0  ;;  %4014 = vmatprep.subr.bf16.mxu0 %v9238_v61  ;;  %4466 = vmatprep.subr.bf16.mxu1 %v9241_v18  ;;  %v9245_v61 = vld [vmem:[%s10241_s11 + $0xb18] ss:$24 sps:$4 sm:$0xff]   ;;  %v9253_v19 = vld [vmem:[%s10241_s11 + $0xb4c] ss:$24 sps:$4 sm:$0xff]  }
 0x234   : > { %12053 = vst [vmem:[#allocation36_spill] sm:$0xff] %v11018_v46  ;;  %v976_v45 = vadd.f32 %v975_v21, %v10894_v28  ;;  %v977_v17 = vpop.f32.mrb[90].mxu0  ;;  %3963 = vmatprep.mubr.bf16.mxu0 %v11018_v46  ;;  %4415 = vmatprep.mubr.bf16.mxu1 %v11018_v46 }
 0x235   : > { %v978_v58 = vadd.f32 %v977_v17, %v10887_v55  ;;  %v979_v11 = vpop.f32.mrb[91].mxu0  ;;  %3964 = vmatmul.mubr.bf16.gmra.mrb[116].mxu0 %v11016_v24  ;;  %4416 = vmatmul.mubr.bf16.gmra.mrb[52].mxu1 %v11016_v24  ;;  %v1205_v18 = vmax.f32 %v974_v7, 0.0 }
 0x236   : > { %v980_v39 = vadd.f32 %v979_v11, %v10894_v28  ;;  %4015 = vmatpush1.bf16.msra.mxu0 %v9236_v23  ;;  %4467 = vmatpush1.bf16.msra.mxu1 %v9239_v33  ;;  %v1206_v21 = vmax.f32 %v976_v45, 0.0  ;;  %v9248_v33 = vld [vmem:[%s10241_s11 + $0xb40] ss:$24 sps:$4 sm:$0xff]  }
 0x237   : > { %v1213_v48 = vmax.f32 %v978_v58, 0.0  ;;  %4016 = vmatprep.subr.bf16.mxu0 %v9244_v16  ;;  %4468 = vmatprep.subr.bf16.mxu1 %v9247_v0  ;;  %v9251_v11 = vld [vmem:[%s10241_s11 + $0xb48] ss:$24 sps:$4 sm:$0xff]   ;;  %v9256_v16 = vld [vmem:[%s10241_s11 + $0xb74] ss:$24 sps:$4 sm:$0xff]  }
 0x238   : > { %v1214_v17 = vmax.f32 %v980_v39, 0.0  ;;  %v9259_v0 = vld [vmem:[%s10241_s11 + $0xb7c] ss:$24 sps:$4 sm:$0xff]  }
 0x239   : > { %v11036_v46 = vpack.c.bf16 %v1213_v48, %v1205_v18  ;;  %v9254_v48 = vld [vmem:[%s10241_s11 + $0xb70] ss:$24 sps:$4 sm:$0xff]  }
 0x23a   : > { %v11038_v24 = vpack.c.bf16 %v1214_v17, %v1206_v21  ;;  %v983_v23 = vpop.f32.mrb[92].mxu0  ;;  %4017 = vmatpush1.bf16.msra.mxu0 %v9242_v49  ;;  %4469 = vmatpush1.bf16.msra.mxu1 %v9245_v61  ;;  %v9265_v17 = vld [vmem:[%s10241_s11 + $0xbac] ss:$24 sps:$4 sm:$0xff]  }
 0x23b   : > { %v984_v7 = vadd.f32 %v983_v23, %v10887_v55  ;;  %v985_v58 = vpop.f32.mrb[93].mxu0  ;;  %4018 = vmatprep.subr.bf16.mxu0 %v9250_v43  ;;  %4470 = vmatprep.subr.bf16.mxu1 %v9253_v19  ;;  %v9257_v43 = vld [vmem:[%s10241_s11 + $0xb78] ss:$24 sps:$4 sm:$0xff]  }
 0x23c   : > { %v986_v45 = vadd.f32 %v985_v58, %v10894_v28  ;;  %v987_v39 = vpop.f32.mrb[94].mxu0  ;;  %3973 = vmatprep.mubr.bf16.mxu0 %v11038_v24  ;;  %4425 = vmatprep.mubr.bf16.mxu1 %v11038_v24 }
 0x23d   : > { %v988_v49 = vadd.f32 %v987_v39, %v10887_v55  ;;  %v989_v61 = vpop.f32.mrb[95].mxu0  ;;  %3974 = vmatmul.mubr.bf16.gmra.mrb[120].mxu0 %v11036_v46  ;;  %4426 = vmatmul.mubr.bf16.gmra.mrb[56].mxu1 %v11036_v46  ;;  %v1221_v19 = vmax.f32 %v984_v7, 0.0  ;;  %v9262_v55 = vld [vmem:[%s10241_s11 + $0xba4] ss:$24 sps:$4 sm:$0xff]   ;;  %v9268_v7 = vld [vmem:[%s10241_s11 + $0xbd4] ss:$24 sps:$4 sm:$0xff]  }
 0x23e   : > { %v990_v18 = vadd.f32 %v989_v61, %v10894_v28  ;;  %4019 = vmatpush1.bf16.msra.mxu0 %v9248_v33  ;;  %4471 = vmatpush1.bf16.msra.mxu1 %v9251_v11  ;;  %v1222_v23 = vmax.f32 %v986_v45, 0.0  ;;  %v9260_v33 = vld [vmem:[%s10241_s11 + $0xba0] ss:$24 sps:$4 sm:$0xff]   ;;  %v9272_v61 = vld [vmem:[%s10241_s11 + $0x10] ss:$24 sps:$4 sm:$0xff]  }
 0x23f   : > { %v1229_v21 = vmax.f32 %v988_v49, 0.0  ;;  %4020 = vmatprep.subr.bf16.mxu0 %v9256_v16  ;;  %4472 = vmatprep.subr.bf16.mxu1 %v9259_v0  ;;  %v9263_v11 = vld [vmem:[%s10241_s11 + $0xba8] ss:$24 sps:$4 sm:$0xff]   ;;  %v9271_v16 = vld [vmem:[%s10241_s11 + $0xbdc] ss:$24 sps:$4 sm:$0xff]  }
 0x240   : > { %v1230_v58 = vmax.f32 %v990_v18, 0.0  ;;  %v9266_v0 = vld [vmem:[%s10241_s11 + $0xbd0] ss:$24 sps:$4 sm:$0xff]   ;;  %v9274_v49 = vld [vmem:[%s10241_s11 + $0x14] ss:$24 sps:$4 sm:$0xff]  }
 0x241   : > { %v11056_v39 = vpack.c.bf16 %v1229_v21, %v1221_v19  ;;  %v9269_v45 = vld [vmem:[%s10241_s11 + $0xbd8] ss:$24 sps:$4 sm:$0xff]   ;;  %v9277_v18 = vld [vmem:[%s10241_s11 + $0x44] ss:$24 sps:$4 sm:$0xff]  }
 0x242   : > { %v11058_v28 = vpack.c.bf16 %v1230_v58, %v1222_v23  ;;  %4021 = vmatpush1.bf16.msra.mxu0 %v9254_v48  ;;  %4473 = vmatpush1.bf16.msra.mxu1 %v9257_v43  ;;  %v9275_v48 = vld [vmem:[%s10241_s11 + $0x40] ss:$24 sps:$4 sm:$0xff]   ;;  %v9280_v43 = vld [vmem:[%s10241_s11 + $0x74] ss:$24 sps:$4 sm:$0xff]   ;;  %v9278_v19 = vld [vmem:[%s10241_s11 + $0x70] ss:$24 sps:$4 sm:$0xff]  }
 0x243   : > { %4022 = vmatprep.subr.bf16.mxu0 %v9262_v55  ;;  %4474 = vmatprep.subr.bf16.mxu1 %v9265_v17  ;;  %v9283_v21 = vld [vmem:[%s10241_s11 + $0xa4] ss:$24 sps:$4 sm:$0xff]   ;;  %v9281_v55 = vld [vmem:[%s10241_s11 + $0xa0] ss:$24 sps:$4 sm:$0xff]   ;;  %v9286_v17 = vld [vmem:[%s10241_s11 + $0xd4] ss:$24 sps:$4 sm:$0xff]  }
 0x244   : > { %3983 = vmatprep.mubr.bf16.mxu0 %v11058_v28  ;;  %4435 = vmatprep.mubr.bf16.mxu1 %v11058_v28  ;;  %v9284_v23 = vld [vmem:[%s10241_s11 + $0xd0] ss:$24 sps:$4 sm:$0xff]   ;;  %v9289_v58 = vld [vmem:[%s10241_s11 + $0x104] ss:$24 sps:$4 sm:$0xff]  }
 0x245   : > { %3984 = vmatmul.mubr.bf16.gmra.mrb[124].mxu0 %v11056_v39  ;;  %4436 = vmatmul.mubr.bf16.gmra.mrb[60].mxu1 %v11056_v39 }
 0x246   : > { %4023 = vmatpush1.bf16.msra.mxu0 %v9260_v33  ;;  %4475 = vmatpush1.bf16.msra.mxu1 %v9263_v11  ;;  %v9287_v33 = vld [vmem:[%s10241_s11 + $0x100] ss:$24 sps:$4 sm:$0xff]   ;;  %v9292_v11 = vld [vmem:[%s10241_s11 + $0x134] ss:$24 sps:$4 sm:$0xff]  }
 0x247   : > { %4024 = vmatprep.subr.bf16.mxu0 %v9268_v7  ;;  %4476 = vmatprep.subr.bf16.mxu1 %v9271_v16  ;;  %v9290_v7 = vld [vmem:[%s10241_s11 + $0x130] ss:$24 sps:$4 sm:$0xff]   ;;  %v9295_v16 = vld [vmem:[%s10241_s11 + $0x164] ss:$24 sps:$4 sm:$0xff]  }
 0x248   : > { %4026 = vmatprep.mubr.bf16.mxu0 %v10691_v59  ;;  %4478 = vmatprep.mubr.bf16.mxu1 %v10691_v59 }
 0x24a   : > { %4025 = vmatpush1.bf16.msra.mxu0 %v9266_v0  ;;  %4477 = vmatpush1.bf16.msra.mxu1 %v9269_v45  ;;  %v9293_v0 = vld [vmem:[%s10241_s11 + $0x160] ss:$24 sps:$4 sm:$0xff]   ;;  %v9298_v45 = vld [vmem:[%s10241_s11 + $0x194] ss:$24 sps:$4 sm:$0xff]  }
 0x24b   : > { %4559 = vmatprep.subr.bf16.mxu0 %v9274_v49  ;;  %v9394_v49 = vld [vmem:[%s10249_s1 + $0x4] ss:$16 sps:$4 sm:$0xff]  }
 0x24c   : > { %6343 = vmatprep.subr.bf16.mxu1 %v9394_v49  ;;  %v9313_v49 = vld [vmem:[%s10241_s11 + $0x284] ss:$24 sps:$4 sm:$0xff]  }
 0x24d   : > { %4027 = vmatmul.mubr.bf16.vlgmr.msra.gmra.mrb[96].mxu0 %v10689_v50  ;;  %4479 = vmatmul.mubr.bf16.vlgmr.msra.gmra.mrb[32].mxu1 %v10689_v50 }
 0x24e   : > { %4560 = vmatpush1.bf16.msra.mxu0 %v9272_v61  ;;  %4036 = vmatprep.mubr.bf16.mxu0 %v10717_v44  ;;  %v9296_v61 = vld [vmem:[%s10241_s11 + $0x190] ss:$24 sps:$4 sm:$0xff]  }
 0x24f   : > { %4561 = vmatprep.subr.bf16.mxu0 %v9277_v18  ;;  %4488 = vmatprep.mubr.bf16.mxu1 %v10717_v44  ;;  %v9392_v18 = vld [vmem:[%s10249_s1] ss:$16 sps:$4 sm:$0xff]  }
 0x250   : > { %6344 = vmatpush1.bf16.msra.mxu1 %v9392_v18  ;;  %v9416_v18 = vld [vmem:[%s10249_s1 + $0x80] ss:$16 sps:$4 sm:$0xff]  }
 0x252   : > { %4562 = vmatpush1.bf16.msra.mxu0 %v9275_v48  ;;  %v9301_v48 = vld [vmem:[%s10241_s11 + $0x1c4] ss:$24 sps:$4 sm:$0xff]  }
 0x253   : > { %4563 = vmatprep.subr.bf16.mxu0 %v9280_v43  ;;  %v9400_v43 = vld [vmem:[%s10249_s1 + $0x24] ss:$16 sps:$4 sm:$0xff]  }
 0x254   : > { %6345 = vmatprep.subr.bf16.mxu1 %v9400_v43  ;;  %v9424_v43 = vld [vmem:[%s10249_s1 + $0xa4] ss:$16 sps:$4 sm:$0xff]  }
 0x255   : > { %4037 = vmatmul.mubr.bf16.gmra.mrb[100].mxu0 %v10711_v32  ;;  %4489 = vmatmul.mubr.bf16.gmra.mrb[36].mxu1 %v10711_v32 }
 0x256   : > { %4564 = vmatpush1.bf16.msra.mxu0 %v9278_v19  ;;  %4046 = vmatprep.mubr.bf16.mxu0 %v10745_v42  ;;  %v9299_v19 = vld [vmem:[%s10241_s11 + $0x1c0] ss:$24 sps:$4 sm:$0xff]  }
 0x257   : > { %4565 = vmatprep.subr.bf16.mxu0 %v9283_v21  ;;  %4498 = vmatprep.mubr.bf16.mxu1 %v10745_v42  ;;  %v9398_v21 = vld [vmem:[%s10249_s1 + $0x20] ss:$16 sps:$4 sm:$0xff]  }
 0x258   : > { %6346 = vmatpush1.bf16.msra.mxu1 %v9398_v21  ;;  %v9314_v21 = vld [vmem:[%s10241_s11 + $0x2b0] ss:$24 sps:$4 sm:$0xff]  }
 0x25a   : > { %4566 = vmatpush1.bf16.msra.mxu0 %v9281_v55  ;;  %v9304_v55 = vld [vmem:[%s10241_s11 + $0x1f4] ss:$24 sps:$4 sm:$0xff]  }
 0x25b   : > { %4567 = vmatprep.subr.bf16.mxu0 %v9286_v17  ;;  %v9406_v17 = vld [vmem:[%s10249_s1 + $0x44] ss:$16 sps:$4 sm:$0xff]  }
 0x25c   : > { %6347 = vmatprep.subr.bf16.mxu1 %v9406_v17  ;;  %v9422_v17 = vld [vmem:[%s10249_s1 + $0xa0] ss:$16 sps:$4 sm:$0xff]  }
 0x25d   : > { %4047 = vmatmul.mubr.bf16.gmra.mrb[104].mxu0 %v10739_v30  ;;  %4499 = vmatmul.mubr.bf16.gmra.mrb[40].mxu1 %v10739_v30 }
 0x25e   : > { %4568 = vmatpush1.bf16.msra.mxu0 %v9284_v23  ;;  %4056 = vmatprep.mubr.bf16.mxu0 %v10773_v56  ;;  %v9302_v23 = vld [vmem:[%s10241_s11 + $0x1f0] ss:$24 sps:$4 sm:$0xff]  }
 0x25f   : > { %4569 = vmatprep.subr.bf16.mxu0 %v9289_v58  ;;  %4508 = vmatprep.mubr.bf16.mxu1 %v10773_v56  ;;  %v9307_v58 = vld [vmem:[%s10241_s11 + $0x224] ss:$24 sps:$4 sm:$0xff]  }
 0x262   : > { %4570 = vmatpush1.bf16.msra.mxu0 %v9287_v33  ;;  %v9404_v33 = vld [vmem:[%s10249_s1 + $0x40] ss:$16 sps:$4 sm:$0xff]  }
 0x263   : > { %4571 = vmatprep.subr.bf16.mxu0 %v9292_v11  ;;  %v9412_v11 = vld [vmem:[%s10249_s1 + $0x64] ss:$16 sps:$4 sm:$0xff]   ;;  %6348 = vmatpush1.bf16.msra.mxu1 %v9404_v33 }
 0x264   : > { %6349 = vmatprep.subr.bf16.mxu1 %v9412_v11  ;;  %v9322_v33 = vld [vmem:[%s10241_s11 + $0x314] ss:$24 sps:$4 sm:$0xff]   ;;  %v9428_v11 = vld [vmem:[%s10249_s1 + $0xc0] ss:$16 sps:$4 sm:$0xff]  }
 0x265   : > { %4057 = vmatmul.mubr.bf16.gmra.mrb[108].mxu0 %v10767_v37  ;;  %4509 = vmatmul.mubr.bf16.gmra.mrb[44].mxu1 %v10767_v37 }
 0x266   : > { %4572 = vmatpush1.bf16.msra.mxu0 %v9290_v7  ;;  %4066 = vmatprep.mubr.bf16.mxu0 %v10801_v29  ;;  %v9305_v7 = vld [vmem:[%s10241_s11 + $0x220] ss:$24 sps:$4 sm:$0xff]  }
 0x267   : > { %4573 = vmatprep.subr.bf16.mxu0 %v9295_v16  ;;  %4518 = vmatprep.mubr.bf16.mxu1 %v10801_v29  ;;  %v9310_v16 = vld [vmem:[%s10241_s11 + $0x254] ss:$24 sps:$4 sm:$0xff]  }
 0x26a   : > { %4574 = vmatpush1.bf16.msra.mxu0 %v9293_v0  ;;  %v9410_v0 = vld [vmem:[%s10249_s1 + $0x60] ss:$16 sps:$4 sm:$0xff]  }
 0x26b   : > { %4575 = vmatprep.subr.bf16.mxu0 %v9298_v45  ;;  %v9308_v45 = vld [vmem:[%s10241_s11 + $0x250] ss:$24 sps:$4 sm:$0xff]   ;;  %6350 = vmatpush1.bf16.msra.mxu1 %v9410_v0  ;;  %v9325_v0 = vld [vmem:[%s10241_s11 + $0x344] ss:$24 sps:$4 sm:$0xff]  }
 0x26d   : > { %4067 = vmatmul.mubr.bf16.gmra.mrb[112].mxu0 %v10795_v54  ;;  %4519 = vmatmul.mubr.bf16.gmra.mrb[48].mxu1 %v10795_v54 }
 0x26e   : > { %4576 = vmatpush1.bf16.msra.mxu0 %v9296_v61  ;;  %4076 = vmatprep.mubr.bf16.mxu0 %v10829_v34  ;;  %v9418_v61 = vld [vmem:[%s10249_s1 + $0x84] ss:$16 sps:$4 sm:$0xff]  }
 0x26f   : > { %4577 = vmatprep.subr.bf16.mxu0 %v9301_v48  ;;  %4528 = vmatprep.mubr.bf16.mxu1 %v10829_v34  ;;  %v9311_v48 = vld [vmem:[%s10241_s11 + $0x280] ss:$24 sps:$4 sm:$0xff]  }
 0x270   : > { %6351 = vmatprep.subr.bf16.mxu1 %v9418_v61  ;;  %v9328_v61 = vld [vmem:[%s10241_s11 + $0x374] ss:$24 sps:$4 sm:$0xff]  }
 0x271   : > { %6352 = vmatpush1.bf16.msra.mxu1 %v9416_v18  ;;  %v9440_v18 = vld [vmem:[%s10249_s1 + $0x100] ss:$16 sps:$4 sm:$0xff]  }
 0x272   : > { %4578 = vmatpush1.bf16.msra.mxu0 %v9299_v19  ;;  %v9316_v19 = vld [vmem:[%s10241_s11 + $0x2b4] ss:$24 sps:$4 sm:$0xff]   ;;  %6353 = vmatprep.subr.bf16.mxu1 %v9424_v43  ;;  %v9326_v43 = vld [vmem:[%s10241_s11 + $0x370] ss:$24 sps:$4 sm:$0xff]  }
 0x273   : > { %4579 = vmatprep.subr.bf16.mxu0 %v9304_v55  ;;  %v9319_v55 = vld [vmem:[%s10241_s11 + $0x2e4] ss:$24 sps:$4 sm:$0xff]  }
 0x275   : > { %4077 = vmatmul.mubr.bf16.gmra.mrb[116].mxu0 %v10823_v20  ;;  %4529 = vmatmul.mubr.bf16.gmra.mrb[52].mxu1 %v10823_v20 }
 0x276   : > { %4580 = vmatpush1.bf16.msra.mxu0 %v9302_v23  ;;  %4086 = vmatprep.mubr.bf16.mxu0 %v10858_v35  ;;  %v9430_v23 = vld [vmem:[%s10249_s1 + $0xc4] ss:$16 sps:$4 sm:$0xff]  }
 0x277   : > { %4581 = vmatprep.subr.bf16.mxu0 %v9307_v58  ;;  %4538 = vmatprep.mubr.bf16.mxu1 %v10858_v35  ;;  %v9317_v58 = vld [vmem:[%s10241_s11 + $0x2e0] ss:$24 sps:$4 sm:$0xff]  }
 0x278   : > { %6354 = vmatpush1.bf16.msra.mxu1 %v9422_v17  ;;  %v9452_v17 = vld [vmem:[%s10249_s1 + $0x140] ss:$16 sps:$4 sm:$0xff]  }
 0x279   : > { %6355 = vmatprep.subr.bf16.mxu1 %v9430_v23  ;;  %v9460_v23 = vld [vmem:[%s10249_s1 + $0x164] ss:$16 sps:$4 sm:$0xff]  }
 0x27a   : > { %4582 = vmatpush1.bf16.msra.mxu0 %v9305_v7  ;;  %v9436_v7 = vld [vmem:[%s10249_s1 + $0xe4] ss:$16 sps:$4 sm:$0xff]  }
 0x27b   : > { %4583 = vmatprep.subr.bf16.mxu0 %v9310_v16  ;;  %v9320_v16 = vld [vmem:[%s10241_s11 + $0x310] ss:$24 sps:$4 sm:$0xff]  }
 0x27c   : > { %6356 = vmatpush1.bf16.msra.mxu1 %v9428_v11  ;;  %v9335_v11 = vld [vmem:[%s10241_s11 + $0x400] ss:$24 sps:$4 sm:$0xff]  }
 0x27d   : > { %4087 = vmatmul.mubr.bf16.gmra.mrb[120].mxu0 %v10852_v12  ;;  %4539 = vmatmul.mubr.bf16.gmra.mrb[56].mxu1 %v10852_v12 }
 0x27e   : > { %4584 = vmatpush1.bf16.msra.mxu0 %v9308_v45  ;;  %4096 = vmatprep.mubr.bf16.mxu0 %v10891_v25  ;;  %v9434_v45 = vld [vmem:[%s10249_s1 + $0xe0] ss:$16 sps:$4 sm:$0xff]  }
 0x27f   : > { %4585 = vmatprep.subr.bf16.mxu0 %v9313_v49  ;;  %4548 = vmatprep.mubr.bf16.mxu1 %v10891_v25  ;;  %v9323_v49 = vld [vmem:[%s10241_s11 + $0x340] ss:$24 sps:$4 sm:$0xff]  }
 0x280   : > { %6357 = vmatprep.subr.bf16.mxu1 %v9436_v7  ;;  %v9340_v7 = vld [vmem:[%s10241_s11 + $0x434] ss:$24 sps:$4 sm:$0xff]  }
 0x281   : > { %6358 = vmatpush1.bf16.msra.mxu1 %v9434_v45  ;;  %v9338_v45 = vld [vmem:[%s10241_s11 + $0x430] ss:$24 sps:$4 sm:$0xff]  }
 0x282   : > { %4586 = vmatpush1.bf16.msra.mxu0 %v9311_v48  ;;  %v9448_v48 = vld [vmem:[%s10249_s1 + $0x124] ss:$16 sps:$4 sm:$0xff]  }
 0x283   : > { %4587 = vmatprep.subr.bf16.mxu0 %v9316_v19  ;;  %v9331_v19 = vld [vmem:[%s10241_s11 + $0x3a4] ss:$24 sps:$4 sm:$0xff]  }
 0x285   : > { %4097 = vmatmul.mubr.bf16.gmra.mrb[124].mxu0 %v10881_v10  ;;  %4549 = vmatmul.mubr.bf16.gmra.mrb[60].mxu1 %v10881_v10 }
 0x286   : > { %4588 = vmatpush1.bf16.msra.mxu0 %v9314_v21  ;;  %4591 = vmatprep.mubr.bf16.mxu0 %v10509_v4  ;;  %v9442_v4 = vld [vmem:[%s10249_s1 + $0x104] ss:$16 sps:$4 sm:$0xff]   ;;  %v9329_v21 = vld [vmem:[%s10241_s11 + $0x3a0] ss:$24 sps:$4 sm:$0xff]  }
 0x287   : > { %4589 = vmatprep.subr.bf16.mxu0 %v9319_v55  ;;  %6359 = vmatprep.subr.bf16.mxu1 %v9442_v4  ;;  %v9334_v55 = vld [vmem:[%s10241_s11 + $0x3d4] ss:$24 sps:$4 sm:$0xff]   ;;  %v9343_v4 = vld [vmem:[%s10241_s11 + $0x464] ss:$24 sps:$4 sm:$0xff]  }
 0x288   : > { %6360 = vmatpush1.bf16.msra.mxu1 %v9440_v18  ;;  %v9476_v18 = vld [vmem:[%s10249_s1 + $0x1c0] ss:$16 sps:$4 sm:$0xff]  }
 0x289   : > { %6361 = vmatprep.subr.bf16.mxu1 %v9448_v48  ;;  %v9484_v48 = vld [vmem:[%s10249_s1 + $0x1e4] ss:$16 sps:$4 sm:$0xff]  }
 0x28a   : > { %4590 = vmatpush1.bf16.msra.mxu0 %v9317_v58  ;;  %v9332_v58 = vld [vmem:[%s10241_s11 + $0x3d0] ss:$24 sps:$4 sm:$0xff]  }
 0x28b   : > { %4672 = vmatprep.subr.bf16.mxu0 %v9322_v33  ;;  %v9337_v33 = vld [vmem:[%s10241_s11 + $0x404] ss:$24 sps:$4 sm:$0xff]  }
 0x28d   : > { %4592 = vmatmul.mubr.bf16.vlgmr.msra.gmra.mrb[128].mxu0 %v10507_v3  ;;  %v9446_v3 = vld [vmem:[%s10249_s1 + $0x120] ss:$16 sps:$4 sm:$0xff]  }
 0x28e   : > { %4601 = vmatprep.mubr.bf16.mxu0 %v10529_v22  ;;  %4673 = vmatpush1.bf16.msra.mxu0 %v9320_v16  ;;  %v9454_v22 = vld [vmem:[%s10249_s1 + $0x144] ss:$16 sps:$4 sm:$0xff]   ;;  %v9464_v16 = vld [vmem:[%s10249_s1 + $0x180] ss:$16 sps:$4 sm:$0xff]  }
 0x28f   : > { %4674 = vmatprep.subr.bf16.mxu0 %v9325_v0  ;;  %6362 = vmatpush1.bf16.msra.mxu1 %v9446_v3  ;;  %v9472_v0 = vld [vmem:[%s10249_s1 + $0x1a4] ss:$16 sps:$4 sm:$0xff]   ;;  %v9347_v3 = vld [vmem:[%s10241_s11 + $0x4c0] ss:$24 sps:$4 sm:$0xff]  }
 0x290   : > { %6363 = vmatprep.subr.bf16.mxu1 %v9454_v22  ;;  %v9352_v22 = vld [vmem:[%s10241_s11 + $0x4f4] ss:$24 sps:$4 sm:$0xff]  }
 0x292   : > { %4675 = vmatpush1.bf16.msra.mxu0 %v9323_v49  ;;  %v9341_v49 = vld [vmem:[%s10241_s11 + $0x460] ss:$24 sps:$4 sm:$0xff]  }
 0x293   : > { %4676 = vmatprep.subr.bf16.mxu0 %v9328_v61  ;;  %6364 = vmatpush1.bf16.msra.mxu1 %v9452_v17  ;;  %v9346_v61 = vld [vmem:[%s10241_s11 + $0x494] ss:$24 sps:$4 sm:$0xff]   ;;  %v9356_v17 = vld [vmem:[%s10241_s11 + $0x550] ss:$24 sps:$4 sm:$0xff]  }
 0x294   : > { %6365 = vmatprep.subr.bf16.mxu1 %v9460_v23  ;;  %v9361_v23 = vld [vmem:[%s10241_s11 + $0x584] ss:$24 sps:$4 sm:$0xff]  }
 0x295   : > { %4602 = vmatmul.mubr.bf16.gmra.mrb[132].mxu0 %v10527_v26  ;;  %v9458_v26 = vld [vmem:[%s10249_s1 + $0x160] ss:$16 sps:$4 sm:$0xff]  }
 0x296   : > { %4611 = vmatprep.mubr.bf16.mxu0 %v10549_v52  ;;  %4677 = vmatpush1.bf16.msra.mxu0 %v9326_v43  ;;  %v9466_v52 = vld [vmem:[%s10249_s1 + $0x184] ss:$16 sps:$4 sm:$0xff]   ;;  %v9344_v43 = vld [vmem:[%s10241_s11 + $0x490] ss:$24 sps:$4 sm:$0xff]  }
 0x297   : > { %4678 = vmatprep.subr.bf16.mxu0 %v9331_v19  ;;  %6366 = vmatpush1.bf16.msra.mxu1 %v9458_v26  ;;  %v9349_v19 = vld [vmem:[%s10241_s11 + $0x4c4] ss:$24 sps:$4 sm:$0xff]   ;;  %v9368_v26 = vld [vmem:[%s10241_s11 + $0x610] ss:$24 sps:$4 sm:$0xff]  }
 0x298   : > { %6367 = vmatprep.subr.bf16.mxu1 %v9466_v52  ;;  %v9373_v52 = vld [vmem:[%s10241_s11 + $0x644] ss:$24 sps:$4 sm:$0xff]  }
 0x29a   : > { %4679 = vmatpush1.bf16.msra.mxu0 %v9329_v21  ;;  %v9350_v21 = vld [vmem:[%s10241_s11 + $0x4f0] ss:$24 sps:$4 sm:$0xff]  }
 0x29b   : > { %4680 = vmatprep.subr.bf16.mxu0 %v9334_v55  ;;  %6368 = vmatpush1.bf16.msra.mxu1 %v9464_v16  ;;  %v9355_v55 = vld [vmem:[%s10241_s11 + $0x524] ss:$24 sps:$4 sm:$0xff]   ;;  %v12054_v16 = vld [vmem:[#allocation21_spill] sm:$0xff] }
 0x29c   : > { %6369 = vmatprep.subr.bf16.mxu1 %v9472_v0  ;;  %v9380_v0 = vld [vmem:[%s10241_s11 + $0x6d0] ss:$24 sps:$4 sm:$0xff]  }
 0x29d   : > { %4612 = vmatmul.mubr.bf16.gmra.mrb[136].mxu0 %v10547_v47  ;;  %v9470_v47 = vld [vmem:[%s10249_s1 + $0x1a0] ss:$16 sps:$4 sm:$0xff]  }
 0x29e   : > { %4621 = vmatprep.mubr.bf16.mxu0 %v10569_v14  ;;  %4681 = vmatpush1.bf16.msra.mxu0 %v9332_v58  ;;  %v9478_v14 = vld [vmem:[%s10249_s1 + $0x1c4] ss:$16 sps:$4 sm:$0xff]   ;;  %v9362_v58 = vld [vmem:[%s10241_s11 + $0x5b0] ss:$24 sps:$4 sm:$0xff]  }
 0x29f   : > { %4682 = vmatprep.subr.bf16.mxu0 %v9337_v33  ;;  %6370 = vmatpush1.bf16.msra.mxu1 %v9470_v47  ;;  %v9367_v33 = vld [vmem:[%s10241_s11 + $0x5e4] ss:$24 sps:$4 sm:$0xff]  }
 0x2a0   : > { %6371 = vmatprep.subr.bf16.mxu1 %v9478_v14  ;;  %v12056_v47 = vld [vmem:[#allocation23_spill] sm:$0xff]  ;;  %v9388_v14 = vld [vmem:[%s10241_s11 + $0x734] ss:$24 sps:$4 sm:$0xff]  }
 0x2a2   : > { %4683 = vmatpush1.bf16.msra.mxu0 %v9335_v11  ;;  %v9374_v11 = vld [vmem:[%s10241_s11 + $0x670] ss:$24 sps:$4 sm:$0xff]  }
 0x2a3   : > { %4684 = vmatprep.subr.bf16.mxu0 %v9340_v7  ;;  %6372 = vmatpush1.bf16.msra.mxu1 %v9476_v18  ;;  %v9379_v7 = vld [vmem:[%s10241_s11 + $0x6a4] ss:$24 sps:$4 sm:$0xff]  }
 0x2a4   : > { %6373 = vmatprep.subr.bf16.mxu1 %v9484_v48  ;;  %v12057_v18 = vld [vmem:[#allocation22_spill] sm:$0xff]  ;;  %v12058_v48 = vld [vmem:[#allocation25_spill] sm:$0xff] }
 0x2a5   : > { %4622 = vmatmul.mubr.bf16.gmra.mrb[140].mxu0 %v10567_v13  ;;  %v9482_v13 = vld [vmem:[%s10249_s1 + $0x1e0] ss:$16 sps:$4 sm:$0xff]  }
 0x2a6   : > { %4631 = vmatprep.mubr.bf16.mxu0 %v10589_v38  ;;  %4685 = vmatpush1.bf16.msra.mxu0 %v9338_v45  ;;  %v9490_v38 = vld [vmem:[%s10249_s1 + $0x204] ss:$16 sps:$4 sm:$0xff]  }
 0x2a7   : > { %4686 = vmatprep.subr.bf16.mxu0 %v9343_v4  ;;  %6374 = vmatpush1.bf16.msra.mxu1 %v9482_v13  ;;  %v9385_v45 = vld [vmem:[%s10241_s11 + $0x704] ss:$24 sps:$4 sm:$0xff]   ;;  %v12055_v4 = vld [vmem:[#allocation20_spill] sm:$0xff] }
 0x2a8   : > { %6456 = vmatprep.subr.bf16.mxu1 %v9490_v38  ;;  %v9395_v13 = vld [vmem:[%s10241_s11 + $0x790] ss:$24 sps:$4 sm:$0xff]   ;;  %v9403_v38 = vld [vmem:[%s10241_s11 + $0x7c4] ss:$24 sps:$4 sm:$0xff]  }
 0x2aa   : > { %4687 = vmatpush1.bf16.msra.mxu0 %v9341_v49  ;;  %v9386_v49 = vld [vmem:[%s10241_s11 + $0x730] ss:$24 sps:$4 sm:$0xff]  }
 0x2ab   : > { %4688 = vmatprep.subr.bf16.mxu0 %v9346_v61  ;;  %v9391_v61 = vld [vmem:[%s10241_s11 + $0x764] ss:$24 sps:$4 sm:$0xff]  }
 0x2ad   : > { %4632 = vmatmul.mubr.bf16.gmra.mrb[144].mxu0 %v10587_v36  ;;  %v9353_v36 = vld [vmem:[%s10241_s11 + $0x520] ss:$24 sps:$4 sm:$0xff]  }
 0x2ae   : > { %4641 = vmatprep.mubr.bf16.mxu0 %v10609_v2  ;;  %4689 = vmatpush1.bf16.msra.mxu0 %v9344_v43  ;;  %v9358_v2 = vld [vmem:[%s10241_s11 + $0x554] ss:$24 sps:$4 sm:$0xff]   ;;  %v9389_v43 = vld [vmem:[%s10241_s11 + $0x760] ss:$24 sps:$4 sm:$0xff]  }
 0x2af   : > { %4690 = vmatprep.subr.bf16.mxu0 %v9349_v19  ;;  %v9397_v19 = vld [vmem:[%s10241_s11 + $0x794] ss:$24 sps:$4 sm:$0xff]  }
 0x2b2   : > { %4691 = vmatpush1.bf16.msra.mxu0 %v9347_v3  ;;  %v12059_v3 = vld [vmem:[#allocation24_spill] sm:$0xff] }
 0x2b3   : > { %4692 = vmatprep.subr.bf16.mxu0 %v9352_v22  ;;  %v12060_v22 = vld [vmem:[#allocation27_spill] sm:$0xff] }
 0x2b5   : > { %4642 = vmatmul.mubr.bf16.gmra.mrb[148].mxu0 %v10607_v1  ;;  %v9359_v1 = vld [vmem:[%s10241_s11 + $0x580] ss:$24 sps:$4 sm:$0xff]  }
 0x2b6   : > { %4651 = vmatprep.mubr.bf16.mxu0 %v10630_v31  ;;  %4693 = vmatpush1.bf16.msra.mxu0 %v9350_v21  ;;  %v9364_v31 = vld [vmem:[%s10241_s11 + $0x5b4] ss:$24 sps:$4 sm:$0xff]   ;;  %v9401_v21 = vld [vmem:[%s10241_s11 + $0x7c0] ss:$24 sps:$4 sm:$0xff]  }
 0x2b7   : > { %4694 = vmatprep.subr.bf16.mxu0 %v9355_v55  ;;  %v9409_v55 = vld [vmem:[%s10241_s11 + $0x7f4] ss:$24 sps:$4 sm:$0xff]  }
 0x2ba   : > { %4695 = vmatpush1.bf16.msra.mxu0 %v9353_v36  ;;  %v9407_v36 = vld [vmem:[%s10241_s11 + $0x7f0] ss:$24 sps:$4 sm:$0xff]  }
 0x2bb   : > { %4696 = vmatprep.subr.bf16.mxu0 %v9358_v2  ;;  %v9415_v2 = vld [vmem:[%s10241_s11 + $0x824] ss:$24 sps:$4 sm:$0xff]  }
 0x2bd   : > { %4652 = vmatmul.mubr.bf16.gmra.mrb[152].mxu0 %v10628_v27  ;;  %v9365_v27 = vld [vmem:[%s10241_s11 + $0x5e0] ss:$24 sps:$4 sm:$0xff]  }
 0x2be   : > { %4661 = vmatprep.mubr.bf16.mxu0 %v10667_v15  ;;  %4697 = vmatpush1.bf16.msra.mxu0 %v9356_v17  ;;  %v9370_v15 = vld [vmem:[%s10241_s11 + $0x614] ss:$24 sps:$4 sm:$0xff]   ;;  %v12061_v17 = vld [vmem:[#allocation26_spill] sm:$0xff] }
 0x2bf   : > { %4698 = vmatprep.subr.bf16.mxu0 %v9361_v23  ;;  %v9413_v23 = vld [vmem:[%s10241_s11 + $0x820] ss:$24 sps:$4 sm:$0xff]  }
 0x2c2   : > { %4699 = vmatpush1.bf16.msra.mxu0 %v9359_v1  ;;  %v9421_v1 = vld [vmem:[%s10241_s11 + $0x854] ss:$24 sps:$4 sm:$0xff]  }
 0x2c3   : > { %4700 = vmatprep.subr.bf16.mxu0 %v9364_v31  ;;  %v9419_v31 = vld [vmem:[%s10241_s11 + $0x850] ss:$24 sps:$4 sm:$0xff]  }
 0x2c5   : > { %4662 = vmatmul.mubr.bf16.gmra.mrb[156].mxu0 %v10659_v8  ;;  %v9371_v8 = vld [vmem:[%s10241_s11 + $0x640] ss:$24 sps:$4 sm:$0xff]  }
 0x2c6   : > { %4701 = vmatpush1.bf16.msra.mxu0 %v9362_v58  ;;  %4704 = vmatprep.mubr.bf16.mxu0 %v10697_v6  ;;  %v9376_v6 = vld [vmem:[%s10241_s11 + $0x674] ss:$24 sps:$4 sm:$0xff]   ;;  %v9427_v58 = vld [vmem:[%s10241_s11 + $0x884] ss:$24 sps:$4 sm:$0xff]  }
 0x2c7   : > { %4702 = vmatprep.subr.bf16.mxu0 %v9367_v33  ;;  %v9425_v33 = vld [vmem:[%s10241_s11 + $0x880] ss:$24 sps:$4 sm:$0xff]  }
 0x2ca   : > { %4703 = vmatpush1.bf16.msra.mxu0 %v9365_v27  ;;  %v9431_v27 = vld [vmem:[%s10241_s11 + $0x8b0] ss:$24 sps:$4 sm:$0xff]  }
 0x2cb   : > { %4785 = vmatprep.subr.bf16.mxu0 %v9370_v15  ;;  %v9439_v15 = vld [vmem:[%s10241_s11 + $0x8e4] ss:$24 sps:$4 sm:$0xff]  }
 0x2cd   : > { %4705 = vmatmul.mubr.bf16.vlgmr.msra.gmra.mrb[128].mxu0 %v10694_v62  ;;  %v9377_v62 = vld [vmem:[%s10241_s11 + $0x6a0] ss:$24 sps:$4 sm:$0xff]  }
 0x2ce   : > { %4714 = vmatprep.mubr.bf16.mxu0 %v10725_v51  ;;  %4786 = vmatpush1.bf16.msra.mxu0 %v9368_v26  ;;  %v9382_v51 = vld [vmem:[%s10241_s11 + $0x6d4] ss:$24 sps:$4 sm:$0xff]   ;;  %v9443_v26 = vld [vmem:[%s10241_s11 + $0x910] ss:$24 sps:$4 sm:$0xff]  }
 0x2cf   : > { %4787 = vmatprep.subr.bf16.mxu0 %v9373_v52  ;;  %v9451_v52 = vld [vmem:[%s10241_s11 + $0x944] ss:$24 sps:$4 sm:$0xff]  }
 0x2d2   : > { %4788 = vmatpush1.bf16.msra.mxu0 %v9371_v8  ;;  %v9455_v8 = vld [vmem:[%s10241_s11 + $0x970] ss:$24 sps:$4 sm:$0xff]  }
 0x2d3   : > { %4789 = vmatprep.subr.bf16.mxu0 %v9376_v6  ;;  %v9463_v6 = vld [vmem:[%s10241_s11 + $0x9a4] ss:$24 sps:$4 sm:$0xff]  }
 0x2d5   : > { %4715 = vmatmul.mubr.bf16.gmra.mrb[132].mxu0 %v10721_v57  ;;  %v9383_v57 = vld [vmem:[%s10241_s11 + $0x700] ss:$24 sps:$4 sm:$0xff]  }
 0x2d6   : > { %4724 = vmatprep.mubr.bf16.mxu0 %v12054_v16  ;;  %4790 = vmatpush1.bf16.msra.mxu0 %v9374_v11  ;;  %v12062_v11 = vld [vmem:[#allocation28_spill] sm:$0xff] }
 0x2d7   : > { %4791 = vmatprep.subr.bf16.mxu0 %v9379_v7  ;;  %v12063_v7 = vld [vmem:[#allocation19_spill] sm:$0xff] }
 0x2d8   : > { %v11275_v16 = vsub.s32 1, %v12063_v7 }
 0x2da   : > { %4792 = vmatpush1.bf16.msra.mxu0 %v9377_v62  ;;  %v11280_v62 = vsub.s32 5, %v12063_v7 }
 0x2db   : > { %4793 = vmatprep.subr.bf16.mxu0 %v9382_v51  ;;  %v9469_v51 = vld [vmem:[%s10241_s11 + $0x9d4] ss:$24 sps:$4 sm:$0xff]  }
 0x2dd   : > { %4725 = vmatmul.mubr.bf16.gmra.mrb[136].mxu0 %v12055_v4  ;;  %v9753_v4 = vld [vmem:[%s10252_s28 + $0x8] sm:$0x77] }
 0x2de   : > { %4734 = vmatprep.mubr.bf16.mxu0 %v12056_v47  ;;  %4794 = vmatpush1.bf16.msra.mxu0 %v9380_v0  ;;  %v9752_v0 = vld [vmem:[%s10252_s28] sm:$0x77]  ;;  %v1692_v47 = vrot.slane %v9753_v4, %v11275_v16 }
 0x2df   : > { %4795 = vmatprep.subr.bf16.mxu0 %v9385_v45  ;;  %v1684_v45 = vrot.slane %v9752_v0, %v11275_v16 }
 0x2e2   : > { %4796 = vmatpush1.bf16.msra.mxu0 %v9383_v57  ;;  %v9467_v57 = vld [vmem:[%s10241_s11 + $0x9d0] ss:$24 sps:$4 sm:$0xff]  }
 0x2e3   : > { %4797 = vmatprep.subr.bf16.mxu0 %v9388_v14  ;;  %v1688_v14 = vrot.slane %v9752_v0, %v11280_v62 }
 0x2e5   : > { %4735 = vmatmul.mubr.bf16.gmra.mrb[140].mxu0 %v12057_v18  ;;  %v12065_v18 = vld [vmem:[#allocation29_spill] sm:$0xff] }
 0x2e6   : > { %4744 = vmatprep.mubr.bf16.mxu0 %v12058_v48  ;;  %4798 = vmatpush1.bf16.msra.mxu0 %v9386_v49  ;;  %v1696_v49 = vrot.slane %v9753_v4, %v11280_v62  ;;  %v11293_v48 = vrot.slane %v1684_v45, %v11275_v16  ;;  %v12068_v4 = vld [vmem:[#allocation34_spill] sm:$0xff] }
 0x2e7   : > { %4799 = vmatprep.subr.bf16.mxu0 %v9391_v61  ;;  %v9475_v61 = vld [vmem:[%s10241_s11 + $0xa04] ss:$24 sps:$4 sm:$0xff]  }
 0x2ea   : > { %4800 = vmatpush1.bf16.msra.mxu0 %v9389_v43  ;;  %v11296_v43 = vrot.slane %v1692_v47, %v11275_v16  ;;  %v9485_v47 = vld [vmem:[%s10241_s11 + $0xa60] ss:$24 sps:$4 sm:$0xff]  }
 0x2eb   : > { %4801 = vmatprep.subr.bf16.mxu0 %v9397_v19  ;;  %v12066_v19 = vld [vmem:[#allocation32_spill] sm:$0xff] }
 0x2ed   : > { %4745 = vmatmul.mubr.bf16.gmra.mrb[144].mxu0 %v12059_v3  ;;  %v9473_v3 = vld [vmem:[%s10241_s11 + $0xa00] ss:$24 sps:$4 sm:$0xff]  }
 0x2ee   : > { %4754 = vmatprep.mubr.bf16.mxu0 %v12060_v22  ;;  %4802 = vmatpush1.bf16.msra.mxu0 %v9395_v13  ;;  %v11300_v13 = vrot.slane %v1688_v14, %v11275_v16  ;;  %v9481_v22 = vld [vmem:[%s10241_s11 + $0xa34] ss:$24 sps:$4 sm:$0xff]  }
 0x2ef   : > { %4803 = vmatprep.subr.bf16.mxu0 %v9403_v38  ;;  %v11303_v38 = vrot.slane %v1696_v49, %v11275_v16  ;;  %v9493_v49 = vld [vmem:[%s10241_s11 + $0xa94] ss:$24 sps:$4 sm:$0xff]  }
 0x2f2   : > { %4804 = vmatpush1.bf16.msra.mxu0 %v9401_v21 }
 0x2f3   : > { %4805 = vmatprep.subr.bf16.mxu0 %v9409_v55 }
 0x2f5   : > { %4755 = vmatmul.mubr.bf16.gmra.mrb[148].mxu0 %v12061_v17 }
 0x2f6   : > { %4764 = vmatprep.mubr.bf16.mxu0 %v10866_v5  ;;  %4806 = vmatpush1.bf16.msra.mxu0 %v9407_v36  ;;  %v9433_v5 = vld [vmem:[%s10241_s11 + $0x8b4] ss:$24 sps:$4 sm:$0xff]  }
 0x2f7   : > { %4807 = vmatprep.subr.bf16.mxu0 %v9415_v2 }
 0x2fa   : > { %4808 = vmatpush1.bf16.msra.mxu0 %v9413_v23 }
 0x2fb   : > { %4809 = vmatprep.subr.bf16.mxu0 %v9421_v1 }
 0x2fd   : > { %4765 = vmatmul.mubr.bf16.gmra.mrb[152].mxu0 %v10862_v60  ;;  %v9437_v60 = vld [vmem:[%s10241_s11 + $0x8e0] ss:$24 sps:$4 sm:$0xff]  }
 0x2fe   : > { %4774 = vmatprep.mubr.bf16.mxu0 %v10898_v41  ;;  %4810 = vmatpush1.bf16.msra.mxu0 %v9419_v31  ;;  %v9445_v41 = vld [vmem:[%s10241_s11 + $0x914] ss:$24 sps:$4 sm:$0xff]  }
 0x2ff   : > { %4811 = vmatprep.subr.bf16.mxu0 %v9427_v58 }
 0x302   : > { %4812 = vmatpush1.bf16.msra.mxu0 %v9425_v33 }
 0x303   : > { %4813 = vmatprep.subr.bf16.mxu0 %v9433_v5  ;;  %v9479_v5 = vld [vmem:[%s10241_s11 + $0xa30] ss:$24 sps:$4 sm:$0xff]  }
 0x305   : > { %4775 = vmatmul.mubr.bf16.gmra.mrb[156].mxu0 %v10896_v53  ;;  %v9449_v53 = vld [vmem:[%s10241_s11 + $0x940] ss:$24 sps:$4 sm:$0xff]  }
 0x306   : > { %4814 = vmatpush1.bf16.msra.mxu0 %v9431_v27  ;;  %4817 = vmatprep.mubr.bf16.mxu0 %v10918_v40  ;;  %v9457_v40 = vld [vmem:[%s10241_s11 + $0x974] ss:$24 sps:$4 sm:$0xff]  }
 0x307   : > { %4815 = vmatprep.subr.bf16.mxu0 %v9439_v15 }
 0x30a   : > { %4816 = vmatpush1.bf16.msra.mxu0 %v9437_v60 }
 0x30b   : > { %4898 = vmatprep.subr.bf16.mxu0 %v9445_v41 }
 0x30d   : > { %4818 = vmatmul.mubr.bf16.vlgmr.msra.gmra.mrb[128].mxu0 %v10916_v63  ;;  %v12064_v63 = vld [vmem:[#allocation30_spill] sm:$0xff] }
 0x30e   : > { %4827 = vmatprep.mubr.bf16.mxu0 %v10938_v9  ;;  %4899 = vmatpush1.bf16.msra.mxu0 %v9443_v26  ;;  %v9461_v9 = vld [vmem:[%s10241_s11 + $0x9a0] ss:$24 sps:$4 sm:$0xff]   ;;  %v9487_v26 = vld [vmem:[%s10241_s11 + $0xa64] ss:$24 sps:$4 sm:$0xff]  }
 0x30f   : > { %4900 = vmatprep.subr.bf16.mxu0 %v9451_v52 }
 0x312   : > { %4901 = vmatpush1.bf16.msra.mxu0 %v9449_v53 }
 0x313   : > { %4902 = vmatprep.subr.bf16.mxu0 %v9457_v40 }
 0x315   : > { %4828 = vmatmul.mubr.bf16.gmra.mrb[132].mxu0 %v12062_v11 }
 0x316   : > { %4837 = vmatprep.mubr.bf16.mxu0 %v12064_v63  ;;  %4903 = vmatpush1.bf16.msra.mxu0 %v9455_v8  ;;  %v12067_v63 = vld [vmem:[#allocation31_spill] sm:$0xff] }
 0x317   : > { %4904 = vmatprep.subr.bf16.mxu0 %v9463_v6 }
 0x31a   : > { %4905 = vmatpush1.bf16.msra.mxu0 %v9461_v9 }
 0x31b   : > { %4906 = vmatprep.subr.bf16.mxu0 %v9469_v51 }
 0x31d   : > { %4838 = vmatmul.mubr.bf16.gmra.mrb[136].mxu0 %v12065_v18 }
 0x31e   : > { %4847 = vmatprep.mubr.bf16.mxu0 %v12066_v19  ;;  %4907 = vmatpush1.bf16.msra.mxu0 %v9467_v57 }
 0x31f   : > { %4908 = vmatprep.subr.bf16.mxu0 %v9475_v61 }
 0x320   : > { %v4028_v21 = vpop.f32.mrb[96].mxu0  ;;  %v4480_v55 = vpop.f32.mrb[32].mxu1 }
 0x321   : > { %v8212_v36 = vadd.f32 %v4028_v21, %v11293_v48  ;;  %v8244_v2 = vadd.f32 %v4480_v55, %v11296_v43  ;;  %v4030_v17 = vpop.f32.mrb[97].mxu0  ;;  %v4482_v23 = vpop.f32.mrb[33].mxu1 }
 0x322   : > { %v8213_v1 = vadd.f32 %v4030_v17, %v11300_v13  ;;  %v8245_v31 = vadd.f32 %v4482_v23, %v11303_v38  ;;  %v4032_v58 = vpop.f32.mrb[98].mxu0  ;;  %v4484_v33 = vpop.f32.mrb[34].mxu1  ;;  %4909 = vmatpush1.bf16.msra.mxu0 %v9473_v3  ;;  %v9496_v17 = vld [vmem:[%s10249_s1 + $0x224] ss:$16 sps:$4 sm:$0xff]  }
 0x323   : > { %v8214_v27 = vadd.f32 %v4032_v58, %v11293_v48  ;;  %v8246_v15 = vadd.f32 %v4484_v33, %v11296_v43  ;;  %v4034_v60 = vpop.f32.mrb[99].mxu0  ;;  %v4486_v41 = vpop.f32.mrb[35].mxu1  ;;  %4910 = vmatprep.subr.bf16.mxu0 %v9481_v22  ;;  %v5011_v40 = vmax.f32 %v8212_v36, 0.0  ;;  %v5013_v8 = vmax.f32 %v8244_v2, 0.0  ;;  %v9488_v22 = vld [vmem:[%s10249_s1 + $0x200] ss:$16 sps:$4 sm:$0xff]  }
 0x324   : > { %v8215_v52 = vadd.f32 %v4034_v60, %v11300_v13  ;;  %v8247_v53 = vadd.f32 %v4486_v41, %v11303_v38  ;;  %v5012_v9 = vmax.f32 %v8213_v1, 0.0  ;;  %v5014_v51 = vmax.f32 %v8245_v31, 0.0  ;;  %v9491_v33 = vld [vmem:[%s10241_s11 + $0xa90] ss:$24 sps:$4 sm:$0xff]   ;;  %v9499_v41 = vld [vmem:[%s10241_s11 + $0xac4] ss:$24 sps:$4 sm:$0xff]  }
 0x325   : > { %v5017_v6 = vmax.f32 %v8214_v27, 0.0  ;;  %v5019_v11 = vmax.f32 %v8246_v15, 0.0  ;;  %4848 = vmatmul.mubr.bf16.gmra.mrb[140].mxu0 %v12067_v63  ;;  %v12069_v63 = vld [vmem:[#allocation33_spill] sm:$0xff] }
 0x326   : > { %v5018_v0 = vmax.f32 %v8215_v52, 0.0  ;;  %v5020_v45 = vmax.f32 %v8247_v53, 0.0  ;;  %4857 = vmatprep.mubr.bf16.mxu0 %v12068_v4  ;;  %4911 = vmatpush1.bf16.msra.mxu0 %v9479_v5  ;;  %v9494_v53 = vld [vmem:[%s10249_s1 + $0x220] ss:$16 sps:$4 sm:$0xff]  }
 0x327   : > { %v11320_v57 = vpack.c.bf16 %v5017_v6, %v5011_v40  ;;  %v11322_v14 = vpack.c.bf16 %v5019_v11, %v5013_v8  ;;  %4912 = vmatprep.subr.bf16.mxu0 %v9487_v26 }
 0x328   : > { %v11325_v61 = vpack.c.bf16 %v5018_v0, %v5012_v9  ;;  %v11327_v18 = vpack.c.bf16 %v5020_v45, %v5014_v51  ;;  %v4038_v19 = vpop.f32.mrb[100].mxu0  ;;  %v4490_v3 = vpop.f32.mrb[36].mxu1  ;;  %v9502_v9 = vld [vmem:[%s10249_s1 + $0x244] ss:$16 sps:$4 sm:$0xff]  }
 0x329   : > { %v8216_v21 = vadd.f32 %v4038_v19, %v11293_v48  ;;  %v8248_v55 = vadd.f32 %v4490_v3, %v11296_v43  ;;  %v4040_v36 = vpop.f32.mrb[101].mxu0  ;;  %v4492_v2 = vpop.f32.mrb[37].mxu1 }
 0x32a   : > { %v8217_v23 = vadd.f32 %v4040_v36, %v11300_v13  ;;  %v8249_v1 = vadd.f32 %v4492_v2, %v11303_v38  ;;  %v4042_v31 = vpop.f32.mrb[102].mxu0  ;;  %v4494_v58 = vpop.f32.mrb[38].mxu1  ;;  %4913 = vmatpush1.bf16.msra.mxu0 %v9485_v47  ;;  %6375 = vmatprep.mubr.bf16.mxu1 %v11325_v61  ;;  %v12070_v47 = vld [vmem:[#allocation36_spill] sm:$0xff] }
 0x32b   : > { %v8218_v5 = vadd.f32 %v4042_v31, %v11293_v48  ;;  %v8250_v27 = vadd.f32 %v4494_v58, %v11296_v43  ;;  %v4044_v15 = vpop.f32.mrb[103].mxu0  ;;  %v4496_v60 = vpop.f32.mrb[39].mxu1  ;;  %6376 = vmatmul.mubr.bf16.vlgmr.msra.gmra.mrb[64].mxu1 %v11320_v57  ;;  %4914 = vmatprep.subr.bf16.mxu0 %v9493_v49  ;;  %v5023_v40 = vmax.f32 %v8216_v21, 0.0  ;;  %v5025_v8 = vmax.f32 %v8248_v55, 0.0  ;;  %v9497_v49 = vld [vmem:[%s10241_s11 + $0xac0] ss:$24 sps:$4 sm:$0xff]  }
 0x32c   : > { %v8219_v26 = vadd.f32 %v4044_v15, %v11300_v13  ;;  %v8251_v52 = vadd.f32 %v4496_v60, %v11303_v38  ;;  %6457 = vmatpush1.bf16.msra.mxu1 %v9488_v22  ;;  %v5024_v51 = vmax.f32 %v8217_v23, 0.0  ;;  %v5026_v0 = vmax.f32 %v8249_v1, 0.0  ;;  %v9505_v22 = vld [vmem:[%s10241_s11 + $0xaf4] ss:$24 sps:$4 sm:$0xff]  }
 0x32d   : > { %v5029_v6 = vmax.f32 %v8218_v5, 0.0  ;;  %v5031_v11 = vmax.f32 %v8250_v27, 0.0  ;;  %4858 = vmatmul.mubr.bf16.gmra.mrb[144].mxu0 %v12069_v63  ;;  %6458 = vmatprep.subr.bf16.mxu1 %v9496_v17  ;;  %v9500_v17 = vld [vmem:[%s10249_s1 + $0x240] ss:$16 sps:$4 sm:$0xff]  }
 0x32e   : > { %v5030_v45 = vmax.f32 %v8219_v26, 0.0  ;;  %v5032_v4 = vmax.f32 %v8251_v52, 0.0  ;;  %4867 = vmatprep.mubr.bf16.mxu0 %v12070_v47  ;;  %4915 = vmatpush1.bf16.msra.mxu0 %v9491_v33  ;;  %v9508_v33 = vld [vmem:[%s10249_s1 + $0x264] ss:$16 sps:$4 sm:$0xff]   ;;  %v9506_v63 = vld [vmem:[%s10249_s1 + $0x260] ss:$16 sps:$4 sm:$0xff]  }
 0x32f   : > { %v11348_v19 = vpack.c.bf16 %v5029_v6, %v5023_v40  ;;  %v11350_v3 = vpack.c.bf16 %v5031_v11, %v5025_v8  ;;  %4916 = vmatprep.subr.bf16.mxu0 %v9499_v41  ;;  %v9503_v41 = vld [vmem:[%s10241_s11 + $0xaf0] ss:$24 sps:$4 sm:$0xff]   ;;  %v9511_v8 = vld [vmem:[%s10241_s11 + $0xb24] ss:$24 sps:$4 sm:$0xff]  }
 0x330   : > { %v11353_v21 = vpack.c.bf16 %v5030_v45, %v5024_v51  ;;  %v11355_v55 = vpack.c.bf16 %v5032_v4, %v5026_v0  ;;  %v4048_v36 = vpop.f32.mrb[104].mxu0  ;;  %v4500_v2 = vpop.f32.mrb[40].mxu1  ;;  %6459 = vmatpush1.bf16.msra.mxu1 %v9494_v53  ;;  %v12071_v4 = vld [vmem:[#allocation35_spill] sm:$0xff] }
 0x331   : > { %v8220_v23 = vadd.f32 %v4048_v36, %v11293_v48  ;;  %v8252_v1 = vadd.f32 %v4500_v2, %v11296_v43  ;;  %v4050_v31 = vpop.f32.mrb[105].mxu0  ;;  %v4502_v58 = vpop.f32.mrb[41].mxu1  ;;  %6460 = vmatprep.subr.bf16.mxu1 %v9502_v9  ;;  %v9514_v47 = vld [vmem:[%s10249_s1 + $0x284] ss:$16 sps:$4 sm:$0xff]  }
 0x332   : > { %v8221_v5 = vadd.f32 %v4050_v31, %v11300_v13  ;;  %v8253_v27 = vadd.f32 %v4502_v58, %v11303_v38  ;;  %v4052_v15 = vpop.f32.mrb[106].mxu0  ;;  %v4504_v60 = vpop.f32.mrb[42].mxu1  ;;  %4917 = vmatpush1.bf16.msra.mxu0 %v9497_v49  ;;  %6385 = vmatprep.mubr.bf16.mxu1 %v11353_v21  ;;  %v9509_v31 = vld [vmem:[%s10241_s11 + $0xb20] ss:$24 sps:$4 sm:$0xff]  }
 0x333   : > { %v8222_v26 = vadd.f32 %v4052_v15, %v11293_v48  ;;  %v8254_v52 = vadd.f32 %v4504_v60, %v11296_v43  ;;  %v4054_v53 = vpop.f32.mrb[107].mxu0  ;;  %v4506_v40 = vpop.f32.mrb[43].mxu1  ;;  %6386 = vmatmul.mubr.bf16.gmra.mrb[68].mxu1 %v11348_v19  ;;  %4918 = vmatprep.subr.bf16.mxu0 %v9505_v22  ;;  %v5035_v9 = vmax.f32 %v8220_v23, 0.0  ;;  %v5037_v51 = vmax.f32 %v8252_v1, 0.0  ;;  %v9517_v1 = vld [vmem:[%s10241_s11 + $0xb54] ss:$24 sps:$4 sm:$0xff]  }
 0x334   : > { %v8223_v6 = vadd.f32 %v4054_v53, %v11300_v13  ;;  %v8255_v11 = vadd.f32 %v4506_v40, %v11303_v38  ;;  %6461 = vmatpush1.bf16.msra.mxu1 %v9500_v17  ;;  %v5036_v49 = vmax.f32 %v8221_v5, 0.0  ;;  %v5038_v22 = vmax.f32 %v8253_v27, 0.0  ;;  %v9512_v15 = vld [vmem:[%s10249_s1 + $0x280] ss:$16 sps:$4 sm:$0xff]  }
 0x335   : > { %v5041_v0 = vmax.f32 %v8222_v26, 0.0  ;;  %v5043_v45 = vmax.f32 %v8254_v52, 0.0  ;;  %4868 = vmatmul.mubr.bf16.gmra.mrb[148].mxu0 %v12071_v4  ;;  %6462 = vmatprep.subr.bf16.mxu1 %v9508_v33  ;;  %v9520_v52 = vld [vmem:[%s10249_s1 + $0x2a4] ss:$16 sps:$4 sm:$0xff]  }
 0x336   : > { %v5042_v36 = vmax.f32 %v8223_v6, 0.0  ;;  %v5044_v2 = vmax.f32 %v8255_v11, 0.0  ;;  %4877 = vmatprep.mubr.bf16.mxu0 %v11038_v24  ;;  %4919 = vmatpush1.bf16.msra.mxu0 %v9503_v41  ;;  %v9515_v11 = vld [vmem:[%s10241_s11 + $0xb50] ss:$24 sps:$4 sm:$0xff]  }
 0x337   : > { %v11376_v17 = vpack.c.bf16 %v5041_v0, %v5035_v9  ;;  %v11378_v23 = vpack.c.bf16 %v5043_v45, %v5037_v51  ;;  %4920 = vmatprep.subr.bf16.mxu0 %v9511_v8  ;;  %v9523_v45 = vld [vmem:[%s10241_s11 + $0xb84] ss:$24 sps:$4 sm:$0xff]  }
 0x338   : > { %v11381_v58 = vpack.c.bf16 %v5042_v36, %v5036_v49  ;;  %v11383_v33 = vpack.c.bf16 %v5044_v2, %v5038_v22  ;;  %v4058_v5 = vpop.f32.mrb[108].mxu0  ;;  %v4510_v27 = vpop.f32.mrb[44].mxu1  ;;  %6463 = vmatpush1.bf16.msra.mxu1 %v9506_v63  ;;  %v9518_v49 = vld [vmem:[%s10249_s1 + $0x2a0] ss:$16 sps:$4 sm:$0xff]  }
 0x339   : > { %v8224_v24 = vadd.f32 %v4058_v5, %v11293_v48  ;;  %v8256_v60 = vadd.f32 %v4510_v27, %v11296_v43  ;;  %v4060_v41 = vpop.f32.mrb[109].mxu0  ;;  %v4512_v26 = vpop.f32.mrb[45].mxu1  ;;  %6464 = vmatprep.subr.bf16.mxu1 %v9514_v47  ;;  %v9526_v5 = vld [vmem:[%s10249_s1 + $0x2c4] ss:$16 sps:$4 sm:$0xff]  }
 0x33a   : > { %v8225_v53 = vadd.f32 %v4060_v41, %v11300_v13  ;;  %v8257_v40 = vadd.f32 %v4512_v26, %v11303_v38  ;;  %v4062_v8 = vpop.f32.mrb[110].mxu0  ;;  %v4514_v6 = vpop.f32.mrb[46].mxu1  ;;  %4921 = vmatpush1.bf16.msra.mxu0 %v9509_v31  ;;  %6395 = vmatprep.mubr.bf16.mxu1 %v11381_v58 }
 0x33b   : > { %v8226_v63 = vadd.f32 %v4062_v8, %v11293_v48  ;;  %v8258_v9 = vadd.f32 %v4514_v6, %v11296_v43  ;;  %v4064_v51 = vpop.f32.mrb[111].mxu0  ;;  %v4516_v0 = vpop.f32.mrb[47].mxu1  ;;  %6396 = vmatmul.mubr.bf16.gmra.mrb[72].mxu1 %v11376_v17  ;;  %4922 = vmatprep.subr.bf16.mxu0 %v9517_v1  ;;  %v5047_v22 = vmax.f32 %v8224_v24, 0.0  ;;  %v5049_v36 = vmax.f32 %v8256_v60, 0.0  ;;  %v9521_v8 = vld [vmem:[%s10241_s11 + $0xb80] ss:$24 sps:$4 sm:$0xff]  }
 0x33c   : > { %v8227_v4 = vadd.f32 %v4064_v51, %v11300_v13  ;;  %v8259_v47 = vadd.f32 %v4516_v0, %v11303_v38  ;;  %6465 = vmatpush1.bf16.msra.mxu1 %v9512_v15  ;;  %v5048_v27 = vmax.f32 %v8225_v53, 0.0  ;;  %v5050_v1 = vmax.f32 %v8257_v40, 0.0  ;;  %v9529_v60 = vld [vmem:[%s10241_s11 + $0xbb4] ss:$24 sps:$4 sm:$0xff]   ;;  %v9524_v40 = vld [vmem:[%s10249_s1 + $0x2c0] ss:$16 sps:$4 sm:$0xff]  }
 0x33d   : > { %v5053_v2 = vmax.f32 %v8226_v63, 0.0  ;;  %v5055_v31 = vmax.f32 %v8258_v9, 0.0  ;;  %4878 = vmatmul.mubr.bf16.gmra.mrb[152].mxu0 %v11036_v46  ;;  %6466 = vmatprep.subr.bf16.mxu1 %v9520_v52  ;;  %v9532_v51 = vld [vmem:[%s10249_s1 + $0x2e4] ss:$16 sps:$4 sm:$0xff]  }
 0x33e   : > { %v5054_v41 = vmax.f32 %v8227_v4, 0.0  ;;  %v5056_v26 = vmax.f32 %v8259_v47, 0.0  ;;  %4887 = vmatprep.mubr.bf16.mxu0 %v11058_v28  ;;  %4923 = vmatpush1.bf16.msra.mxu0 %v9515_v11 }
 0x33f   : > { %v11404_v15 = vpack.c.bf16 %v5053_v2, %v5047_v22  ;;  %v11406_v24 = vpack.c.bf16 %v5055_v31, %v5049_v36  ;;  %4924 = vmatprep.subr.bf16.mxu0 %v9523_v45 }
 0x340   : > { %v11409_v6 = vpack.c.bf16 %v5054_v41, %v5048_v27  ;;  %v11411_v46 = vpack.c.bf16 %v5056_v26, %v5050_v1  ;;  %v4068_v52 = vpop.f32.mrb[112].mxu0  ;;  %v4520_v53 = vpop.f32.mrb[48].mxu1  ;;  %6467 = vmatpush1.bf16.msra.mxu1 %v9518_v49  ;;  %v9527_v49 = vld [vmem:[%s10241_s11 + $0xbb0] ss:$24 sps:$4 sm:$0xff]  }
 0x341   : > { %v8228_v28 = vadd.f32 %v4068_v52, %v11293_v48  ;;  %v8260_v11 = vadd.f32 %v4520_v53, %v11296_v43  ;;  %v4070_v63 = vpop.f32.mrb[113].mxu0  ;;  %v4522_v9 = vpop.f32.mrb[49].mxu1  ;;  %6468 = vmatprep.subr.bf16.mxu1 %v9526_v5  ;;  %v9535_v5 = vld [vmem:[%s10241_s11 + $0xbe4] ss:$24 sps:$4 sm:$0xff]   ;;  %v9530_v41 = vld [vmem:[%s10249_s1 + $0x2e0] ss:$16 sps:$4 sm:$0xff]  }
 0x342   : > { %v8229_v0 = vadd.f32 %v4070_v63, %v11300_v13  ;;  %v8261_v45 = vadd.f32 %v4522_v9, %v11303_v38  ;;  %v4072_v4 = vpop.f32.mrb[114].mxu0  ;;  %v4524_v47 = vpop.f32.mrb[50].mxu1  ;;  %4925 = vmatpush1.bf16.msra.mxu0 %v9521_v8  ;;  %6405 = vmatprep.mubr.bf16.mxu1 %v11409_v6  ;;  %v9538_v63 = vld [vmem:[%s10249_s1 + $0x304] ss:$16 sps:$4 sm:$0xff]  }
 0x343   : > { %v8230_v22 = vadd.f32 %v4072_v4, %v11293_v48  ;;  %v8262_v36 = vadd.f32 %v4524_v47, %v11296_v43  ;;  %v4074_v2 = vpop.f32.mrb[115].mxu0  ;;  %v4526_v31 = vpop.f32.mrb[51].mxu1  ;;  %6406 = vmatmul.mubr.bf16.gmra.mrb[76].mxu1 %v11404_v15  ;;  %4926 = vmatprep.subr.bf16.mxu0 %v9529_v60  ;;  %v5059_v26 = vmax.f32 %v8228_v28, 0.0  ;;  %v5061_v8 = vmax.f32 %v8260_v11, 0.0 }
 0x344   : > { %v8231_v27 = vadd.f32 %v4074_v2, %v11300_v13  ;;  %v8263_v1 = vadd.f32 %v4526_v31, %v11303_v38  ;;  %6469 = vmatpush1.bf16.msra.mxu1 %v9524_v40  ;;  %v5060_v9 = vmax.f32 %v8229_v0, 0.0  ;;  %v5062_v4 = vmax.f32 %v8261_v45, 0.0  ;;  %v9533_v2 = vld [vmem:[%s10241_s11 + $0xbe0] ss:$24 sps:$4 sm:$0xff]   ;;  %v9541_v31 = vld [vmem:[%s10249_s1 + $0x324] ss:$16 sps:$4 sm:$0xff]  }
 0x345   : > { %v5065_v52 = vmax.f32 %v8230_v22, 0.0  ;;  %v5067_v53 = vmax.f32 %v8262_v36, 0.0  ;;  %4888 = vmatmul.mubr.bf16.gmra.mrb[156].mxu0 %v11056_v39  ;;  %6470 = vmatprep.subr.bf16.mxu1 %v9532_v51  ;;  %v9536_v0 = vld [vmem:[%s10249_s1 + $0x300] ss:$16 sps:$4 sm:$0xff]   ;;  %s11819_s11 = scalar_lea.vmem [#allocation10], %s7507_s13 }
 0x346   : > { %v5066_v60 = vmax.f32 %v8231_v27, 0.0  ;;  %v5068_v47 = vmax.f32 %v8263_v1, 0.0  ;;  %4927 = vmatpush1.bf16.msra.mxu0 %v9527_v49  ;;  %4930 = vmatprep.mubr.bf16.mxu0 %v10691_v59 }
 0x347   : > { %v11432_v40 = vpack.c.bf16 %v5065_v52, %v5059_v26  ;;  %v11434_v28 = vpack.c.bf16 %v5067_v53, %v5061_v8  ;;  %4928 = vmatprep.subr.bf16.mxu0 %v9535_v5 }
 0x348   : > { %v11436_v11 = vpack.c.bf16 %v5066_v60, %v5060_v9  ;;  %v11438_v39 = vpack.c.bf16 %v5068_v47, %v5062_v4  ;;  %v4078_v51 = vpop.f32.mrb[116].mxu0  ;;  %v4530_v22 = vpop.f32.mrb[52].mxu1  ;;  %6471 = vmatpush1.bf16.msra.mxu1 %v9530_v41  ;;  %v9539_v4 = vld [vmem:[%s10249_s1 + $0x320] ss:$16 sps:$4 sm:$0xff]  }
 0x349   : > { %v8232_v45 = vadd.f32 %v4078_v51, %v11293_v48  ;;  %v8264_v49 = vadd.f32 %v4530_v22, %v11296_v43  ;;  %v4080_v59 = vpop.f32.mrb[117].mxu0  ;;  %v4532_v36 = vpop.f32.mrb[53].mxu1  ;;  %6472 = vmatprep.subr.bf16.mxu1 %v9538_v63  ;;  %v9544_v22 = vld [vmem:[%s10249_s1 + $0x344] ss:$16 sps:$4 sm:$0xff]  }
 0x34a   : > { %v8233_v27 = vadd.f32 %v4080_v59, %v11300_v13  ;;  %v8265_v5 = vadd.f32 %v4532_v36, %v11303_v38  ;;  %v4082_v1 = vpop.f32.mrb[118].mxu0  ;;  %v4534_v26 = vpop.f32.mrb[54].mxu1  ;;  %4929 = vmatpush1.bf16.msra.mxu0 %v9533_v2  ;;  %6415 = vmatprep.mubr.bf16.mxu1 %v11436_v11 }
 0x34b   : > { %v8234_v41 = vadd.f32 %v4082_v1, %v11293_v48  ;;  %v8266_v8 = vadd.f32 %v4534_v26, %v11296_v43  ;;  %v4084_v52 = vpop.f32.mrb[119].mxu0  ;;  %v4536_v53 = vpop.f32.mrb[55].mxu1  ;;  %6416 = vmatmul.mubr.bf16.gmra.mrb[80].mxu1 %v11432_v40  ;;  %v5071_v60 = vmax.f32 %v8232_v45, 0.0  ;;  %v5073_v47 = vmax.f32 %v8264_v49, 0.0 }
 0x34c   : > { %v8235_v63 = vadd.f32 %v4084_v52, %v11300_v13  ;;  %v8267_v9 = vadd.f32 %v4536_v53, %v11303_v38  ;;  %6473 = vmatpush1.bf16.msra.mxu1 %v9536_v0  ;;  %v5072_v59 = vmax.f32 %v8233_v27, 0.0  ;;  %v5074_v36 = vmax.f32 %v8265_v5, 0.0 }
 0x34d   : > { %v5077_v2 = vmax.f32 %v8234_v41, 0.0  ;;  %v5079_v51 = vmax.f32 %v8266_v8, 0.0  ;;  %4931 = vmatmul.mubr.bf16.vlgmr.msra.gmra.mrb[128].mxu0 %v10689_v50  ;;  %6474 = vmatprep.subr.bf16.mxu1 %v9541_v31  ;;  %v9542_v50 = vld [vmem:[%s10249_s1 + $0x340] ss:$16 sps:$4 sm:$0xff]  }
 0x34e   : > { %v5078_v1 = vmax.f32 %v8235_v63, 0.0  ;;  %v5080_v26 = vmax.f32 %v8267_v9, 0.0  ;;  %4940 = vmatprep.mubr.bf16.mxu0 %v10717_v44  ;;  %v9547_v44 = vld [vmem:[%s10249_s1 + $0x364] ss:$16 sps:$4 sm:$0xff]  }
 0x34f   : > { %v11456_v52 = vpack.c.bf16 %v5077_v2, %v5071_v60  ;;  %v11458_v0 = vpack.c.bf16 %v5079_v51, %v5073_v47 }
 0x350   : > { %v11460_v45 = vpack.c.bf16 %v5078_v1, %v5072_v59  ;;  %v11462_v49 = vpack.c.bf16 %v5080_v26, %v5074_v36  ;;  %v4088_v41 = vpop.f32.mrb[120].mxu0  ;;  %v4540_v8 = vpop.f32.mrb[56].mxu1  ;;  %6475 = vmatpush1.bf16.msra.mxu1 %v9539_v4  ;;  %v9545_v1 = vld [vmem:[%s10249_s1 + $0x360] ss:$16 sps:$4 sm:$0xff]  }
 0x351   : > { %12072 = vst [vmem:[#allocation21_spill] sm:$0xff] %v11456_v52  ;;  %v8236_v31 = vadd.f32 %v4088_v41, %v11293_v48  ;;  %v8268_v27 = vadd.f32 %v4540_v8, %v11296_v43  ;;  %v4090_v5 = vpop.f32.mrb[121].mxu0  ;;  %v4542_v53 = vpop.f32.mrb[57].mxu1  ;;  %6476 = vmatprep.subr.bf16.mxu1 %v9544_v22 }
 0x352   : > { %v8237_v63 = vadd.f32 %v4090_v5, %v11300_v13  ;;  %v8269_v9 = vadd.f32 %v4542_v53, %v11303_v38  ;;  %v4092_v60 = vpop.f32.mrb[122].mxu0  ;;  %v4544_v47 = vpop.f32.mrb[58].mxu1  ;;  %6425 = vmatprep.mubr.bf16.mxu1 %v11460_v45  ;;  %v9550_v53 = vld [vmem:[%s10249_s1 + $0x384] ss:$16 sps:$4 sm:$0xff]  }
 0x353   : > { %v8238_v4 = vadd.f32 %v4092_v60, %v11293_v48  ;;  %v8270_v2 = vadd.f32 %v4544_v47, %v11296_v43  ;;  %v4094_v51 = vpop.f32.mrb[123].mxu0  ;;  %v4546_v59 = vpop.f32.mrb[59].mxu1  ;;  %6426 = vmatmul.mubr.bf16.gmra.mrb[84].mxu1 %v11456_v52  ;;  %v5083_v26 = vmax.f32 %v8236_v31, 0.0  ;;  %v5085_v41 = vmax.f32 %v8268_v27, 0.0 }
 0x354   : > { %v8239_v22 = vadd.f32 %v4094_v51, %v11300_v13  ;;  %v8271_v36 = vadd.f32 %v4546_v59, %v11303_v38  ;;  %6477 = vmatpush1.bf16.msra.mxu1 %v9542_v50  ;;  %v5084_v60 = vmax.f32 %v8237_v63, 0.0  ;;  %v5086_v47 = vmax.f32 %v8269_v9, 0.0 }
 0x355   : > { %v5089_v8 = vmax.f32 %v8238_v4, 0.0  ;;  %v5091_v5 = vmax.f32 %v8270_v2, 0.0  ;;  %4941 = vmatmul.mubr.bf16.gmra.mrb[132].mxu0 %v10711_v32  ;;  %6478 = vmatprep.subr.bf16.mxu1 %v9547_v44  ;;  %v9548_v32 = vld [vmem:[%s10249_s1 + $0x380] ss:$16 sps:$4 sm:$0xff]  }
 0x356   : > { %v5090_v7 = vmax.f32 %v8239_v22, 0.0  ;;  %v5092_v52 = vmax.f32 %v8271_v36, 0.0  ;;  %4950 = vmatprep.mubr.bf16.mxu0 %v10745_v42  ;;  %v9553_v42 = vld [vmem:[%s10249_s1 + $0x3a4] ss:$16 sps:$4 sm:$0xff]  }
 0x357   : > { %v11480_v51 = vpack.c.bf16 %v5089_v8, %v5083_v26  ;;  %v11482_v50 = vpack.c.bf16 %v5091_v5, %v5085_v41 }
 0x358   : > { %v11484_v31 = vpack.c.bf16 %v5090_v7, %v5084_v60  ;;  %v11486_v27 = vpack.c.bf16 %v5092_v52, %v5086_v47  ;;  %v4098_v4 = vpop.f32.mrb[124].mxu0  ;;  %v4550_v2 = vpop.f32.mrb[60].mxu1  ;;  %6479 = vmatpush1.bf16.msra.mxu1 %v9545_v1  ;;  %v9551_v60 = vld [vmem:[%s10249_s1 + $0x3a0] ss:$16 sps:$4 sm:$0xff]  }
 0x359   : > { %v8240_v44 = vadd.f32 %v4098_v4, %v11293_v48  ;;  %v8272_v63 = vadd.f32 %v4550_v2, %v11296_v43  ;;  %v4100_v9 = vpop.f32.mrb[125].mxu0  ;;  %v4552_v59 = vpop.f32.mrb[61].mxu1  ;;  %6480 = vmatprep.subr.bf16.mxu1 %v9550_v53 }
 0x35a   : > { %v8241_v22 = vadd.f32 %v4100_v9, %v11300_v13  ;;  %v8273_v7 = vadd.f32 %v4552_v59, %v11303_v38  ;;  %v4102_v36 = vpop.f32.mrb[126].mxu0  ;;  %v4554_v52 = vpop.f32.mrb[62].mxu1  ;;  %6435 = vmatprep.mubr.bf16.mxu1 %v11484_v31 }
 0x35b   : > { %v8242_v1 = vadd.f32 %v4102_v36, %v11293_v48  ;;  %v8274_v26 = vadd.f32 %v4554_v52, %v11296_v43  ;;  %v4104_v41 = vpop.f32.mrb[127].mxu0  ;;  %v4556_v8 = vpop.f32.mrb[63].mxu1  ;;  %6436 = vmatmul.mubr.bf16.gmra.mrb[88].mxu1 %v11480_v51  ;;  %v5095_v47 = vmax.f32 %v8240_v44, 0.0  ;;  %v5097_v4 = vmax.f32 %v8272_v63, 0.0  ;;  %v9556_v48 = vld [vmem:[%s10249_s1 + $0x3c4] ss:$16 sps:$4 sm:$0xff]  }
 0x35c   : > { %v8243_v5 = vadd.f32 %v4104_v41, %v11300_v13  ;;  %v8275_v53 = vadd.f32 %v4556_v8, %v11303_v38  ;;  %6481 = vmatpush1.bf16.msra.mxu1 %v9548_v32  ;;  %v5096_v43 = vmax.f32 %v8241_v22, 0.0  ;;  %v5098_v59 = vmax.f32 %v8273_v7, 0.0  ;;  %v9559_v63 = vld [vmem:[%s10249_s1 + $0x3e4] ss:$16 sps:$4 sm:$0xff]   ;;  %v9560_v22 = vld [vmem:[%s10249_s1 + $0x400] ss:$16 sps:$4 sm:$0xff]  }
 0x35d   : > { %v5101_v2 = vmax.f32 %v8242_v1, 0.0  ;;  %v5103_v9 = vmax.f32 %v8274_v26, 0.0  ;;  %4951 = vmatmul.mubr.bf16.gmra.mrb[136].mxu0 %v10739_v30  ;;  %6482 = vmatprep.subr.bf16.mxu1 %v9553_v42  ;;  %v9554_v30 = vld [vmem:[%s10249_s1 + $0x3c0] ss:$16 sps:$4 sm:$0xff]   ;;  %v9562_v42 = vld [vmem:[%s10249_s1 + $0x404] ss:$16 sps:$4 sm:$0xff]  }
 0x35e   : > { %v5102_v36 = vmax.f32 %v8243_v5, 0.0  ;;  %v5104_v52 = vmax.f32 %v8275_v53, 0.0  ;;  %4960 = vmatprep.mubr.bf16.mxu0 %v10773_v56  ;;  %v9557_v56 = vld [vmem:[%s10249_s1 + $0x3e0] ss:$16 sps:$4 sm:$0xff]   ;;  %v9565_v7 = vld [vmem:[%s10249_s1 + $0x424] ss:$16 sps:$4 sm:$0xff]  }
 0x35f   : > { %v11504_v13 = vpack.c.bf16 %v5101_v2, %v5095_v47  ;;  %v11506_v38 = vpack.c.bf16 %v5103_v9, %v5097_v4  ;;  %v9563_v1 = vld [vmem:[%s10249_s1 + $0x420] ss:$16 sps:$4 sm:$0xff]   ;;  %v9571_v26 = vld [vmem:[%s10249_s1 + $0x464] ss:$16 sps:$4 sm:$0xff]  }
 0x360   : > { %v11508_v32 = vpack.c.bf16 %v5102_v36, %v5096_v43  ;;  %v11510_v44 = vpack.c.bf16 %v5104_v52, %v5098_v59  ;;  %6483 = vmatpush1.bf16.msra.mxu1 %v9551_v60  ;;  %v9569_v41 = vld [vmem:[%s10249_s1 + $0x460] ss:$16 sps:$4 sm:$0xff]   ;;  %v9577_v8 = vld [vmem:[%s10249_s1 + $0x4a4] ss:$16 sps:$4 sm:$0xff]  }
 0x361   : > { %6484 = vmatprep.subr.bf16.mxu1 %v9556_v48  ;;  %v9575_v5 = vld [vmem:[%s10249_s1 + $0x4a0] ss:$16 sps:$4 sm:$0xff]   ;;  %v9583_v53 = vld [vmem:[%s10249_s1 + $0x4e4] ss:$16 sps:$4 sm:$0xff]  }
 0x362   : > { %6445 = vmatprep.mubr.bf16.mxu1 %v11508_v32  ;;  %v9581_v60 = vld [vmem:[%s10249_s1 + $0x4e0] ss:$16 sps:$4 sm:$0xff]   ;;  %v9589_v47 = vld [vmem:[%s10249_s1 + $0x524] ss:$16 sps:$4 sm:$0xff]  }
 0x363   : > { %6446 = vmatmul.mubr.bf16.gmra.mrb[92].mxu1 %v11504_v13  ;;  %v9587_v4 = vld [vmem:[%s10249_s1 + $0x520] ss:$16 sps:$4 sm:$0xff]   ;;  %v9592_v2 = vld [vmem:[%s10249_s1 + $0x544] ss:$16 sps:$4 sm:$0xff]  }
 0x364   : > { %6485 = vmatpush1.bf16.msra.mxu1 %v9554_v30  ;;  %6488 = vmatprep.mubr.bf16.mxu1 %v11327_v18  ;;  %v9595_v9 = vld [vmem:[%s10249_s1 + $0x564] ss:$16 sps:$4 sm:$0xff]   ;;  %v9593_v48 = vld [vmem:[%s10249_s1 + $0x560] ss:$16 sps:$4 sm:$0xff]  }
 0x365   : > { %4961 = vmatmul.mubr.bf16.gmra.mrb[140].mxu0 %v10767_v37  ;;  %6486 = vmatprep.subr.bf16.mxu1 %v9559_v63  ;;  %v9568_v37 = vld [vmem:[%s10249_s1 + $0x444] ss:$16 sps:$4 sm:$0xff]   ;;  %v9596_v59 = vld [vmem:[%s10249_s1 + $0x580] ss:$16 sps:$4 sm:$0xff]  }
 0x366   : > { %4970 = vmatprep.mubr.bf16.mxu0 %v10801_v29  ;;  %v9566_v29 = vld [vmem:[%s10249_s1 + $0x440] ss:$16 sps:$4 sm:$0xff]   ;;  %v9598_v43 = vld [vmem:[%s10249_s1 + $0x584] ss:$16 sps:$4 sm:$0xff]  }
 0x367   : > { %v9601_v36 = vld [vmem:[%s10249_s1 + $0x5a4] ss:$16 sps:$4 sm:$0xff]   ;;  %v9599_v52 = vld [vmem:[%s10249_s1 + $0x5a0] ss:$16 sps:$4 sm:$0xff]  }
 0x368   : > { %6487 = vmatpush1.bf16.msra.mxu1 %v9557_v56  ;;  %v9604_v30 = vld [vmem:[%s10249_s1 + $0x5c4] ss:$16 sps:$4 sm:$0xff]   ;;  %v9602_v63 = vld [vmem:[%s10249_s1 + $0x5c0] ss:$16 sps:$4 sm:$0xff]  }
 0x369   : > { %6569 = vmatprep.subr.bf16.mxu1 %v9562_v42  ;;  %v9607_v56 = vld [vmem:[%s10249_s1 + $0x5e4] ss:$16 sps:$4 sm:$0xff]   ;;  %v9605_v42 = vld [vmem:[%s10249_s1 + $0x5e0] ss:$16 sps:$4 sm:$0xff]  }
 0x36b   : > { %6489 = vmatmul.mubr.bf16.vlgmr.msra.gmra.mrb[64].mxu1 %v11322_v14 }
 0x36c   : > { %6498 = vmatprep.mubr.bf16.mxu1 %v11355_v55  ;;  %6570 = vmatpush1.bf16.msra.mxu1 %v9560_v22  ;;  %v9610_v22 = vld [vmem:[%s10249_s1 + $0xc] ss:$16 sps:$4 sm:$0xff]  }
 0x36d   : > { %4971 = vmatmul.mubr.bf16.gmra.mrb[144].mxu0 %v10795_v54  ;;  %6571 = vmatprep.subr.bf16.mxu1 %v9565_v7  ;;  %v9574_v54 = vld [vmem:[%s10249_s1 + $0x484] ss:$16 sps:$4 sm:$0xff]  }
 0x36e   : > { %4980 = vmatprep.mubr.bf16.mxu0 %v10829_v34  ;;  %v9572_v34 = vld [vmem:[%s10249_s1 + $0x480] ss:$16 sps:$4 sm:$0xff]  }
 0x36f   : > { %v9754_v7 = vld [vmem:[%s10252_s28 + $0x10] sm:$0x77] }
 0x370   : > { %6572 = vmatpush1.bf16.msra.mxu1 %v9563_v1  ;;  %v1700_v1 = vrot.slane %v9754_v7, %v11275_v16 }
 0x371   : > { %6573 = vmatprep.subr.bf16.mxu1 %v9568_v37  ;;  %v1704_v37 = vrot.slane %v9754_v7, %v11280_v62 }
 0x373   : > { %6499 = vmatmul.mubr.bf16.gmra.mrb[68].mxu1 %v11350_v3 }
 0x374   : > { %6508 = vmatprep.mubr.bf16.mxu1 %v11383_v33  ;;  %6574 = vmatpush1.bf16.msra.mxu1 %v9566_v29  ;;  %v11579_v29 = vrot.slane %v1700_v1, %v11275_v16 }
 0x375   : > { %4981 = vmatmul.mubr.bf16.gmra.mrb[148].mxu0 %v10823_v20  ;;  %6575 = vmatprep.subr.bf16.mxu1 %v9571_v26  ;;  %v9580_v20 = vld [vmem:[%s10249_s1 + $0x4c4] ss:$16 sps:$4 sm:$0xff]   ;;  %v11582_v26 = vrot.slane %v1704_v37, %v11275_v16 }
 0x376   : > { %4990 = vmatprep.mubr.bf16.mxu0 %v10858_v35  ;;  %v9578_v35 = vld [vmem:[%s10249_s1 + $0x4c0] ss:$16 sps:$4 sm:$0xff]  }
 0x378   : > { %6576 = vmatpush1.bf16.msra.mxu1 %v9569_v41 }
 0x379   : > { %6577 = vmatprep.subr.bf16.mxu1 %v9574_v54 }
 0x37b   : > { %6509 = vmatmul.mubr.bf16.gmra.mrb[72].mxu1 %v11378_v23 }
 0x37c   : > { %6518 = vmatprep.mubr.bf16.mxu1 %v11411_v46  ;;  %6578 = vmatpush1.bf16.msra.mxu1 %v9572_v34 }
 0x37d   : > { %4991 = vmatmul.mubr.bf16.gmra.mrb[152].mxu0 %v10852_v12  ;;  %6579 = vmatprep.subr.bf16.mxu1 %v9577_v8  ;;  %v9586_v12 = vld [vmem:[%s10249_s1 + $0x504] ss:$16 sps:$4 sm:$0xff]  }
 0x37e   : > { %5000 = vmatprep.mubr.bf16.mxu0 %v10891_v25  ;;  %v9584_v25 = vld [vmem:[%s10249_s1 + $0x500] ss:$16 sps:$4 sm:$0xff]  }
 0x380   : > { %6580 = vmatpush1.bf16.msra.mxu1 %v9575_v5 }
 0x381   : > { %6581 = vmatprep.subr.bf16.mxu1 %v9580_v20 }
 0x383   : > { %6519 = vmatmul.mubr.bf16.gmra.mrb[76].mxu1 %v11406_v24 }
 0x384   : > { %6528 = vmatprep.mubr.bf16.mxu1 %v11438_v39  ;;  %6582 = vmatpush1.bf16.msra.mxu1 %v9578_v35 }
 0x385   : > { %5001 = vmatmul.mubr.bf16.gmra.mrb[156].mxu0 %v10881_v10  ;;  %6583 = vmatprep.subr.bf16.mxu1 %v9583_v53  ;;  %v9590_v10 = vld [vmem:[%s10249_s1 + $0x540] ss:$16 sps:$4 sm:$0xff]  }
 0x388   : > { %6584 = vmatpush1.bf16.msra.mxu1 %v9581_v60 }
 0x389   : > { %6585 = vmatprep.subr.bf16.mxu1 %v9586_v12 }
 0x38b   : > { %6529 = vmatmul.mubr.bf16.gmra.mrb[80].mxu1 %v11434_v28 }
 0x38c   : > { %6538 = vmatprep.mubr.bf16.mxu1 %v11462_v49  ;;  %6586 = vmatpush1.bf16.msra.mxu1 %v9584_v25 }
 0x38d   : > { %6587 = vmatprep.subr.bf16.mxu1 %v9589_v47 }
 0x390   : > { %6588 = vmatpush1.bf16.msra.mxu1 %v9587_v4 }
 0x391   : > { %6589 = vmatprep.subr.bf16.mxu1 %v9592_v2  ;;  %v9608_v2 = vld [vmem:[%s10249_s1 + $0x8] ss:$16 sps:$4 sm:$0xff]  }
 0x393   : > { %6539 = vmatmul.mubr.bf16.gmra.mrb[84].mxu1 %v11458_v0 }
 0x394   : > { %6548 = vmatprep.mubr.bf16.mxu1 %v11486_v27  ;;  %6590 = vmatpush1.bf16.msra.mxu1 %v9590_v10 }
 0x395   : > { %6591 = vmatprep.subr.bf16.mxu1 %v9595_v9 }
 0x398   : > { %6592 = vmatpush1.bf16.msra.mxu1 %v9593_v48  ;;  %v9613_v48 = vld [vmem:[%s10249_s1 + $0x2c] ss:$16 sps:$4 sm:$0xff]  }
 0x399   : > { %6593 = vmatprep.subr.bf16.mxu1 %v9598_v43 }
 0x39b   : > { %6549 = vmatmul.mubr.bf16.gmra.mrb[88].mxu1 %v11482_v50 }
 0x39c   : > { %6558 = vmatprep.mubr.bf16.mxu1 %v11510_v44  ;;  %6594 = vmatpush1.bf16.msra.mxu1 %v9596_v59 }
 0x39d   : > { %6595 = vmatprep.subr.bf16.mxu1 %v9601_v36 }
 0x3a0   : > { %6596 = vmatpush1.bf16.msra.mxu1 %v9599_v52 }
 0x3a1   : > { %6597 = vmatprep.subr.bf16.mxu1 %v9604_v30 }
 0x3a3   : > { %6559 = vmatmul.mubr.bf16.gmra.mrb[92].mxu1 %v11506_v38 }
 0x3a4   : > { %6598 = vmatpush1.bf16.msra.mxu1 %v9602_v63  ;;  %v9611_v63 = vld [vmem:[%s10249_s1 + $0x28] ss:$16 sps:$4 sm:$0xff]  }
 0x3a5   : > { %6599 = vmatprep.subr.bf16.mxu1 %v9607_v56 }
 0x3a8   : > { %6600 = vmatpush1.bf16.msra.mxu1 %v9605_v42 }
 0x3a9   : > { %6682 = vmatprep.subr.bf16.mxu1 %v9610_v22  ;;  %v9616_v22 = vld [vmem:[%s10249_s1 + $0x4c] ss:$16 sps:$4 sm:$0xff]  }
 0x420   : > { %v4932_v41 = vpop.f32.mrb[128].mxu0 }
 0x421   : > { %v8276_v54 = vadd.f32 %v4932_v41, %v11579_v29  ;;  %v4934_v34 = vpop.f32.mrb[129].mxu0 }
 0x422   : > { %v8277_v8 = vadd.f32 %v4934_v34, %v11582_v26  ;;  %v4936_v5 = vpop.f32.mrb[130].mxu0  ;;  %v9614_v34 = vld [vmem:[%s10249_s1 + $0x48] ss:$16 sps:$4 sm:$0xff]  }
 0x423   : > { %v8278_v20 = vadd.f32 %v4936_v5, %v11579_v29  ;;  %v4938_v35 = vpop.f32.mrb[131].mxu0  ;;  %v5015_v53 = vmax.f32 %v8276_v54, 0.0 }
 0x424   : > { %v8279_v62 = vadd.f32 %v4938_v35, %v11582_v26  ;;  %v5016_v12 = vmax.f32 %v8277_v8, 0.0 }
 0x425   : > { %v5021_v60 = vmax.f32 %v8278_v20, 0.0  ;;  %v9619_v20 = vld [vmem:[%s10249_s1 + $0x6c] ss:$16 sps:$4 sm:$0xff]  }
 0x426   : > { %v5022_v25 = vmax.f32 %v8279_v62, 0.0 }
 0x427   : > { %v11588_v16 = vpack.c.bf16 %v5021_v60, %v5015_v53 }
 0x428   : > { %v11590_v47 = vpack.c.bf16 %v5022_v25, %v5016_v12  ;;  %v4942_v4 = vpop.f32.mrb[132].mxu0  ;;  %v9617_v25 = vld [vmem:[%s10249_s1 + $0x68] ss:$16 sps:$4 sm:$0xff]  }
 0x429   : > { %v8280_v10 = vadd.f32 %v4942_v4, %v11579_v29  ;;  %v4944_v9 = vpop.f32.mrb[133].mxu0 }
 0x42a   : > { %v8281_v43 = vadd.f32 %v4944_v9, %v11582_v26  ;;  %v4946_v59 = vpop.f32.mrb[134].mxu0  ;;  %6601 = vmatprep.mubr.bf16.mxu1 %v11590_v47 }
 0x42b   : > { %v8282_v36 = vadd.f32 %v4946_v59, %v11579_v29  ;;  %v4948_v52 = vpop.f32.mrb[135].mxu0  ;;  %6602 = vmatmul.mubr.bf16.vlgmr.msra.gmra.mrb[64].mxu1 %v11588_v16  ;;  %v5027_v56 = vmax.f32 %v8280_v10, 0.0  ;;  %v9622_v10 = vld [vmem:[%s10249_s1 + $0x8c] ss:$16 sps:$4 sm:$0xff]  }
 0x42c   : > { %v8283_v30 = vadd.f32 %v4948_v52, %v11582_v26  ;;  %6683 = vmatpush1.bf16.msra.mxu1 %v9608_v2  ;;  %v5028_v7 = vmax.f32 %v8281_v43, 0.0  ;;  %v9620_v52 = vld [vmem:[%s10249_s1 + $0x88] ss:$16 sps:$4 sm:$0xff]  }
 0x42d   : > { %v5033_v42 = vmax.f32 %v8282_v36, 0.0  ;;  %6684 = vmatprep.subr.bf16.mxu1 %v9613_v48 }
 0x42e   : > { %v5034_v1 = vmax.f32 %v8283_v30, 0.0 }
 0x42f   : > { %v11602_v37 = vpack.c.bf16 %v5033_v42, %v5027_v56  ;;  %v9625_v56 = vld [vmem:[%s10249_s1 + $0xac] ss:$16 sps:$4 sm:$0xff]  }
 0x430   : > { %v11604_v41 = vpack.c.bf16 %v5034_v1, %v5028_v7  ;;  %v4952_v54 = vpop.f32.mrb[136].mxu0  ;;  %6685 = vmatpush1.bf16.msra.mxu1 %v9611_v63 }
 0x431   : > { %v8284_v8 = vadd.f32 %v4952_v54, %v11579_v29  ;;  %v4954_v5 = vpop.f32.mrb[137].mxu0  ;;  %6686 = vmatprep.subr.bf16.mxu1 %v9616_v22 }
 0x432   : > { %v8285_v35 = vadd.f32 %v4954_v5, %v11582_v26  ;;  %v4956_v62 = vpop.f32.mrb[138].mxu0  ;;  %6611 = vmatprep.mubr.bf16.mxu1 %v11604_v41 }
 0x433   : > { %v8286_v53 = vadd.f32 %v4956_v62, %v11579_v29  ;;  %v4958_v60 = vpop.f32.mrb[139].mxu0  ;;  %6612 = vmatmul.mubr.bf16.gmra.mrb[68].mxu1 %v11602_v37  ;;  %v5039_v4 = vmax.f32 %v8284_v8, 0.0 }
 0x434   : > { %v8287_v12 = vadd.f32 %v4958_v60, %v11582_v26  ;;  %6687 = vmatpush1.bf16.msra.mxu1 %v9614_v34  ;;  %v5040_v9 = vmax.f32 %v8285_v35, 0.0  ;;  %v9623_v34 = vld [vmem:[%s10249_s1 + $0xa8] ss:$16 sps:$4 sm:$0xff]  }
 0x435   : > { %v5045_v2 = vmax.f32 %v8286_v53, 0.0  ;;  %6688 = vmatprep.subr.bf16.mxu1 %v9619_v20  ;;  %v9628_v20 = vld [vmem:[%s10249_s1 + $0xcc] ss:$16 sps:$4 sm:$0xff]  }
 0x436   : > { %v5046_v48 = vmax.f32 %v8287_v12, 0.0 }
 0x437   : > { %v11616_v43 = vpack.c.bf16 %v5045_v2, %v5039_v4 }
 0x438   : > { %v11618_v59 = vpack.c.bf16 %v5046_v48, %v5040_v9  ;;  %v4962_v36 = vpop.f32.mrb[140].mxu0  ;;  %6689 = vmatpush1.bf16.msra.mxu1 %v9617_v25  ;;  %v9626_v25 = vld [vmem:[%s10249_s1 + $0xc8] ss:$16 sps:$4 sm:$0xff]  }
 0x439   : > { %v8288_v30 = vadd.f32 %v4962_v36, %v11579_v29  ;;  %v4964_v63 = vpop.f32.mrb[141].mxu0  ;;  %6690 = vmatprep.subr.bf16.mxu1 %v9622_v10  ;;  %v9631_v10 = vld [vmem:[%s10249_s1 + $0xec] ss:$16 sps:$4 sm:$0xff]  }
 0x43a   : > { %v8289_v42 = vadd.f32 %v4964_v63, %v11582_v26  ;;  %v4966_v22 = vpop.f32.mrb[142].mxu0  ;;  %6621 = vmatprep.mubr.bf16.mxu1 %v11618_v59  ;;  %v9629_v63 = vld [vmem:[%s10249_s1 + $0xe8] ss:$16 sps:$4 sm:$0xff]  }
 0x43b   : > { %v8290_v7 = vadd.f32 %v4966_v22, %v11579_v29  ;;  %v4968_v1 = vpop.f32.mrb[143].mxu0  ;;  %6622 = vmatmul.mubr.bf16.gmra.mrb[72].mxu1 %v11616_v43  ;;  %v5051_v8 = vmax.f32 %v8288_v30, 0.0  ;;  %v9634_v22 = vld [vmem:[%s10249_s1 + $0x10c] ss:$16 sps:$4 sm:$0xff]  }
 0x43c   : > { %v8291_v54 = vadd.f32 %v4968_v1, %v11582_v26  ;;  %6691 = vmatpush1.bf16.msra.mxu1 %v9620_v52  ;;  %v5052_v35 = vmax.f32 %v8289_v42, 0.0 }
 0x43d   : > { %v5057_v5 = vmax.f32 %v8290_v7, 0.0  ;;  %6692 = vmatprep.subr.bf16.mxu1 %v9625_v56 }
 0x43e   : > { %v5058_v62 = vmax.f32 %v8291_v54, 0.0 }
 0x43f   : > { %v11630_v53 = vpack.c.bf16 %v5057_v5, %v5051_v8  ;;  %v9632_v5 = vld [vmem:[%s10249_s1 + $0x108] ss:$16 sps:$4 sm:$0xff]  }
 0x440   : > { %v11632_v60 = vpack.c.bf16 %v5058_v62, %v5052_v35  ;;  %v4972_v12 = vpop.f32.mrb[144].mxu0  ;;  %6693 = vmatpush1.bf16.msra.mxu1 %v9623_v34  ;;  %v9637_v62 = vld [vmem:[%s10249_s1 + $0x12c] ss:$16 sps:$4 sm:$0xff]  }
 0x441   : > { %v8292_v4 = vadd.f32 %v4972_v12, %v11579_v29  ;;  %v4974_v2 = vpop.f32.mrb[145].mxu0  ;;  %6694 = vmatprep.subr.bf16.mxu1 %v9628_v20 }
 0x442   : > { %v8293_v9 = vadd.f32 %v4974_v2, %v11582_v26  ;;  %v4976_v48 = vpop.f32.mrb[146].mxu0  ;;  %6631 = vmatprep.mubr.bf16.mxu1 %v11632_v60 }
 0x443   : > { %v8294_v36 = vadd.f32 %v4976_v48, %v11579_v29  ;;  %v4978_v52 = vpop.f32.mrb[147].mxu0  ;;  %6632 = vmatmul.mubr.bf16.gmra.mrb[76].mxu1 %v11630_v53  ;;  %v5063_v56 = vmax.f32 %v8292_v4, 0.0 }
 0x444   : > { %v8295_v30 = vadd.f32 %v4978_v52, %v11582_v26  ;;  %6695 = vmatpush1.bf16.msra.mxu1 %v9626_v25  ;;  %v5064_v7 = vmax.f32 %v8293_v9, 0.0  ;;  %v9635_v9 = vld [vmem:[%s10249_s1 + $0x128] ss:$16 sps:$4 sm:$0xff]   ;;  %v9640_v52 = vld [vmem:[%s10249_s1 + $0x14c] ss:$16 sps:$4 sm:$0xff]  }
 0x445   : > { %v5069_v42 = vmax.f32 %v8294_v36, 0.0  ;;  %6696 = vmatprep.subr.bf16.mxu1 %v9631_v10 }
 0x446   : > { %v5070_v1 = vmax.f32 %v8295_v30, 0.0 }
 0x447   : > { %v11644_v54 = vpack.c.bf16 %v5069_v42, %v5063_v56 }
 0x448   : > { %v11646_v34 = vpack.c.bf16 %v5070_v1, %v5064_v7  ;;  %v4982_v8 = vpop.f32.mrb[148].mxu0  ;;  %6697 = vmatpush1.bf16.msra.mxu1 %v9629_v63  ;;  %v9638_v7 = vld [vmem:[%s10249_s1 + $0x148] ss:$16 sps:$4 sm:$0xff]  }
 0x449   : > { %v8296_v20 = vadd.f32 %v4982_v8, %v11579_v29  ;;  %v4984_v35 = vpop.f32.mrb[149].mxu0  ;;  %6698 = vmatprep.subr.bf16.mxu1 %v9634_v22 }
 0x44a   : > { %v8297_v12 = vadd.f32 %v4984_v35, %v11582_v26  ;;  %v4986_v25 = vpop.f32.mrb[150].mxu0  ;;  %6641 = vmatprep.mubr.bf16.mxu1 %v11646_v34 }
 0x44b   : > { %v8298_v4 = vadd.f32 %v4986_v25, %v11579_v29  ;;  %v4988_v2 = vpop.f32.mrb[151].mxu0  ;;  %6642 = vmatmul.mubr.bf16.gmra.mrb[80].mxu1 %v11644_v54  ;;  %v5075_v48 = vmax.f32 %v8296_v20, 0.0 }
 0x44c   : > { %v8299_v10 = vadd.f32 %v4988_v2, %v11582_v26  ;;  %6699 = vmatpush1.bf16.msra.mxu1 %v9632_v5  ;;  %v5076_v30 = vmax.f32 %v8297_v12, 0.0  ;;  %v9643_v5 = vld [vmem:[%s10249_s1 + $0x16c] ss:$16 sps:$4 sm:$0xff]  }
 0x44d   : > { %v5081_v36 = vmax.f32 %v8298_v4, 0.0  ;;  %6700 = vmatprep.subr.bf16.mxu1 %v9637_v62  ;;  %v9641_v4 = vld [vmem:[%s10249_s1 + $0x168] ss:$16 sps:$4 sm:$0xff]  }
 0x44e   : > { %v5082_v63 = vmax.f32 %v8299_v10, 0.0 }
 0x44f   : > { %v11658_v56 = vpack.c.bf16 %v5081_v36, %v5075_v48 }
 0x450   : > { %v11660_v42 = vpack.c.bf16 %v5082_v63, %v5076_v30  ;;  %v4992_v22 = vpop.f32.mrb[152].mxu0  ;;  %6701 = vmatpush1.bf16.msra.mxu1 %v9635_v9  ;;  %v9646_v9 = vld [vmem:[%s10249_s1 + $0x18c] ss:$16 sps:$4 sm:$0xff]  }
 0x451   : > { %v8300_v1 = vadd.f32 %v4992_v22, %v11579_v29  ;;  %v4994_v8 = vpop.f32.mrb[153].mxu0  ;;  %6702 = vmatprep.subr.bf16.mxu1 %v9640_v52  ;;  %v9644_v22 = vld [vmem:[%s10249_s1 + $0x188] ss:$16 sps:$4 sm:$0xff]  }
 0x452   : > { %v8301_v20 = vadd.f32 %v4994_v8, %v11582_v26  ;;  %v4996_v35 = vpop.f32.mrb[154].mxu0  ;;  %6651 = vmatprep.mubr.bf16.mxu1 %v11660_v42 }
 0x453   : > { %v8302_v62 = vadd.f32 %v4996_v35, %v11579_v29  ;;  %v4998_v12 = vpop.f32.mrb[155].mxu0  ;;  %6652 = vmatmul.mubr.bf16.gmra.mrb[84].mxu1 %v11658_v56  ;;  %v5087_v2 = vmax.f32 %v8300_v1, 0.0  ;;  %v9649_v35 = vld [vmem:[%s10249_s1 + $0x1ac] ss:$16 sps:$4 sm:$0xff]  }
 0x454   : > { %v8303_v25 = vadd.f32 %v4998_v12, %v11582_v26  ;;  %6703 = vmatpush1.bf16.msra.mxu1 %v9638_v7  ;;  %v5088_v48 = vmax.f32 %v8301_v20, 0.0 }
 0x455   : > { %v5093_v10 = vmax.f32 %v8302_v62, 0.0  ;;  %6704 = vmatprep.subr.bf16.mxu1 %v9643_v5 }
 0x456   : > { %v5094_v36 = vmax.f32 %v8303_v25, 0.0  ;;  %v9647_v25 = vld [vmem:[%s10249_s1 + $0x1a8] ss:$16 sps:$4 sm:$0xff]  }
 0x457   : > { %v11672_v52 = vpack.c.bf16 %v5093_v10, %v5087_v2  ;;  %v9652_v10 = vld [vmem:[%s10249_s1 + $0x1cc] ss:$16 sps:$4 sm:$0xff]  }
 0x458   : > { %v11674_v30 = vpack.c.bf16 %v5094_v36, %v5088_v48  ;;  %v5002_v63 = vpop.f32.mrb[156].mxu0  ;;  %6705 = vmatpush1.bf16.msra.mxu1 %v9641_v4 }
 0x459   : > { %v8304_v8 = vadd.f32 %v5002_v63, %v11579_v29  ;;  %v5004_v7 = vpop.f32.mrb[157].mxu0  ;;  %6706 = vmatprep.subr.bf16.mxu1 %v9646_v9  ;;  %v9650_v63 = vld [vmem:[%s10249_s1 + $0x1c8] ss:$16 sps:$4 sm:$0xff]  }
 0x45a   : > { %v8305_v1 = vadd.f32 %v5004_v7, %v11582_v26  ;;  %v5006_v5 = vpop.f32.mrb[158].mxu0  ;;  %6661 = vmatprep.mubr.bf16.mxu1 %v11674_v30  ;;  %v9656_v7 = vld [vmem:[%s10249_s1 + $0x208] ss:$16 sps:$4 sm:$0xff]  }
 0x45b   : > { %v8306_v20 = vadd.f32 %v5006_v5, %v11579_v29  ;;  %v5008_v62 = vpop.f32.mrb[159].mxu0  ;;  %6662 = vmatmul.mubr.bf16.gmra.mrb[88].mxu1 %v11672_v52  ;;  %v5099_v4 = vmax.f32 %v8304_v8, 0.0  ;;  %v9658_v8 = vld [vmem:[%s10249_s1 + $0x20c] ss:$16 sps:$4 sm:$0xff]   ;;  %v9662_v5 = vld [vmem:[%s10249_s1 + $0x248] ss:$16 sps:$4 sm:$0xff]  }
 0x45c   : > { %v8307_v12 = vadd.f32 %v5008_v62, %v11582_v26  ;;  %6707 = vmatpush1.bf16.msra.mxu1 %v9644_v22  ;;  %v5100_v9 = vmax.f32 %v8305_v1, 0.0  ;;  %v9655_v26 = vld [vmem:[%s10249_s1 + $0x1ec] ss:$16 sps:$4 sm:$0xff]   ;;  %v9653_v22 = vld [vmem:[%s10249_s1 + $0x1e8] ss:$16 sps:$4 sm:$0xff]  }
 0x45d   : > { %v5105_v2 = vmax.f32 %v8306_v20, 0.0  ;;  %6708 = vmatprep.subr.bf16.mxu1 %v9649_v35  ;;  %v9661_v35 = vld [vmem:[%s10249_s1 + $0x22c] ss:$16 sps:$4 sm:$0xff]   ;;  %v9659_v1 = vld [vmem:[%s10249_s1 + $0x228] ss:$16 sps:$4 sm:$0xff]  }
 0x45e   : > { %v5106_v48 = vmax.f32 %v8307_v12, 0.0  ;;  %v9667_v20 = vld [vmem:[%s10249_s1 + $0x26c] ss:$16 sps:$4 sm:$0xff]   ;;  %v9668_v62 = vld [vmem:[%s10249_s1 + $0x288] ss:$16 sps:$4 sm:$0xff]  }
 0x45f   : > { %v11686_v36 = vpack.c.bf16 %v5105_v2, %v5099_v4  ;;  %v9673_v12 = vld [vmem:[%s10249_s1 + $0x2ac] ss:$16 sps:$4 sm:$0xff]   ;;  %v9680_v2 = vld [vmem:[%s10249_s1 + $0x308] ss:$16 sps:$4 sm:$0xff]  }
 0x460   : > { %v11688_v29 = vpack.c.bf16 %v5106_v48, %v5100_v9  ;;  %6709 = vmatpush1.bf16.msra.mxu1 %v9647_v25  ;;  %v9674_v25 = vld [vmem:[%s10249_s1 + $0x2c8] ss:$16 sps:$4 sm:$0xff]   ;;  %v9679_v4 = vld [vmem:[%s10249_s1 + $0x2ec] ss:$16 sps:$4 sm:$0xff]  }
 0x461   : > { %6710 = vmatprep.subr.bf16.mxu1 %v9652_v10  ;;  %v9685_v10 = vld [vmem:[%s10249_s1 + $0x32c] ss:$16 sps:$4 sm:$0xff]   ;;  %v9686_v9 = vld [vmem:[%s10249_s1 + $0x348] ss:$16 sps:$4 sm:$0xff]  }
 0x462   : > { %6671 = vmatprep.mubr.bf16.mxu1 %v11688_v29  ;;  %v9691_v48 = vld [vmem:[%s10249_s1 + $0x36c] ss:$16 sps:$4 sm:$0xff]  }
 0x463   : > { %6672 = vmatmul.mubr.bf16.gmra.mrb[92].mxu1 %v11686_v36 }
 0x464   : > { %6711 = vmatpush1.bf16.msra.mxu1 %v9650_v63  ;;  %6714 = vmatprep.mubr.bf16.mxu1 %v11325_v61  ;;  %v9664_v61 = vld [vmem:[%s10249_s1 + $0x24c] ss:$16 sps:$4 sm:$0xff]   ;;  %v12073_v63 = vld [vmem:[#allocation21_spill] sm:$0xff] }
 0x465   : > { %6712 = vmatprep.subr.bf16.mxu1 %v9655_v26  ;;  %v9692_v26 = vld [vmem:[%s10249_s1 + $0x388] ss:$16 sps:$4 sm:$0xff]  }
 0x468   : > { %6713 = vmatpush1.bf16.msra.mxu1 %v9653_v22  ;;  %v9697_v22 = vld [vmem:[%s10249_s1 + $0x3ac] ss:$16 sps:$4 sm:$0xff]  }
 0x469   : > { %6795 = vmatprep.subr.bf16.mxu1 %v9658_v8  ;;  %v9695_v8 = vld [vmem:[%s10249_s1 + $0x3a8] ss:$16 sps:$4 sm:$0xff]  }
 0x46b   : > { %6715 = vmatmul.mubr.bf16.vlgmr.msra.gmra.mrb[96].mxu1 %v11320_v57  ;;  %v9665_v57 = vld [vmem:[%s10249_s1 + $0x268] ss:$16 sps:$4 sm:$0xff]  }
 0x46c   : > { %6724 = vmatprep.mubr.bf16.mxu1 %v11353_v21  ;;  %6796 = vmatpush1.bf16.msra.mxu1 %v9656_v7  ;;  %v9670_v21 = vld [vmem:[%s10249_s1 + $0x28c] ss:$16 sps:$4 sm:$0xff]   ;;  %v9698_v7 = vld [vmem:[%s10249_s1 + $0x3c8] ss:$16 sps:$4 sm:$0xff]  }
 0x46d   : > { %6797 = vmatprep.subr.bf16.mxu1 %v9661_v35  ;;  %v9703_v35 = vld [vmem:[%s10249_s1 + $0x3ec] ss:$16 sps:$4 sm:$0xff]  }
 0x470   : > { %6798 = vmatpush1.bf16.msra.mxu1 %v9659_v1  ;;  %v9704_v1 = vld [vmem:[%s10249_s1 + $0x408] ss:$16 sps:$4 sm:$0xff]  }
 0x471   : > { %6799 = vmatprep.subr.bf16.mxu1 %v9664_v61  ;;  %v9709_v61 = vld [vmem:[%s10249_s1 + $0x42c] ss:$16 sps:$4 sm:$0xff]  }
 0x473   : > { %6725 = vmatmul.mubr.bf16.gmra.mrb[100].mxu1 %v11348_v19  ;;  %v9671_v19 = vld [vmem:[%s10249_s1 + $0x2a8] ss:$16 sps:$4 sm:$0xff]  }
 0x474   : > { %6734 = vmatprep.mubr.bf16.mxu1 %v11381_v58  ;;  %6800 = vmatpush1.bf16.msra.mxu1 %v9662_v5  ;;  %v9676_v58 = vld [vmem:[%s10249_s1 + $0x2cc] ss:$16 sps:$4 sm:$0xff]   ;;  %v9710_v5 = vld [vmem:[%s10249_s1 + $0x448] ss:$16 sps:$4 sm:$0xff]  }
 0x475   : > { %6801 = vmatprep.subr.bf16.mxu1 %v9667_v20  ;;  %v9715_v20 = vld [vmem:[%s10249_s1 + $0x46c] ss:$16 sps:$4 sm:$0xff]  }
 0x478   : > { %6802 = vmatpush1.bf16.msra.mxu1 %v9665_v57  ;;  %v9716_v57 = vld [vmem:[%s10249_s1 + $0x488] ss:$16 sps:$4 sm:$0xff]  }
 0x479   : > { %6803 = vmatprep.subr.bf16.mxu1 %v9670_v21  ;;  %v9721_v21 = vld [vmem:[%s10249_s1 + $0x4ac] ss:$16 sps:$4 sm:$0xff]  }
 0x47b   : > { %6735 = vmatmul.mubr.bf16.gmra.mrb[104].mxu1 %v11376_v17  ;;  %v9677_v17 = vld [vmem:[%s10249_s1 + $0x2e8] ss:$16 sps:$4 sm:$0xff]  }
 0x47c   : > { %6744 = vmatprep.mubr.bf16.mxu1 %v11409_v6  ;;  %6804 = vmatpush1.bf16.msra.mxu1 %v9668_v62  ;;  %v9682_v6 = vld [vmem:[%s10249_s1 + $0x30c] ss:$16 sps:$4 sm:$0xff]   ;;  %v9722_v62 = vld [vmem:[%s10249_s1 + $0x4c8] ss:$16 sps:$4 sm:$0xff]  }
 0x47d   : > { %6805 = vmatprep.subr.bf16.mxu1 %v9673_v12  ;;  %v9727_v12 = vld [vmem:[%s10249_s1 + $0x4ec] ss:$16 sps:$4 sm:$0xff]  }
 0x480   : > { %6806 = vmatpush1.bf16.msra.mxu1 %v9671_v19  ;;  %v9728_v19 = vld [vmem:[%s10249_s1 + $0x508] ss:$16 sps:$4 sm:$0xff]  }
 0x481   : > { %6807 = vmatprep.subr.bf16.mxu1 %v9676_v58  ;;  %v9733_v58 = vld [vmem:[%s10249_s1 + $0x52c] ss:$16 sps:$4 sm:$0xff]  }
 0x483   : > { %6745 = vmatmul.mubr.bf16.gmra.mrb[108].mxu1 %v11404_v15  ;;  %v9683_v15 = vld [vmem:[%s10249_s1 + $0x328] ss:$16 sps:$4 sm:$0xff]  }
 0x484   : > { %6754 = vmatprep.mubr.bf16.mxu1 %v11436_v11  ;;  %6808 = vmatpush1.bf16.msra.mxu1 %v9674_v25  ;;  %v9688_v11 = vld [vmem:[%s10249_s1 + $0x34c] ss:$16 sps:$4 sm:$0xff]   ;;  %v9734_v25 = vld [vmem:[%s10249_s1 + $0x548] ss:$16 sps:$4 sm:$0xff]  }
 0x485   : > { %6809 = vmatprep.subr.bf16.mxu1 %v9679_v4  ;;  %v9739_v4 = vld [vmem:[%s10249_s1 + $0x56c] ss:$16 sps:$4 sm:$0xff]  }
 0x488   : > { %6810 = vmatpush1.bf16.msra.mxu1 %v9677_v17  ;;  %v9740_v17 = vld [vmem:[%s10249_s1 + $0x588] ss:$16 sps:$4 sm:$0xff]  }
 0x489   : > { %6811 = vmatprep.subr.bf16.mxu1 %v9682_v6  ;;  %v9745_v6 = vld [vmem:[%s10249_s1 + $0x5ac] ss:$16 sps:$4 sm:$0xff]  }
 0x48b   : > { %6755 = vmatmul.mubr.bf16.gmra.mrb[112].mxu1 %v11432_v40  ;;  %v9689_v40 = vld [vmem:[%s10249_s1 + $0x368] ss:$16 sps:$4 sm:$0xff]  }
 0x48c   : > { %6764 = vmatprep.mubr.bf16.mxu1 %v11460_v45  ;;  %6812 = vmatpush1.bf16.msra.mxu1 %v9680_v2  ;;  %v9694_v45 = vld [vmem:[%s10249_s1 + $0x38c] ss:$16 sps:$4 sm:$0xff]   ;;  %v9743_v2 = vld [vmem:[%s10249_s1 + $0x5a8] ss:$16 sps:$4 sm:$0xff]  }
 0x48d   : > { %6813 = vmatprep.subr.bf16.mxu1 %v9685_v10  ;;  %v9751_v10 = vld [vmem:[%s10249_s1 + $0x5ec] ss:$16 sps:$4 sm:$0xff]  }
 0x490   : > { %6814 = vmatpush1.bf16.msra.mxu1 %v9683_v15  ;;  %v9749_v15 = vld [vmem:[%s10249_s1 + $0x5e8] ss:$16 sps:$4 sm:$0xff]  }
 0x491   : > { %6815 = vmatprep.subr.bf16.mxu1 %v9688_v11  ;;  %v9755_v11 = vld [vmem:[%s10252_s28] sm:$0x77] }
 0x493   : > { %6765 = vmatmul.mubr.bf16.gmra.mrb[116].mxu1 %v12073_v63 }
 0x494   : > { %6774 = vmatprep.mubr.bf16.mxu1 %v11484_v31  ;;  %6816 = vmatpush1.bf16.msra.mxu1 %v9686_v9  ;;  %v9700_v31 = vld [vmem:[%s10249_s1 + $0x3cc] ss:$16 sps:$4 sm:$0xff]  }
 0x495   : > { %6817 = vmatprep.subr.bf16.mxu1 %v9691_v48 }
 0x498   : > { %6818 = vmatpush1.bf16.msra.mxu1 %v9689_v40 }
 0x499   : > { %6819 = vmatprep.subr.bf16.mxu1 %v9694_v45 }
 0x49b   : > { %6775 = vmatmul.mubr.bf16.gmra.mrb[120].mxu1 %v11480_v51  ;;  %v9701_v51 = vld [vmem:[%s10249_s1 + $0x3e8] ss:$16 sps:$4 sm:$0xff]  }
 0x49c   : > { %6784 = vmatprep.mubr.bf16.mxu1 %v11508_v32  ;;  %6820 = vmatpush1.bf16.msra.mxu1 %v9692_v26  ;;  %v9706_v32 = vld [vmem:[%s10249_s1 + $0x40c] ss:$16 sps:$4 sm:$0xff]  }
 0x49d   : > { %6821 = vmatprep.subr.bf16.mxu1 %v9697_v22 }
 0x4a0   : > { %6822 = vmatpush1.bf16.msra.mxu1 %v9695_v8 }
 0x4a1   : > { %6823 = vmatprep.subr.bf16.mxu1 %v9700_v31 }
 0x4a3   : > { %6785 = vmatmul.mubr.bf16.gmra.mrb[124].mxu1 %v11504_v13  ;;  %v9707_v13 = vld [vmem:[%s10249_s1 + $0x428] ss:$16 sps:$4 sm:$0xff]  }
 0x4a4   : > { %6824 = vmatpush1.bf16.msra.mxu1 %v9698_v7  ;;  %6827 = vmatprep.mubr.bf16.mxu1 %v11327_v18  ;;  %v9712_v18 = vld [vmem:[%s10249_s1 + $0x44c] ss:$16 sps:$4 sm:$0xff]  }
 0x4a5   : > { %6825 = vmatprep.subr.bf16.mxu1 %v9703_v35 }
 0x4a8   : > { %6826 = vmatpush1.bf16.msra.mxu1 %v9701_v51 }
 0x4a9   : > { %6908 = vmatprep.subr.bf16.mxu1 %v9706_v32 }
 0x4ab   : > { %6828 = vmatmul.mubr.bf16.vlgmr.msra.gmra.mrb[96].mxu1 %v11322_v14  ;;  %v9713_v14 = vld [vmem:[%s10249_s1 + $0x468] ss:$16 sps:$4 sm:$0xff]  }
 0x4ac   : > { %6837 = vmatprep.mubr.bf16.mxu1 %v11355_v55  ;;  %6909 = vmatpush1.bf16.msra.mxu1 %v9704_v1  ;;  %v9718_v55 = vld [vmem:[%s10249_s1 + $0x48c] ss:$16 sps:$4 sm:$0xff]  }
 0x4ad   : > { %6910 = vmatprep.subr.bf16.mxu1 %v9709_v61 }
 0x4b0   : > { %6911 = vmatpush1.bf16.msra.mxu1 %v9707_v13 }
 0x4b1   : > { %6912 = vmatprep.subr.bf16.mxu1 %v9712_v18 }
 0x4b3   : > { %6838 = vmatmul.mubr.bf16.gmra.mrb[100].mxu1 %v11350_v3  ;;  %v9719_v3 = vld [vmem:[%s10249_s1 + $0x4a8] ss:$16 sps:$4 sm:$0xff]  }
 0x4b4   : > { %6847 = vmatprep.mubr.bf16.mxu1 %v11383_v33  ;;  %6913 = vmatpush1.bf16.msra.mxu1 %v9710_v5  ;;  %v9724_v33 = vld [vmem:[%s10249_s1 + $0x4cc] ss:$16 sps:$4 sm:$0xff]  }
 0x4b5   : > { %6914 = vmatprep.subr.bf16.mxu1 %v9715_v20 }
 0x4b8   : > { %6915 = vmatpush1.bf16.msra.mxu1 %v9713_v14 }
 0x4b9   : > { %6916 = vmatprep.subr.bf16.mxu1 %v9718_v55 }
 0x4bb   : > { %6848 = vmatmul.mubr.bf16.gmra.mrb[104].mxu1 %v11378_v23  ;;  %v9725_v23 = vld [vmem:[%s10249_s1 + $0x4e8] ss:$16 sps:$4 sm:$0xff]  }
 0x4bc   : > { %6857 = vmatprep.mubr.bf16.mxu1 %v11411_v46  ;;  %6917 = vmatpush1.bf16.msra.mxu1 %v9716_v57  ;;  %v9730_v46 = vld [vmem:[%s10249_s1 + $0x50c] ss:$16 sps:$4 sm:$0xff]  }
 0x4bd   : > { %6918 = vmatprep.subr.bf16.mxu1 %v9721_v21 }
 0x4c0   : > { %6919 = vmatpush1.bf16.msra.mxu1 %v9719_v3 }
 0x4c1   : > { %6920 = vmatprep.subr.bf16.mxu1 %v9724_v33 }
 0x4c3   : > { %6858 = vmatmul.mubr.bf16.gmra.mrb[108].mxu1 %v11406_v24  ;;  %v9731_v24 = vld [vmem:[%s10249_s1 + $0x528] ss:$16 sps:$4 sm:$0xff]  }
 0x4c4   : > { %6867 = vmatprep.mubr.bf16.mxu1 %v11438_v39  ;;  %6921 = vmatpush1.bf16.msra.mxu1 %v9722_v62  ;;  %v9736_v39 = vld [vmem:[%s10249_s1 + $0x54c] ss:$16 sps:$4 sm:$0xff]  }
 0x4c5   : > { %6922 = vmatprep.subr.bf16.mxu1 %v9727_v12 }
 0x4c8   : > { %6923 = vmatpush1.bf16.msra.mxu1 %v9725_v23 }
 0x4c9   : > { %6924 = vmatprep.subr.bf16.mxu1 %v9730_v46 }
 0x4cb   : > { %6868 = vmatmul.mubr.bf16.gmra.mrb[112].mxu1 %v11434_v28  ;;  %v9737_v28 = vld [vmem:[%s10249_s1 + $0x568] ss:$16 sps:$4 sm:$0xff]  }
 0x4cc   : > { %6877 = vmatprep.mubr.bf16.mxu1 %v11462_v49  ;;  %6925 = vmatpush1.bf16.msra.mxu1 %v9728_v19  ;;  %v9742_v49 = vld [vmem:[%s10249_s1 + $0x58c] ss:$16 sps:$4 sm:$0xff]  }
 0x4cd   : > { %6926 = vmatprep.subr.bf16.mxu1 %v9733_v58 }
 0x4d0   : > { %6927 = vmatpush1.bf16.msra.mxu1 %v9731_v24 }
 0x4d1   : > { %6928 = vmatprep.subr.bf16.mxu1 %v9736_v39 }
 0x4d3   : > { %6878 = vmatmul.mubr.bf16.gmra.mrb[116].mxu1 %v11458_v0  ;;  %v9748_v0 = vld [vmem:[%s10249_s1 + $0x5cc] ss:$16 sps:$4 sm:$0xff]  }
 0x4d4   : > { %6887 = vmatprep.mubr.bf16.mxu1 %v11486_v27  ;;  %6929 = vmatpush1.bf16.msra.mxu1 %v9734_v25  ;;  %v9746_v27 = vld [vmem:[%s10249_s1 + $0x5c8] ss:$16 sps:$4 sm:$0xff]   ;;  %s8211_s1 = sshll.u32 %s9959_s21, 12  ;;  %s9980_s21 = smov [#allocation10]  }
 0x4d5   : > { %6930 = vmatprep.subr.bf16.mxu1 %v9739_v4  ;;  %s11933_s26 = scalar_lea.hbm %s11990_s5, %s8211_s1  ;;  %s9881_s9 = sshll.u32 %s9980_s21, 4  ;;  %s9882_s9 = int_to_ptr.vmem [resolvable:$false] %s9881_s9 }
 0x4d6   : > { %s9883_s14 = scalar_lea.vmem %s9882_s9, 8192 }
 0x4d8   : > { %6931 = vmatpush1.bf16.msra.mxu1 %v9737_v28 }
 0x4d9   : > { %6932 = vmatprep.subr.bf16.mxu1 %v9742_v49 }
 0x4db   : > { %6888 = vmatmul.mubr.bf16.gmra.mrb[120].mxu1 %v11482_v50  ;;  %v12074_v50 = vld [vmem:[#allocation19_spill] sm:$0xff] }
 0x4dc   : > { %6897 = vmatprep.mubr.bf16.mxu1 %v11510_v44  ;;  %6933 = vmatpush1.bf16.msra.mxu1 %v9740_v17  ;;  %v11796_v44 = vsub.s32 2, %v12074_v50 }
 0x4dd   : > { %6934 = vmatprep.subr.bf16.mxu1 %v9745_v6 }
 0x4e0   : > { %6935 = vmatpush1.bf16.msra.mxu1 %v9743_v2 }
 0x4e1   : > { %6936 = vmatprep.subr.bf16.mxu1 %v9748_v0 }
 0x4e3   : > { %6898 = vmatmul.mubr.bf16.gmra.mrb[124].mxu1 %v11506_v38  ;;  %v5353_v38 = vsub.s32 6, %v12074_v50 }
 0x4e4   : > { %6937 = vmatpush1.bf16.msra.mxu1 %v9746_v27  ;;  %6940 = vmatprep.mubr.bf16.mxu1 %v11590_v47  ;;  %v5350_v47 = vrot.slane %v9755_v11, %v11796_v44 }
 0x4e5   : > { %6938 = vmatprep.subr.bf16.mxu1 %v9751_v10  ;;  %v5354_v9 = vrot.slane %v9755_v11, %v5353_v38 }
 0x4e8   : > { %6939 = vmatpush1.bf16.msra.mxu1 %v9749_v15 }
 0x4eb   : > { %6941 = vmatmul.mubr.bf16.vlgmr.msra.gmra.mrb[96].mxu1 %v11588_v16  ;;  %v11806_v16 = vrot.slane %v5350_v47, %v11796_v44 }
 0x4ec   : > { %6950 = vmatprep.mubr.bf16.mxu1 %v11604_v41 }
 0x4f3   : > { %6951 = vmatmul.mubr.bf16.gmra.mrb[100].mxu1 %v11602_v37  ;;  %v11810_v37 = vrot.slane %v5354_v9, %v11796_v44 }
 0x4f4   : > { %6960 = vmatprep.mubr.bf16.mxu1 %v11618_v59 }
 0x4fb   : > { %6961 = vmatmul.mubr.bf16.gmra.mrb[104].mxu1 %v11616_v43 }
 0x4fc   : > { %6970 = vmatprep.mubr.bf16.mxu1 %v11632_v60 }
 0x4fe   : > { %v6603_v41 = vpop.f32.mrb[64].mxu1 }
 0x4ff   : > { %v8308_v59 = vadd.f32 %v6603_v41, %v11806_v16  ;;  %v6605_v48 = vpop.f32.mrb[65].mxu1 }
 0x500   : > { %v8309_v63 = vadd.f32 %v6605_v48, %v11810_v37  ;;  %v6607_v40 = vpop.f32.mrb[66].mxu1 }
 0x501   : > { %v7021_v45 = vmax.f32 %v8308_v59, 0.0  ;;  %v8310_v26 = vadd.f32 %v6607_v40, %v11806_v16  ;;  %v6609_v43 = vpop.f32.mrb[67].mxu1 }
 0x502   : > { %v7022_v22 = vmax.f32 %v8309_v63, 0.0  ;;  %v8311_v8 = vadd.f32 %v6609_v43, %v11810_v37 }
 0x503   : > { %v7025_v31 = vmax.f32 %v8310_v26, 0.0  ;;  %6971 = vmatmul.mubr.bf16.gmra.mrb[108].mxu1 %v11630_v53 }
 0x504   : > { %v8179_v60 = vpack.c.bf16 %v7022_v22, %v7021_v45  ;;  %v7026_v7 = vmax.f32 %v8311_v8, 0.0  ;;  %6980 = vmatprep.mubr.bf16.mxu1 %v11646_v34 }
 0x506   : > { %7277 = vst [vmem:[%s11819_s11] sm:$0xff] %v8179_v60  ;;  %v8181_v35 = vpack.c.bf16 %v7026_v7, %v7025_v31  ;;  %v6613_v51 = vpop.f32.mrb[68].mxu1 }
 0x507   : > { %v8312_v32 = vadd.f32 %v6613_v51, %v11806_v16  ;;  %v6615_v1 = vpop.f32.mrb[69].mxu1 }
 0x508   : > { %7279 = vst [vmem:[%s11819_s11 + $0x10] sm:$0xff] %v8181_v35  ;;  %v8313_v61 = vadd.f32 %v6615_v1, %v11810_v37  ;;  %v6617_v13 = vpop.f32.mrb[70].mxu1 }
 0x509   : > { %v7029_v53 = vmax.f32 %v8312_v32, 0.0  ;;  %v8314_v18 = vadd.f32 %v6617_v13, %v11806_v16  ;;  %v6619_v34 = vpop.f32.mrb[71].mxu1 }
 0x50a   : > { %v7030_v5 = vmax.f32 %v8313_v61, 0.0  ;;  %v8315_v20 = vadd.f32 %v6619_v34, %v11810_v37 }
 0x50b   : > { %v7033_v14 = vmax.f32 %v8314_v18, 0.0  ;;  %6981 = vmatmul.mubr.bf16.gmra.mrb[112].mxu1 %v11644_v54 }
 0x50c   : > { %v8183_v55 = vpack.c.bf16 %v7030_v5, %v7029_v53  ;;  %v7034_v57 = vmax.f32 %v8315_v20, 0.0  ;;  %6990 = vmatprep.mubr.bf16.mxu1 %v11660_v42 }
 0x50e   : > { %7281 = vst [vmem:[%s11819_s11 + $0x20] sm:$0xff] %v8183_v55  ;;  %v8185_v21 = vpack.c.bf16 %v7034_v57, %v7033_v14  ;;  %v6623_v3 = vpop.f32.mrb[72].mxu1 }
 0x50f   : > { %v8316_v33 = vadd.f32 %v6623_v3, %v11806_v16  ;;  %v6625_v62 = vpop.f32.mrb[73].mxu1 }
 0x510   : > { %7283 = vst [vmem:[%s11819_s11 + $0x30] sm:$0xff] %v8185_v21  ;;  %v8317_v12 = vadd.f32 %v6625_v62, %v11810_v37  ;;  %v6627_v23 = vpop.f32.mrb[74].mxu1 }
 0x511   : > { %v7037_v46 = vmax.f32 %v8316_v33, 0.0  ;;  %v8318_v19 = vadd.f32 %v6627_v23, %v11806_v16  ;;  %v6629_v54 = vpop.f32.mrb[75].mxu1 }
 0x512   : > { %v7038_v58 = vmax.f32 %v8317_v12, 0.0  ;;  %v8319_v24 = vadd.f32 %v6629_v54, %v11810_v37 }
 0x513   : > { %v7041_v42 = vmax.f32 %v8318_v19, 0.0  ;;  %6991 = vmatmul.mubr.bf16.gmra.mrb[116].mxu1 %v11658_v56 }
 0x514   : > { %v8187_v39 = vpack.c.bf16 %v7038_v58, %v7037_v46  ;;  %v7042_v25 = vmax.f32 %v8319_v24, 0.0  ;;  %7000 = vmatprep.mubr.bf16.mxu1 %v11674_v30 }
 0x516   : > { %7285 = vst [vmem:[%s11819_s11 + $0x40] sm:$0xff] %v8187_v39  ;;  %v8189_v4 = vpack.c.bf16 %v7042_v25, %v7041_v42  ;;  %v6633_v28 = vpop.f32.mrb[76].mxu1 }
 0x517   : > { %v8320_v49 = vadd.f32 %v6633_v28, %v11806_v16  ;;  %v6635_v17 = vpop.f32.mrb[77].mxu1 }
 0x518   : > { %7287 = vst [vmem:[%s11819_s11 + $0x50] sm:$0xff] %v8189_v4  ;;  %v8321_v6 = vadd.f32 %v6635_v17, %v11810_v37  ;;  %v6637_v2 = vpop.f32.mrb[78].mxu1 }
 0x519   : > { %v7045_v0 = vmax.f32 %v8320_v49, 0.0  ;;  %v8322_v27 = vadd.f32 %v6637_v2, %v11806_v16  ;;  %v6639_v56 = vpop.f32.mrb[79].mxu1 }
 0x51a   : > { %v7046_v10 = vmax.f32 %v8321_v6, 0.0  ;;  %v8323_v15 = vadd.f32 %v6639_v56, %v11810_v37 }
 0x51b   : > { %v7049_v30 = vmax.f32 %v8322_v27, 0.0  ;;  %7001 = vmatmul.mubr.bf16.gmra.mrb[120].mxu1 %v11672_v52 }
 0x51c   : > { %v8191_v11 = vpack.c.bf16 %v7046_v10, %v7045_v0  ;;  %v7050_v47 = vmax.f32 %v8323_v15, 0.0  ;;  %7010 = vmatprep.mubr.bf16.mxu1 %v11688_v29 }
 0x51e   : > { %7289 = vst [vmem:[%s11819_s11 + $0x60] sm:$0xff] %v8191_v11  ;;  %v8193_v9 = vpack.c.bf16 %v7050_v47, %v7049_v30  ;;  %v6643_v41 = vpop.f32.mrb[80].mxu1  ;;  %v9756_v11 = vld [vmem:[%s10252_s28 + $0x8] sm:$0x77]  ;;  %s7326_s28 = sshll.u32 %s11819_s11, 4  ;;  %s11935_s28 = int_to_ptr.vmem [resolvable:$true] %s7326_s28 }
 0x51f   : > { %v8324_v59 = vadd.f32 %v6643_v41, %v11806_v16  ;;  %v6645_v48 = vpop.f32.mrb[81].mxu1  ;;  %v5358_v47 = vrot.slane %v9756_v11, %v11796_v44  ;;  %s9877_s20 = scalar_lea.vmem %s11935_s28, 4096  ;;  %p9884_p7 = scmp.lt.s32.totalorder %s11935_s28, %s9882_s9 }
 0x520   : > { %7291 = vst [vmem:[%s11819_s11 + $0x70] sm:$0xff] %v8193_v9  ;;  %v8325_v63 = vadd.f32 %v6645_v48, %v11810_v37  ;;  %v6647_v40 = vpop.f32.mrb[82].mxu1  ;;  %v5362_v9 = vrot.slane %v9756_v11, %v5353_v38  ;;  %p9878_p13 = scmp.ne.s32.totalorder %s11935_s28, %s9877_s20  ;;  %p9885_p11 = scmp.lt.s32.totalorder %s9883_s14, %s9877_s20 }
 0x521   : > { %v7053_v45 = vmax.f32 %v8324_v59, 0.0  ;;  %v8326_v26 = vadd.f32 %v6647_v40, %v11806_v16  ;;  %v6649_v52 = vpop.f32.mrb[83].mxu1  ;;  %v11877_v41 = vrot.slane %v5358_v47, %v11796_v44 }
 0x522   : > { %v7054_v43 = vmax.f32 %v8325_v63, 0.0  ;;  %v8327_v22 = vadd.f32 %v6649_v52, %v11810_v37  ;;  %p9879_p10 = pnand %p9878_p13, %p12075_p9  ;;  %p9886_p2 = por %p9885_p11, %p9884_p7 }
 0x523   : > { %v7057_v29 = vmax.f32 %v8326_v26, 0.0  ;;  %7011 = vmatmul.mubr.bf16.gmra.mrb[124].mxu1 %v11686_v36 }
 0x524   : > { %v8195_v8 = vpack.c.bf16 %v7054_v43, %v7053_v45  ;;  %v7058_v31 = vmax.f32 %v8327_v22, 0.0  ;;  %p9880_p12 = pneg %p9879_p10 }
 0x526   : > { %7293 = vst [vmem:[%s11819_s11 + $0x80] sm:$0xff] %v8195_v8  ;;  %v8197_v60 = vpack.c.bf16 %v7058_v31, %v7057_v29  ;;  %v6653_v7 = vpop.f32.mrb[84].mxu1  ;;  %p9887_p4 = pnand %p9886_p2, %p9880_p12 }
 0x527   : > { %v8328_v35 = vadd.f32 %v6653_v7, %v11806_v16  ;;  %v6655_v51 = vpop.f32.mrb[85].mxu1 }
 0x528   : > { %7295 = vst [vmem:[%s11819_s11 + $0x90] sm:$0xff] %v8197_v60  ;;  %v8329_v32 = vadd.f32 %v6655_v51, %v11810_v37  ;;  %v6657_v1 = vpop.f32.mrb[86].mxu1 }
 0x529   : > { %v7061_v61 = vmax.f32 %v8328_v35, 0.0  ;;  %v8330_v13 = vadd.f32 %v6657_v1, %v11806_v16  ;;  %v6659_v53 = vpop.f32.mrb[87].mxu1 }
 0x52a   : > { %v7062_v18 = vmax.f32 %v8329_v32, 0.0  ;;  %v8331_v36 = vadd.f32 %v6659_v53, %v11810_v37 }
 0x52b   : > { %v7065_v34 = vmax.f32 %v8330_v13, 0.0 }
 0x52c   : > { %v8199_v5 = vpack.c.bf16 %v7062_v18, %v7061_v61  ;;  %v7066_v20 = vmax.f32 %v8331_v36, 0.0 }
 0x52e   : > { %7297 = vst [vmem:[%s11819_s11 + $0xa0] sm:$0xff] %v8199_v5  ;;  %v8201_v14 = vpack.c.bf16 %v7066_v20, %v7065_v34  ;;  %v6663_v55 = vpop.f32.mrb[88].mxu1 }
 0x52f   : > { %v8332_v57 = vadd.f32 %v6663_v55, %v11806_v16  ;;  %v6665_v21 = vpop.f32.mrb[89].mxu1 }
 0x530   : > { %7299 = vst [vmem:[%s11819_s11 + $0xb0] sm:$0xff] %v8201_v14  ;;  %v8333_v3 = vadd.f32 %v6665_v21, %v11810_v37  ;;  %v6667_v33 = vpop.f32.mrb[90].mxu1 }
 0x531   : > { %v7069_v62 = vmax.f32 %v8332_v57, 0.0  ;;  %v8334_v12 = vadd.f32 %v6667_v33, %v11806_v16  ;;  %v6669_v23 = vpop.f32.mrb[91].mxu1 }
 0x532   : > { %v7070_v46 = vmax.f32 %v8333_v3, 0.0  ;;  %v8335_v19 = vadd.f32 %v6669_v23, %v11810_v37 }
 0x533   : > { %v7073_v54 = vmax.f32 %v8334_v12, 0.0 }
 0x534   : > { %v8203_v58 = vpack.c.bf16 %v7070_v46, %v7069_v62  ;;  %v7074_v24 = vmax.f32 %v8335_v19, 0.0 }
 0x536   : > { %7301 = vst [vmem:[%s11819_s11 + $0xc0] sm:$0xff] %v8203_v58  ;;  %v8205_v42 = vpack.c.bf16 %v7074_v24, %v7073_v54  ;;  %v6673_v39 = vpop.f32.mrb[92].mxu1 }
 0x537   : > { %v8336_v25 = vadd.f32 %v6673_v39, %v11806_v16  ;;  %v6675_v4 = vpop.f32.mrb[93].mxu1 }
 0x538   : > { %7303 = vst [vmem:[%s11819_s11 + $0xd0] sm:$0xff] %v8205_v42  ;;  %v8337_v28 = vadd.f32 %v6675_v4, %v11810_v37  ;;  %v6677_v49 = vpop.f32.mrb[94].mxu1 }
 0x539   : > { %v7077_v17 = vmax.f32 %v8336_v25, 0.0  ;;  %v8338_v6 = vadd.f32 %v6677_v49, %v11806_v16  ;;  %v6679_v2 = vpop.f32.mrb[95].mxu1  ;;  %v11880_v16 = vrot.slane %v5362_v9, %v11796_v44 }
 0x53a   : > { %v7078_v0 = vmax.f32 %v8337_v28, 0.0  ;;  %v8339_v27 = vadd.f32 %v6679_v2, %v11810_v37 }
 0x53b   : > { %v7081_v56 = vmax.f32 %v8338_v6, 0.0 }
 0x53c   : > { %v8207_v10 = vpack.c.bf16 %v7078_v0, %v7077_v17  ;;  %v7082_v15 = vmax.f32 %v8339_v27, 0.0 }
 0x53e   : > { %7305 = vst [vmem:[%s11819_s11 + $0xe0] sm:$0xff] %v8207_v10  ;;  %v8209_v30 = vpack.c.bf16 %v7082_v15, %v7081_v56 }
 0x540   : > { %7307 = vst [vmem:[%s11819_s11 + $0xf0] sm:$0xff] %v8209_v30 }
 0x5be   : > { %v6942_v37 = vpop.f32.mrb[96].mxu1 }
 0x5bf   : > { %v8340_v59 = vadd.f32 %v6942_v37, %v11877_v41  ;;  %v6944_v48 = vpop.f32.mrb[97].mxu1 }
 0x5c0   : > { %v8341_v63 = vadd.f32 %v6944_v48, %v11880_v16  ;;  %v6946_v40 = vpop.f32.mrb[98].mxu1 }
 0x5c1   : > { %v7023_v45 = vmax.f32 %v8340_v59, 0.0  ;;  %v8342_v26 = vadd.f32 %v6946_v40, %v11877_v41  ;;  %v6948_v50 = vpop.f32.mrb[99].mxu1 }
 0x5c2   : > { %v7024_v38 = vmax.f32 %v8341_v63, 0.0  ;;  %v8343_v52 = vadd.f32 %v6948_v50, %v11880_v16 }
 0x5c3   : > { %v7027_v43 = vmax.f32 %v8342_v26, 0.0 }
 0x5c4   : > { %v8180_v22 = vpack.c.bf16 %v7024_v38, %v7023_v45  ;;  %v7028_v29 = vmax.f32 %v8343_v52, 0.0 }
 0x5c6   : > { %7278 = vst [vmem:[%s11819_s11 + $0x8] sm:$0xff] %v8180_v22  ;;  %v8182_v44 = vpack.c.bf16 %v7028_v29, %v7027_v43  ;;  %v6952_v8 = vpop.f32.mrb[100].mxu1 }
 0x5c7   : > { %v8344_v31 = vadd.f32 %v6952_v8, %v11877_v41  ;;  %v6954_v60 = vpop.f32.mrb[101].mxu1 }
 0x5c8   : > { %7280 = vst [vmem:[%s11819_s11 + $0x18] sm:$0xff] %v8182_v44  ;;  %v8345_v7 = vadd.f32 %v6954_v60, %v11880_v16  ;;  %v6956_v35 = vpop.f32.mrb[102].mxu1 }
 0x5c9   : > { %v7031_v51 = vmax.f32 %v8344_v31, 0.0  ;;  %v8346_v32 = vadd.f32 %v6956_v35, %v11877_v41  ;;  %v6958_v1 = vpop.f32.mrb[103].mxu1 }
 0x5ca   : > { %v7032_v61 = vmax.f32 %v8345_v7, 0.0  ;;  %v8347_v13 = vadd.f32 %v6958_v1, %v11880_v16 }
 0x5cb   : > { %v7035_v53 = vmax.f32 %v8346_v32, 0.0 }
 0x5cc   : > { %v8184_v18 = vpack.c.bf16 %v7032_v61, %v7031_v51  ;;  %v7036_v36 = vmax.f32 %v8347_v13, 0.0 }
 0x5ce   : > { %7282 = vst [vmem:[%s11819_s11 + $0x28] sm:$0xff] %v8184_v18  ;;  %v8186_v34 = vpack.c.bf16 %v7036_v36, %v7035_v53  ;;  %v6962_v5 = vpop.f32.mrb[104].mxu1 }
 0x5cf   : > { %v8348_v20 = vadd.f32 %v6962_v5, %v11877_v41  ;;  %v6964_v14 = vpop.f32.mrb[105].mxu1 }
 0x5d0   : > { %7284 = vst [vmem:[%s11819_s11 + $0x38] sm:$0xff] %v8186_v34  ;;  %v8349_v55 = vadd.f32 %v6964_v14, %v11880_v16  ;;  %v6966_v57 = vpop.f32.mrb[106].mxu1 }
 0x5d1   : > { %v7039_v21 = vmax.f32 %v8348_v20, 0.0  ;;  %v8350_v3 = vadd.f32 %v6966_v57, %v11877_v41  ;;  %v6968_v33 = vpop.f32.mrb[107].mxu1 }
 0x5d2   : > { %v7040_v62 = vmax.f32 %v8349_v55, 0.0  ;;  %v8351_v12 = vadd.f32 %v6968_v33, %v11880_v16 }
 0x5d3   : > { %v7043_v23 = vmax.f32 %v8350_v3, 0.0 }
 0x5d4   : > { %v8188_v46 = vpack.c.bf16 %v7040_v62, %v7039_v21  ;;  %v7044_v19 = vmax.f32 %v8351_v12, 0.0 }
 0x5d6   : > { %7286 = vst [vmem:[%s11819_s11 + $0x48] sm:$0xff] %v8188_v46  ;;  %v8190_v54 = vpack.c.bf16 %v7044_v19, %v7043_v23  ;;  %v6972_v58 = vpop.f32.mrb[108].mxu1 }
 0x5d7   : > { %v8352_v24 = vadd.f32 %v6972_v58, %v11877_v41  ;;  %v6974_v42 = vpop.f32.mrb[109].mxu1 }
 0x5d8   : > { %7288 = vst [vmem:[%s11819_s11 + $0x58] sm:$0xff] %v8190_v54  ;;  %v8353_v39 = vadd.f32 %v6974_v42, %v11880_v16  ;;  %v6976_v25 = vpop.f32.mrb[110].mxu1 }
 0x5d9   : > { %v7047_v4 = vmax.f32 %v8352_v24, 0.0  ;;  %v8354_v28 = vadd.f32 %v6976_v25, %v11877_v41  ;;  %v6978_v49 = vpop.f32.mrb[111].mxu1 }
 0x5da   : > { %v7048_v17 = vmax.f32 %v8353_v39, 0.0  ;;  %v8355_v6 = vadd.f32 %v6978_v49, %v11880_v16 }
 0x5db   : > { %v7051_v2 = vmax.f32 %v8354_v28, 0.0 }
 0x5dc   : > { %v8192_v0 = vpack.c.bf16 %v7048_v17, %v7047_v4  ;;  %v7052_v27 = vmax.f32 %v8355_v6, 0.0 }
 0x5de   : > { %7290 = vst [vmem:[%s11819_s11 + $0x68] sm:$0xff] %v8192_v0  ;;  %v8194_v56 = vpack.c.bf16 %v7052_v27, %v7051_v2  ;;  %v6982_v10 = vpop.f32.mrb[112].mxu1 }
 0x5df   : > { %v8356_v15 = vadd.f32 %v6982_v10, %v11877_v41  ;;  %v6984_v30 = vpop.f32.mrb[113].mxu1 }
 0x5e0   : > { %7292 = vst [vmem:[%s11819_s11 + $0x78] sm:$0xff] %v8194_v56  ;;  %v8357_v11 = vadd.f32 %v6984_v30, %v11880_v16  ;;  %v6986_v47 = vpop.f32.mrb[114].mxu1 }
 0x5e1   : > { %v7055_v9 = vmax.f32 %v8356_v15, 0.0  ;;  %v8358_v37 = vadd.f32 %v6986_v47, %v11877_v41  ;;  %v6988_v59 = vpop.f32.mrb[115].mxu1 }
 0x5e2   : > { %v7056_v48 = vmax.f32 %v8357_v11, 0.0  ;;  %v8359_v63 = vadd.f32 %v6988_v59, %v11880_v16 }
 0x5e3   : > { %v7059_v40 = vmax.f32 %v8358_v37, 0.0 }
 0x5e4   : > { %v8196_v45 = vpack.c.bf16 %v7056_v48, %v7055_v9  ;;  %v7060_v26 = vmax.f32 %v8359_v63, 0.0 }
 0x5e6   : > { %7294 = vst [vmem:[%s11819_s11 + $0x88] sm:$0xff] %v8196_v45  ;;  %v8198_v50 = vpack.c.bf16 %v7060_v26, %v7059_v40  ;;  %v6992_v38 = vpop.f32.mrb[116].mxu1 }
 0x5e7   : > { %v8360_v52 = vadd.f32 %v6992_v38, %v11877_v41  ;;  %v6994_v43 = vpop.f32.mrb[117].mxu1 }
 0x5e8   : > { %7296 = vst [vmem:[%s11819_s11 + $0x98] sm:$0xff] %v8198_v50  ;;  %v8361_v22 = vadd.f32 %v6994_v43, %v11880_v16  ;;  %v6996_v29 = vpop.f32.mrb[118].mxu1 }
 0x5e9   : > { %v7063_v44 = vmax.f32 %v8360_v52, 0.0  ;;  %v8362_v8 = vadd.f32 %v6996_v29, %v11877_v41  ;;  %v6998_v31 = vpop.f32.mrb[119].mxu1 }
 0x5ea   : > { %v7064_v60 = vmax.f32 %v8361_v22, 0.0  ;;  %v8363_v7 = vadd.f32 %v6998_v31, %v11880_v16 }
 0x5eb   : > { %v7067_v35 = vmax.f32 %v8362_v8, 0.0 }
 0x5ec   : > { %v8200_v51 = vpack.c.bf16 %v7064_v60, %v7063_v44  ;;  %v7068_v32 = vmax.f32 %v8363_v7, 0.0 }
 0x5ee   : > { %7298 = vst [vmem:[%s11819_s11 + $0xa8] sm:$0xff] %v8200_v51  ;;  %v8202_v1 = vpack.c.bf16 %v7068_v32, %v7067_v35  ;;  %v7002_v61 = vpop.f32.mrb[120].mxu1 }
 0x5ef   : > { %v8364_v13 = vadd.f32 %v7002_v61, %v11877_v41  ;;  %v7004_v53 = vpop.f32.mrb[121].mxu1 }
 0x5f0   : > { %7300 = vst [vmem:[%s11819_s11 + $0xb8] sm:$0xff] %v8202_v1  ;;  %v8365_v18 = vadd.f32 %v7004_v53, %v11880_v16  ;;  %v7006_v36 = vpop.f32.mrb[122].mxu1 }
 0x5f1   : > { %v7071_v34 = vmax.f32 %v8364_v13, 0.0  ;;  %v8366_v5 = vadd.f32 %v7006_v36, %v11877_v41  ;;  %v7008_v20 = vpop.f32.mrb[123].mxu1 }
 0x5f2   : > { %v7072_v14 = vmax.f32 %v8365_v18, 0.0  ;;  %v8367_v55 = vadd.f32 %v7008_v20, %v11880_v16 }
 0x5f3   : > { %v7075_v57 = vmax.f32 %v8366_v5, 0.0 }
 0x5f4   : > { %v8204_v21 = vpack.c.bf16 %v7072_v14, %v7071_v34  ;;  %v7076_v3 = vmax.f32 %v8367_v55, 0.0 }
 0x5f6   : > { %7302 = vst [vmem:[%s11819_s11 + $0xc8] sm:$0xff] %v8204_v21  ;;  %v8206_v33 = vpack.c.bf16 %v7076_v3, %v7075_v57  ;;  %v7012_v62 = vpop.f32.mrb[124].mxu1 }
 0x5f7   : > { %v8368_v12 = vadd.f32 %v7012_v62, %v11877_v41  ;;  %v7014_v23 = vpop.f32.mrb[125].mxu1 }
 0x5f8   : > { %7304 = vst [vmem:[%s11819_s11 + $0xd8] sm:$0xff] %v8206_v33  ;;  %v8369_v46 = vadd.f32 %v7014_v23, %v11880_v16  ;;  %v7016_v19 = vpop.f32.mrb[126].mxu1 }
 0x5f9   : > { %v7079_v54 = vmax.f32 %v8368_v12, 0.0  ;;  %v8370_v58 = vadd.f32 %v7016_v19, %v11877_v41  ;;  %v7018_v24 = vpop.f32.mrb[127].mxu1 }
 0x5fa   : > { %v7080_v42 = vmax.f32 %v8369_v46, 0.0  ;;  %v8371_v39 = vadd.f32 %v7018_v24, %v11880_v16 }
 0x5fb   : > { %v7083_v25 = vmax.f32 %v8370_v58, 0.0 }
 0x5fc   : > { %v8208_v4 = vpack.c.bf16 %v7080_v42, %v7079_v54  ;;  %v7084_v28 = vmax.f32 %v8371_v39, 0.0 }
 0x5fe   : > { %7306 = vst [vmem:[%s11819_s11 + $0xe8] sm:$0xff] %v8208_v4  ;;  %v8210_v41 = vpack.c.bf16 %v7084_v28, %v7083_v25 }
 0x600   : > { %7308 = vst [vmem:[%s11819_s11 + $0xf8] sm:$0xff] %v8210_v41 }
 0x601   : > { %9890 = shalt.err (!%p9887_p4)
}
 0x602   : > { %s9891_s2 = scalar_lea.hbm %s11933_s26, 4096  ;;  %s9895_s12 = scalar_lea.hbm %s11990_s5, 12288 }
 0x603   : > { %p9892_p0 = scmp.ne.s32.totalorder %s11933_s26, %s9891_s2  ;;  %p9896_p8 = scmp.lt.u32.totalorder %s11933_s26, %s11990_s5 }
 0x604   : > { %p9897_p3 = scmp.lt.u32.totalorder %s9895_s12, %s9891_s2  ;;  %p9899_p13 = scmp.lt.u32.totalorder %s9891_s2, %s11933_s26 }
 0x605   : > { %p9893_p5 = pnand %p9892_p0, %p12075_p9 }
 0x606   : > { %p9898_p1 = por %p9897_p3, %p9896_p8 }
 0x607   : > { %p9894_p6 = pneg %p9893_p5 }
 0x608   : > { %p9900_p10 = por %p9899_p13, %p9898_p1 }
 0x60a   : > { %p9901_p12 = pnand %p9900_p10, %p9894_p6 }
 0x60c   : > { %9904 = shalt.err (!%p9901_p12)
}
 0x60d   : > { %s9981_s16 = smov 256   ;;  %s9982_s10 = smov 16  }
 0x60e   : > { %8802 = dma.vmem_to_hbm [thread:$0]  (%p12075_p9), %s11935_s28, 4096, %s11933_s26, %s7310_s8, %s9981_s16, %s9981_s16, %s9982_s10  }
 0x60f PF: > { %s12076_s27 = sld [smem:[#allocation18_spill]]  ;;  %p8822_p7 = scmp.ge.s32.totalorder %s9967_s23, 2 }
 0x610   : > { %s7341_s13 = sand.u32 1, %s9947_s18  }
 0x611   : > { %s7342_s11 = scalar_lea.sflag [#allocation4], %s7341_s13 }
 0x615   : > { %p12077_p11 = scmp.ne.s32.totalorder %s12076_s27, 0 }
 0x617   : > { %p8818_p2 = pnand %p8822_p7, %p12077_p11 }
 0x619   : > { %9942 = dma.done.wait (!%p8818_p2), %s7342_s11, 4096  }
 0x61a   : > { %9944 = vsyncadd (!%p8818_p2), %s7342_s11, 4294963200  ;;  %s27_s23 = sadd.s32 1, %s9967_s23   ;;  %s12078_s1 = sld [smem:[#allocation15_spill]] }
 0x61b   : > { %p24_p4 = scmp.ge.s32.totalorder %s27_s23, 5   ;;  %s12079_s20 = sld [smem:[#allocation17_spill]] }
 0x61c   : > { %s12080_s6 = sld [smem:[#allocation16_spill]]  ;;  %s12081_s18 = smov %s9951_s19 }
 0x61d   : > { %s12083_s21 = smov %s9963_s22  ;;  %26 = sbr.rel (!%p24_p4) target bundleno = 13 (0xd), region = 125 }
 0x620   : > { %s12082_s19 = smov %s12078_s1 }
 0x622   : > { %s12084_s22 = smov %s12080_s6 }
 0x624   :  { %7347 = vsyncpa [#allocation3], 1 }
 0x625   :  { %7349 = vsyncpa [#allocation3 + $0x1], 1 }
 0x626   :  { %7350 = vsyncpa [#allocation6], 1 }
 0x627   :  { %7352 = vsyncpa [#allocation6 + $0x1], 1 }
 0x628   :  { %7353 = vsyncpa [#allocation9], 1 }
 0x629   :  { %7355 = vsyncpa [#allocation9 + $0x1], 1 }
 0x62a   :  { %7356 = vsyncpa [#allocation4], 1 }
 0x62b   :  { %7358 = vsyncpa [#allocation4 + $0x1], 1 }

</bundles_post_ra>
